<compile_context>
chip_gen: v6e
topology: v6e:2x2x1
jax: 0.10.0
libtpu: 0.0.40
codegen_flags: <defaults>
</compile_context>

<pallas_src>
import functools
import math

import jax
import jax.numpy as jnp
import numpy as np
from jax.experimental import pallas as pl
from jax.experimental.pallas import tpu as pltpu

MATMUL_DTYPE = jnp.bfloat16   # MXU operand dtype; accumulation stays f32
ACT_DTYPE = jnp.bfloat16      # inter-kernel activation slabs (qkv / attn out)
LN_EPS = 1e-5
LANE = 128


# ------------------------------- helpers -----------------------------------

def _ceil_to(n, m):
    return ((n + m - 1) // m) * m


def _divisor_block(n, cap):
    """Largest divisor of n that is <= cap (n itself when n <= cap)."""
    if n <= cap:
        return n
    for d in range(cap, 0, -1):
        if n % d == 0:
            return d
    return n


def _pad_cols(a, target):
    pad = target - a.shape[-1]
    if pad <= 0:
        return a
    widths = [(0, 0)] * (a.ndim - 1) + [(0, pad)]
    return jnp.pad(a, widths)


def _layernorm_f32(x, g, b, eps):
    mean = jnp.mean(x, axis=-1, keepdims=True)
    var = jnp.mean(jnp.square(x - mean), axis=-1, keepdims=True)
    return (x - mean) * jax.lax.rsqrt(var + eps) * g + b


def _gelu_exact(x):  # matches torch.nn.GELU default (erf form)
    return 0.5 * x * (1.0 + jax.lax.erf(x * (1.0 / math.sqrt(2.0))))


# ----------------------------- Pallas kernels -------------------------------

def _ln_qkv_kernel(x_ref, g_ref, b_ref, w_ref, wb_ref, o_ref, *, eps):
    """o = LayerNorm(x[:, :C]) @ Wqkv + b   (lane-dense padded output)."""
    C = g_ref.shape[1]
    x = x_ref[:, :C].astype(jnp.float32)
    xn = _layernorm_f32(x, g_ref[...], b_ref[...], eps)
    y = jnp.dot(xn.astype(w_ref.dtype), w_ref[...],
                preferred_element_type=jnp.float32) + wb_ref[...]
    o_ref[...] = y.astype(o_ref.dtype)


def ln_qkv(x_pad, g, b, w, wb, *, eps=LN_EPS, max_rows=512):
    R, Cp = x_pad.shape
    C3p = w.shape[1]
    br = _divisor_block(R, max_rows)
    return pl.pallas_call(
        functools.partial(_ln_qkv_kernel, eps=eps),
        out_shape=jax.ShapeDtypeStruct((R, C3p), ACT_DTYPE),
        grid=(R // br,),
        in_specs=[
            pl.BlockSpec((br, Cp), lambda i: (i, 0)),
            pl.BlockSpec(g.shape, lambda i: (0, 0)),
            pl.BlockSpec(b.shape, lambda i: (0, 0)),
            pl.BlockSpec(w.shape, lambda i: (0, 0)),
            pl.BlockSpec(wb.shape, lambda i: (0, 0)),
        ],
        out_specs=pl.BlockSpec((br, C3p), lambda i: (i, 0)),
        compiler_params=pltpu.CompilerParams(dimension_semantics=("parallel",)),
    )(x_pad, g, b, w, wb)


def _attn_proj_kernel(q_ref, k_ref, v_ref, bias_ref, pw_ref, pb_ref, o_ref):
    """Batched window attention for all heads + fused output projection.

    q/k/v : (bw, nh, N, hd) bf16 (q already scaled)
    bias  : (bw, nh, N, N)  f32  (rel-pos bias + optional shift mask, combined)
    pw    : (nh, hd, Cp)    bf16 (proj weight rows grouped per head)
    pb    : (1, Cp)         f32
    o     : (bw, N, Cp)     bf16 (heads merged through the projection)
    """
    bw, nh, N, hd = q_ref.shape
    Cp = pw_ref.shape[-1]

    # Leading-dim merges only (layout-free).
    q = q_ref[...].reshape(bw * nh, N, hd)
    k = k_ref[...].reshape(bw * nh, N, hd)
    v = v_ref[...].reshape(bw * nh, N, hd)

    # Two batched einsums for ALL (window, head) pairs.
    s = jnp.einsum('bqd,bkd->bqk', q, k,
                   preferred_element_type=jnp.float32)            # (bw*nh, N, N)
    s = s + bias_ref[...].reshape(bw * nh, N, N)
    s = s - jnp.max(s, axis=-1, keepdims=True)
    p = jnp.exp(s)
    p = p / jnp.sum(p, axis=-1, keepdims=True)                    # exact softmax
    o = jnp.einsum('bqk,bkd->bqd', p.astype(v.dtype), v,
                   preferred_element_type=jnp.float32)            # (bw*nh, N, hd)
    o = o.reshape(bw, nh, N, hd)                                  # leading split

    # Fused output projection: heads merged via per-head partial sums
    # (leading-dim slices of o, leading-dim slices of pw -> no lane relayouts).
    pw = pw_ref[...]
    acc = jnp.zeros((bw, N, Cp), jnp.float32) + pb_ref[...]
    for h in range(nh):                                           # static unroll
        acc = acc + jnp.einsum('bnd,dc->bnc',
                               o[:, h].astype(pw.dtype), pw[h],
                               preferred_element_type=jnp.float32)
    o_ref[...] = acc.astype(o_ref.dtype)


def attn_proj(q, k, v, bias, pw, pb, *, max_windows=64):
    B_, nh, N, hd = q.shape
    Cp = pw.shape[-1]
    bw = _divisor_block(B_, max_windows)    # bounds VMEM at production sizes
    return pl.pallas_call(
        _attn_proj_kernel,
        out_shape=jax.ShapeDtypeStruct((B_, N, Cp), ACT_DTYPE),
        grid=(B_ // bw,),
        in_specs=[
            pl.BlockSpec((bw, nh, N, hd), lambda i: (i, 0, 0, 0)),
            pl.BlockSpec((bw, nh, N, hd), lambda i: (i, 0, 0, 0)),
            pl.BlockSpec((bw, nh, N, hd), lambda i: (i, 0, 0, 0)),
            pl.BlockSpec((bw, nh, N, N), lambda i: (i, 0, 0, 0)),
            pl.BlockSpec(pw.shape, lambda i: (0, 0, 0)),
            pl.BlockSpec(pb.shape, lambda i: (0, 0)),
        ],
        out_specs=pl.BlockSpec((bw, N, Cp), lambda i: (i, 0, 0)),
        compiler_params=pltpu.CompilerParams(dimension_semantics=("parallel",)),
    )(q, k, v, bias, pw, pb)


def _add_ln_mlp_kernel(s_ref, a_ref, g_ref, b_ref, w1_ref, b1_ref, w2_ref,
                       b2_ref, o_ref, *, eps):
    """x = shortcut + attn ;  o = x + fc2(gelu(fc1(LN(x[:, :C]))))."""
    C = g_ref.shape[1]
    x_full = s_ref[...].astype(jnp.float32) + a_ref[...].astype(jnp.float32)
    xn = _layernorm_f32(x_full[:, :C], g_ref[...], b_ref[...], eps)
    h = jnp.dot(xn.astype(w1_ref.dtype), w1_ref[...],
                preferred_element_type=jnp.float32) + b1_ref[...]
    h = _gelu_exact(h)
    y = jnp.dot(h.astype(w2_ref.dtype), w2_ref[...],
                preferred_element_type=jnp.float32) + b2_ref[...]
    o_ref[...] = (x_full + y).astype(o_ref.dtype)   # pad columns stay 0


def add_ln_mlp(shortcut_pad, attn_pad, g, b, w1, b1, w2, b2, *, eps=LN_EPS,
               max_rows=512):
    R, Cp = shortcut_pad.shape
    Hp = w1.shape[1]
    br = _divisor_block(R, max_rows)
    return pl.pallas_call(
        functools.partial(_add_ln_mlp_kernel, eps=eps),
        out_shape=jax.ShapeDtypeStruct((R, Cp), jnp.float32),
        grid=(R // br,),
        in_specs=[
            pl.BlockSpec((br, Cp), lambda i: (i, 0)),
            pl.BlockSpec((br, Cp), lambda i: (i, 0)),
            pl.BlockSpec(g.shape, lambda i: (0, 0)),
            pl.BlockSpec(b.shape, lambda i: (0, 0)),
            pl.BlockSpec(w1.shape, lambda i: (0, 0)),
            pl.BlockSpec(b1.shape, lambda i: (0, 0)),
            pl.BlockSpec(w2.shape, lambda i: (0, 0)),
            pl.BlockSpec(b2.shape, lambda i: (0, 0)),
        ],
        out_specs=pl.BlockSpec((br, Cp), lambda i: (i, 0)),
        compiler_params=pltpu.CompilerParams(dimension_semantics=("parallel",)),
    )(shortcut_pad, attn_pad, g, b, w1, b1, w2, b2)


# ------------------------------- glue (JAX) ---------------------------------

def window_partition(x, ws):
    B, H, W, C = x.shape
    x = x.reshape(B, H // ws, ws, W // ws, ws, C)
    return x.transpose(0, 1, 3, 2, 4, 5).reshape(-1, ws, ws, C)


def window_reverse(windows, ws, H, W):
    B = windows.shape[0] // (H * W // ws // ws)
    x = windows.reshape(B, H // ws, W // ws, ws, ws, -1)
    return x.transpose(0, 1, 3, 2, 4, 5).reshape(B, H, W, -1)


def build_relative_position_index(ws):
    coords = np.stack(np.meshgrid(np.arange(ws), np.arange(ws), indexing="ij"))
    coords_flat = coords.reshape(2, -1)
    rel = coords_flat[:, :, None] - coords_flat[:, None, :]
    rel = rel.transpose(1, 2, 0).astype(np.int64)
    rel[:, :, 0] += ws - 1
    rel[:, :, 1] += ws - 1
    rel[:, :, 0] *= 2 * ws - 1
    return rel.sum(-1).astype(np.int32)                    # (ws*ws, ws*ws)


def build_attn_mask(H, W, ws, shift):
    img_mask = np.zeros((1, H, W, 1), np.float32)
    slices = (slice(0, -ws), slice(-ws, -shift), slice(-shift, None))
    cnt = 0
    for h in slices:
        for w in slices:
            img_mask[:, h, w, :] = cnt
            cnt += 1
    mw = img_mask.reshape(1, H // ws, ws, W // ws, ws, 1)
    mw = mw.transpose(0, 1, 3, 2, 4, 5).reshape(-1, ws * ws)      # (nW, M)
    diff = mw[:, None, :] - mw[:, :, None]                        # (nW, M, M)
    return np.where(diff != 0, -100.0, 0.0).astype(np.float32)


def swin_block_forward(p, x_pad, ids_keep, *, B, H, W, C, shift_size, num_heads,
                       rpi, attn_mask):
    L = H * W
    K = ids_keep.shape[1]
    nws = int(math.sqrt(K))          # new_window_size (from kept tokens)
    N = nws * nws
    hd = C // num_heads
    Cp = x_pad.shape[1]

    # --- (1) fused LN1 -> QKV on the whole padded token slab -----------------
    qkv = ln_qkv(x_pad, p["norm1_g"], p["norm1_b"], p["qkv_w"], p["qkv_b"])

    # XLA glue (fused gather): drop pad cols, roll, window partition, head split
    qkv = qkv[:, :3 * C].reshape(B, H, W, 3 * C)
    if shift_size > 0:
        qkv = jnp.roll(qkv, shift=(-shift_size, -shift_size), axis=(1, 2))
    qkv_win = window_partition(qkv, nws).reshape(-1, N, 3, num_heads, hd)
    qkv_win = qkv_win.transpose(2, 0, 3, 1, 4)              # (3, B_, nh, N, hd)
    q, k, v = qkv_win[0], qkv_win[1], qkv_win[2]
    B_ = q.shape[0]

    # --- combined rel-pos bias + shift mask (window-major, heads on dim 1) ---
    rpi_m = rpi[ids_keep[:, :, None], ids_keep[:, None, :]]        # (B, N, N)
    rel_bias = p["rel_bias_table"][rpi_m].transpose(0, 3, 1, 2)    # (B, nh, N, N)
    # torch `.repeat(B_/B, 1, 1, 1)`: flat window i uses bias[i % B]
    bias = jnp.tile(rel_bias.astype(jnp.float32), (B_ // B, 1, 1, 1))
    if shift_size > 0 and attn_mask is not None:
        nW = attn_mask.shape[0]
        mask_rep = jnp.tile(attn_mask, (B_ // nW, 1, 1))           # i -> i % nW
        ids_rep = jnp.tile(ids_keep, (B_ // B, 1))                 # i -> i % B
        bidx = jnp.arange(B_)[:, None, None]
        mask_g = mask_rep[bidx, ids_rep[:, :, None], ids_rep[:, None, :]]
        bias = bias + mask_g[:, None, :, :].astype(jnp.float32)

    # --- (2) attention over all windows x heads + fused output projection ---
    aw = attn_proj(q, k, v, bias, p["proj_w"], p["proj_b"])        # (B_, N, Cp)

    # XLA glue: window reverse + roll back (pad channels carried through, =0)
    aw = aw.reshape(B_, nws, nws, Cp)
    xr = window_reverse(aw, nws, H, W)
    if shift_size > 0:
        xr = jnp.roll(xr, shift=(shift_size, shift_size), axis=(1, 2))
    attn_branch = xr.reshape(B * L, Cp)

    # --- (3) fused: (shortcut + attn) -> LN2 -> FC1+GELU -> FC2 -> +residual -
    return add_ln_mlp(x_pad, attn_branch, p["norm2_g"], p["norm2_b"],
                      p["fc1_w"], p["fc1_b"], p["fc2_w"], p["fc2_b"])


def basic_layer_forward(params_list, rank, x, ids_keep, *, num_heads,
                        window_size, rpi, attn_mask):
    B, L, C = x.shape
    H = W = int(math.sqrt(L))
    Cp = _ceil_to(C, LANE)
    x_pad = _pad_cols(x.reshape(B * L, C), Cp)          # lane-dense f32 trunk
    shift = window_size // 2
    for i, p in enumerate(params_list):
        ss = 0 if i % 2 == 0 else shift
        x_pad = swin_block_forward(
            p, x_pad, ids_keep, B=B, H=H, W=W, C=C, shift_size=ss,
            num_heads=num_heads, rpi=rpi,
            attn_mask=attn_mask if ss > 0 else None)
    x_out = x_pad[:, :C].reshape(B, L, C)
    # downsample=None in this config -> nothing to do
    return rank, x_out, ids_keep


# ----------------------------- parameter init -------------------------------

def init_block_params(key, dim, num_heads, window_size, mlp_ratio):
    hidden = int(dim * mlp_ratio)
    table_len = (2 * window_size - 1) ** 2
    ks = jax.random.split(key, 8)

    def nrm(k, shape, s=0.02):
        return (s * jax.random.normal(k, shape)).astype(jnp.float32)

    return {
        "norm1_g": jnp.ones((dim,), jnp.float32),
        "norm1_b": jnp.zeros((dim,), jnp.float32),
        "norm2_g": jnp.ones((dim,), jnp.float32),
        "norm2_b": jnp.zeros((dim,), jnp.float32),
        "qkv_w": nrm(ks[0], (3 * dim, dim)),          # torch Linear weight layout
        "qkv_b": nrm(ks[1], (3 * dim,), 0.01),
        "proj_w": nrm(ks[2], (dim, dim)),
        "proj_b": nrm(ks[3], (dim,), 0.01),
        "rel_bias_table": nrm(ks[4], (table_len, num_heads)),
        "fc1_w": nrm(ks[5], (hidden, dim)),
        "fc1_b": nrm(ks[6], (hidden,), 0.01),
        "fc2_w": nrm(ks[7], (dim, hidden)),
        "fc2_b": jnp.zeros((dim,), jnp.float32),
    }


def prepare_block_params(p, num_heads):
    """One-time layout prep (outside the per-step jit path):
      * weights transposed to (Cin, Cout), padded to lane-dense (128-multiple)
        output widths with zero columns, stored in bf16 (MXU operands),
      * the q scale (head_dim**-0.5) folded into the QKV weight & bias,
      * the proj weight reshaped (nh, hd, Cp) so the attention kernel merges
        heads with leading-dim slices only,
      * biases / LN params stored as (1, Cout) rows for lane-broadcast.
    """
    C = p["norm1_g"].shape[0]
    hd = C // num_heads
    hidden = p["fc1_w"].shape[0]
    Cp = _ceil_to(C, LANE)
    C3p = _ceil_to(3 * C, LANE)
    Hp = _ceil_to(hidden, LANE)

    scale = hd ** -0.5
    col_scale = jnp.concatenate([jnp.full((C,), scale, jnp.float32),
                                 jnp.ones((2 * C,), jnp.float32)])
    qkv_w = p["qkv_w"].T * col_scale[None, :]                     # (C, 3C)
    qkv_b = (p["qkv_b"] * col_scale).reshape(1, 3 * C)

    proj_w = _pad_cols(p["proj_w"].T, Cp)                         # (C, Cp)
    fc2_w = jnp.pad(p["fc2_w"].T, ((0, Hp - hidden), (0, 0)))     # (Hp, C)

    return {
        "norm1_g": p["norm1_g"].reshape(1, C),
        "norm1_b": p["norm1_b"].reshape(1, C),
        "norm2_g": p["norm2_g"].reshape(1, C),
        "norm2_b": p["norm2_b"].reshape(1, C),
        "qkv_w": _pad_cols(qkv_w, C3p).astype(MATMUL_DTYPE),      # (C, C3p)
        "qkv_b": _pad_cols(qkv_b, C3p),                           # (1, C3p) f32
        "proj_w": proj_w.reshape(num_heads, hd, Cp).astype(MATMUL_DTYPE),
        "proj_b": _pad_cols(p["proj_b"].reshape(1, C), Cp),       # (1, Cp) f32
        "rel_bias_table": p["rel_bias_table"],
        "fc1_w": _pad_cols(p["fc1_w"].T, Hp).astype(MATMUL_DTYPE),   # (C, Hp)
        "fc1_b": _pad_cols(p["fc1_b"].reshape(1, hidden), Hp),       # (1, Hp)
        "fc2_w": _pad_cols(fc2_w, Cp).astype(MATMUL_DTYPE),          # (Hp, Cp)
        "fc2_b": _pad_cols(p["fc2_b"].reshape(1, C), Cp),            # (1, Cp)
    }


# ---------------------------------- main -------------------------------------

if __name__ == "__main__":
    # BasicLayer config: dim=32, input_resolution=(8,8), depth=2, heads=4, ws=4
    B, L, C = 2, 16, 32          # tokens kept after masking: H = W = 4
    num_heads = 4
    window_size = 4
    input_resolution = (8, 8)
    depth = 2
    K = 4                        # kept tokens per window -> new_window_size = 2

    key = jax.random.PRNGKey(0)
    kx, kid, kp = jax.random.split(key, 3)

    x = jax.random.normal(kx, (B, L, C), dtype=jnp.float32)
    ids_keep = jnp.stack([
        jax.random.permutation(k, window_size * window_size)[:K]
        for k in jax.random.split(kid, B)
    ]).astype(jnp.int32)                                   # (B, K), values < ws*ws
    rank = jnp.int32(0)

    raw_params = [init_block_params(k, C, num_heads, window_size, 4.0)
                  for k in jax.random.split(kp, depth)]
    params = [prepare_block_params(p, num_heads) for p in raw_params]

    rpi = jnp.asarray(build_relative_position_index(window_size))
    attn_mask = jnp.asarray(
        build_attn_mask(input_resolution[0], input_resolution[1],
                        window_size, window_size // 2))

    fwd = jax.jit(functools.partial(
        basic_layer_forward, num_heads=num_heads, window_size=window_size,
        rpi=rpi, attn_mask=attn_mask))

    rank_out, x_out, ids_out = fwd(params, rank, x, ids_keep)
    jax.block_until_ready(x_out)
    assert x_out.shape == (B, L, C) and ids_out.shape == (B, K)
    assert bool(jnp.all(jnp.isfinite(x_out)))
    print("KERNEL_OK")
</pallas_src>

<mosaic_0001>
module attributes {stable_mosaic.version = 11 : i64} {
  func.func @_ln_qkv_kernel(%arg0: i32, %arg1: memref<32x128xf32, #tpu.memory_space<vmem>>, %arg2: memref<1x32xf32, #tpu.memory_space<vmem>>, %arg3: memref<1x32xf32, #tpu.memory_space<vmem>>, %arg4: memref<32x128xbf16, #tpu.memory_space<vmem>>, %arg5: memref<1x128xf32, #tpu.memory_space<vmem>>, %arg6: memref<32x128xbf16, #tpu.memory_space<vmem>>) attributes {dimension_semantics = [#tpu.dimension_semantics<parallel>], iteration_bounds = array<i64: 1>, scalar_prefetch = 0 : i64, scratch_operands = 0 : i64, tpu.core_type = #tpu.core_type<tc>, window_params = [{transform_indices = @transform_0, window_bounds = array<i64: 32, 128>}, {pipeline_mode = #tpu.pipeline_mode<synchronous>, transform_indices = @transform_1, window_bounds = array<i64: 1, 32>}, {pipeline_mode = #tpu.pipeline_mode<synchronous>, transform_indices = @transform_2, window_bounds = array<i64: 1, 32>}, {pipeline_mode = #tpu.pipeline_mode<synchronous>, transform_indices = @transform_3, window_bounds = array<i64: 32, 128>}, {pipeline_mode = #tpu.pipeline_mode<synchronous>, transform_indices = @transform_4, window_bounds = array<i64: 1, 128>}, {transform_indices = @transform_5, window_bounds = array<i64: 32, 128>}]} {
    %c0 = arith.constant 0 : index
    %c0_0 = arith.constant 0 : index
    %0 = vector.load %arg1[%c0, %c0_0] : memref<32x128xf32, #tpu.memory_space<vmem>>, vector<32x32xf32>
    %c0_1 = arith.constant 0 : index
    %c0_2 = arith.constant 0 : index
    %1 = vector.load %arg2[%c0_1, %c0_2] : memref<1x32xf32, #tpu.memory_space<vmem>>, vector<1x32xf32>
    %c0_3 = arith.constant 0 : index
    %c0_4 = arith.constant 0 : index
    %2 = vector.load %arg3[%c0_3, %c0_4] : memref<1x32xf32, #tpu.memory_space<vmem>>, vector<1x32xf32>
    %cst = arith.constant dense<0.000000e+00> : vector<32xf32>
    %3 = vector.multi_reduction <add>, %0, %cst [1] : vector<32x32xf32> to vector<32xf32>
    %4 = vector.shape_cast %3 : vector<32xf32> to vector<32x1xf32>
    %cst_5 = arith.constant 3.200000e+01 : f32
    %5 = vector.broadcast %cst_5 : f32 to vector<32x1xf32>
    %6 = arith.divf %4, %5 : vector<32x1xf32>
    %7 = vector.broadcast %6 : vector<32x1xf32> to vector<32x32xf32>
    %8 = arith.subf %0, %7 : vector<32x32xf32>
    %9 = arith.mulf %8, %8 : vector<32x32xf32>
    %cst_6 = arith.constant dense<0.000000e+00> : vector<32xf32>
    %10 = vector.multi_reduction <add>, %9, %cst_6 [1] : vector<32x32xf32> to vector<32xf32>
    %11 = vector.shape_cast %10 : vector<32xf32> to vector<32x1xf32>
    %cst_7 = arith.constant 3.200000e+01 : f32
    %12 = vector.broadcast %cst_7 : f32 to vector<32x1xf32>
    %13 = arith.divf %11, %12 : vector<32x1xf32>
    %14 = vector.broadcast %6 : vector<32x1xf32> to vector<32x32xf32>
    %15 = arith.subf %0, %14 : vector<32x32xf32>
    %cst_8 = arith.constant 9.99999974E-6 : f32
    %16 = vector.broadcast %cst_8 : f32 to vector<32x1xf32>
    %17 = arith.addf %13, %16 : vector<32x1xf32>
    %18 = math.rsqrt %17 : vector<32x1xf32>
    %19 = vector.broadcast %18 : vector<32x1xf32> to vector<32x32xf32>
    %20 = arith.mulf %15, %19 : vector<32x32xf32>
    %21 = vector.broadcast %1 : vector<1x32xf32> to vector<32x32xf32>
    %22 = arith.mulf %20, %21 : vector<32x32xf32>
    %23 = vector.broadcast %2 : vector<1x32xf32> to vector<32x32xf32>
    %24 = arith.addf %22, %23 : vector<32x32xf32>
    %25 = arith.truncf %24 : vector<32x32xf32> to vector<32x32xbf16>
    %c0_9 = arith.constant 0 : index
    %c0_10 = arith.constant 0 : index
    %26 = vector.load %arg4[%c0_9, %c0_10] : memref<32x128xbf16, #tpu.memory_space<vmem>>, vector<32x128xbf16>
    %cst_11 = arith.constant dense<0.000000e+00> : vector<32x128xf32>
    %27 = tpu.matmul %25, %26, %cst_11 {dimension_numbers = #tpu.dot_dimension_numbers<[1], [0], [0], [1], [0, 0, 1, 1], [], []>} : vector<32x32xbf16>, vector<32x128xbf16>, vector<32x128xf32> -> vector<32x128xf32>
    %c0_12 = arith.constant 0 : index
    %c0_13 = arith.constant 0 : index
    %28 = vector.load %arg5[%c0_12, %c0_13] : memref<1x128xf32, #tpu.memory_space<vmem>>, vector<1x128xf32>
    %29 = vector.broadcast %28 : vector<1x128xf32> to vector<32x128xf32>
    %30 = arith.addf %27, %29 : vector<32x128xf32>
    %31 = arith.truncf %30 : vector<32x128xf32> to vector<32x128xbf16>
    %c0_14 = arith.constant 0 : index
    %c0_15 = arith.constant 0 : index
    %32 = vector.load %arg6[%c0_14, %c0_15] : memref<32x128xbf16, #tpu.memory_space<vmem>>, vector<32x128xbf16>
    tpu.vector_store %arg6[%c0_14, %c0_15], %31 {strides = array<i32>} : memref<32x128xbf16, #tpu.memory_space<vmem>>, vector<32x128xbf16>,
    return
  }
  func.func @transform_0(%arg0: i32) -> (i32, i32) {
    %c0_i32 = arith.constant 0 : i32
    %c0_i32_0 = arith.constant 0 : i32
    return %arg0, %c0_i32 : i32, i32
  }
  func.func @transform_1(%arg0: i32) -> (i32, i32) {
    %c0_i32 = arith.constant 0 : i32
    %c0_i32_0 = arith.constant 0 : i32
    %c0_i32_1 = arith.constant 0 : i32
    return %c0_i32, %c0_i32_0 : i32, i32
  }
  func.func @transform_2(%arg0: i32) -> (i32, i32) {
    %c0_i32 = arith.constant 0 : i32
    %c0_i32_0 = arith.constant 0 : i32
    %c0_i32_1 = arith.constant 0 : i32
    return %c0_i32, %c0_i32_0 : i32, i32
  }
  func.func @transform_3(%arg0: i32) -> (i32, i32) {
    %c0_i32 = arith.constant 0 : i32
    %c0_i32_0 = arith.constant 0 : i32
    %c0_i32_1 = arith.constant 0 : i32
    return %c0_i32, %c0_i32_0 : i32, i32
  }
  func.func @transform_4(%arg0: i32) -> (i32, i32) {
    %c0_i32 = arith.constant 0 : i32
    %c0_i32_0 = arith.constant 0 : i32
    %c0_i32_1 = arith.constant 0 : i32
    return %c0_i32, %c0_i32_0 : i32, i32
  }
  func.func @transform_5(%arg0: i32) -> (i32, i32) {
    %c0_i32 = arith.constant 0 : i32
    %c0_i32_0 = arith.constant 0 : i32
    return %arg0, %c0_i32 : i32, i32
  }
}

module attributes {stable_mosaic.version = 11 : i64} {
  func.func @_add_ln_mlp_kernel(%arg0: i32, %arg1: memref<32x128xf32, #tpu.memory_space<vmem>>, %arg2: memref<32x128xbf16, #tpu.memory_space<vmem>>, %arg3: memref<1x32xf32, #tpu.memory_space<vmem>>, %arg4: memref<1x32xf32, #tpu.memory_space<vmem>>, %arg5: memref<32x128xbf16, #tpu.memory_space<vmem>>, %arg6: memref<1x128xf32, #tpu.memory_space<vmem>>, %arg7: memref<128x128xbf16, #tpu.memory_space<vmem>>, %arg8: memref<1x128xf32, #tpu.memory_space<vmem>>, %arg9: memref<32x128xf32, #tpu.memory_space<vmem>>) attributes {dimension_semantics = [#tpu.dimension_semantics<parallel>], iteration_bounds = array<i64: 1>, scalar_prefetch = 0 : i64, scratch_operands = 0 : i64, tpu.core_type = #tpu.core_type<tc>, window_params = [{transform_indices = @transform_0, window_bounds = array<i64: 32, 128>}, {transform_indices = @transform_1, window_bounds = array<i64: 32, 128>}, {pipeline_mode = #tpu.pipeline_mode<synchronous>, transform_indices = @transform_2, window_bounds = array<i64: 1, 32>}, {pipeline_mode = #tpu.pipeline_mode<synchronous>, transform_indices = @transform_3, window_bounds = array<i64: 1, 32>}, {pipeline_mode = #tpu.pipeline_mode<synchronous>, transform_indices = @transform_4, window_bounds = array<i64: 32, 128>}, {pipeline_mode = #tpu.pipeline_mode<synchronous>, transform_indices = @transform_5, window_bounds = array<i64: 1, 128>}, {pipeline_mode = #tpu.pipeline_mode<synchronous>, transform_indices = @transform_6, window_bounds = array<i64: 128, 128>}, {pipeline_mode = #tpu.pipeline_mode<synchronous>, transform_indices = @transform_7, window_bounds = array<i64: 1, 128>}, {transform_indices = @transform_8, window_bounds = array<i64: 32, 128>}]} {
    %c0 = arith.constant 0 : index
    %c0_0 = arith.constant 0 : index
    %0 = vector.load %arg1[%c0, %c0_0] : memref<32x128xf32, #tpu.memory_space<vmem>>, vector<32x128xf32>
    %c0_1 = arith.constant 0 : index
    %c0_2 = arith.constant 0 : index
    %1 = vector.load %arg2[%c0_1, %c0_2] : memref<32x128xbf16, #tpu.memory_space<vmem>>, vector<32x128xbf16>
    %2 = arith.extf %1 : vector<32x128xbf16> to vector<32x128xf32>
    %3 = arith.addf %0, %2 : vector<32x128xf32>
    %4 = vector.extract_strided_slice %3 {offsets = [0, 0], sizes = [32, 32], strides = [1, 1]} : vector<32x128xf32> to vector<32x32xf32>
    %c0_3 = arith.constant 0 : index
    %c0_4 = arith.constant 0 : index
    %5 = vector.load %arg3[%c0_3, %c0_4] : memref<1x32xf32, #tpu.memory_space<vmem>>, vector<1x32xf32>
    %c0_5 = arith.constant 0 : index
    %c0_6 = arith.constant 0 : index
    %6 = vector.load %arg4[%c0_5, %c0_6] : memref<1x32xf32, #tpu.memory_space<vmem>>, vector<1x32xf32>
    %cst = arith.constant dense<0.000000e+00> : vector<32xf32>
    %7 = vector.multi_reduction <add>, %4, %cst [1] : vector<32x32xf32> to vector<32xf32>
    %8 = vector.shape_cast %7 : vector<32xf32> to vector<32x1xf32>
    %cst_7 = arith.constant 3.200000e+01 : f32
    %9 = vector.broadcast %cst_7 : f32 to vector<32x1xf32>
    %10 = arith.divf %8, %9 : vector<32x1xf32>
    %11 = vector.broadcast %10 : vector<32x1xf32> to vector<32x32xf32>
    %12 = arith.subf %4, %11 : vector<32x32xf32>
    %13 = arith.mulf %12, %12 : vector<32x32xf32>
    %cst_8 = arith.constant dense<0.000000e+00> : vector<32xf32>
    %14 = vector.multi_reduction <add>, %13, %cst_8 [1] : vector<32x32xf32> to vector<32xf32>
    %15 = vector.shape_cast %14 : vector<32xf32> to vector<32x1xf32>
    %cst_9 = arith.constant 3.200000e+01 : f32
    %16 = vector.broadcast %cst_9 : f32 to vector<32x1xf32>
    %17 = arith.divf %15, %16 : vector<32x1xf32>
    %18 = vector.broadcast %10 : vector<32x1xf32> to vector<32x32xf32>
    %19 = arith.subf %4, %18 : vector<32x32xf32>
    %cst_10 = arith.constant 9.99999974E-6 : f32
    %20 = vector.broadcast %cst_10 : f32 to vector<32x1xf32>
    %21 = arith.addf %17, %20 : vector<32x1xf32>
    %22 = math.rsqrt %21 : vector<32x1xf32>
    %23 = vector.broadcast %22 : vector<32x1xf32> to vector<32x32xf32>
    %24 = arith.mulf %19, %23 : vector<32x32xf32>
    %25 = vector.broadcast %5 : vector<1x32xf32> to vector<32x32xf32>
    %26 = arith.mulf %24, %25 : vector<32x32xf32>
    %27 = vector.broadcast %6 : vector<1x32xf32> to vector<32x32xf32>
    %28 = arith.addf %26, %27 : vector<32x32xf32>
    %29 = arith.truncf %28 : vector<32x32xf32> to vector<32x32xbf16>
    %c0_11 = arith.constant 0 : index
    %c0_12 = arith.constant 0 : index
    %30 = vector.load %arg5[%c0_11, %c0_12] : memref<32x128xbf16, #tpu.memory_space<vmem>>, vector<32x128xbf16>
    %cst_13 = arith.constant dense<0.000000e+00> : vector<32x128xf32>
    %31 = tpu.matmul %29, %30, %cst_13 {dimension_numbers = #tpu.dot_dimension_numbers<[1], [0], [0], [1], [0, 0, 1, 1], [], []>} : vector<32x32xbf16>, vector<32x128xbf16>, vector<32x128xf32> -> vector<32x128xf32>
    %c0_14 = arith.constant 0 : index
    %c0_15 = arith.constant 0 : index
    %32 = vector.load %arg6[%c0_14, %c0_15] : memref<1x128xf32, #tpu.memory_space<vmem>>, vector<1x128xf32>
    %33 = vector.broadcast %32 : vector<1x128xf32> to vector<32x128xf32>
    %34 = arith.addf %31, %33 : vector<32x128xf32>
    %cst_16 = arith.constant 5.000000e-01 : f32
    %35 = vector.broadcast %cst_16 : f32 to vector<32x128xf32>
    %36 = arith.mulf %35, %34 : vector<32x128xf32>
    %cst_17 = arith.constant 0.707106769 : f32
    %37 = vector.broadcast %cst_17 : f32 to vector<32x128xf32>
    %38 = arith.mulf %34, %37 : vector<32x128xf32>
    %39 = math.erf %38 : vector<32x128xf32>
    %cst_18 = arith.constant 1.000000e+00 : f32
    %40 = vector.broadcast %cst_18 : f32 to vector<32x128xf32>
    %41 = arith.addf %40, %39 : vector<32x128xf32>
    %42 = arith.mulf %36, %41 : vector<32x128xf32>
    %43 = arith.truncf %42 : vector<32x128xf32> to vector<32x128xbf16>
    %c0_19 = arith.constant 0 : index
    %c0_20 = arith.constant 0 : index
    %44 = vector.load %arg7[%c0_19, %c0_20] : memref<128x128xbf16, #tpu.memory_space<vmem>>, vector<128x128xbf16>
    %cst_21 = arith.constant dense<0.000000e+00> : vector<32x128xf32>
    %45 = tpu.matmul %43, %44, %cst_21 {dimension_numbers = #tpu.dot_dimension_numbers<[1], [0], [0], [1], [0, 0, 1, 1], [], []>} : vector<32x128xbf16>, vector<128x128xbf16>, vector<32x128xf32> -> vector<32x128xf32>
    %c0_22 = arith.constant 0 : index
    %c0_23 = arith.constant 0 : index
    %46 = vector.load %arg8[%c0_22, %c0_23] : memref<1x128xf32, #tpu.memory_space<vmem>>, vector<1x128xf32>
    %47 = vector.broadcast %46 : vector<1x128xf32> to vector<32x128xf32>
    %48 = arith.addf %45, %47 : vector<32x128xf32>
    %49 = arith.addf %3, %48 : vector<32x128xf32>
    %c0_24 = arith.constant 0 : index
    %c0_25 = arith.constant 0 : index
    %50 = vector.load %arg9[%c0_24, %c0_25] : memref<32x128xf32, #tpu.memory_space<vmem>>, vector<32x128xf32>
    tpu.vector_store %arg9[%c0_24, %c0_25], %49 {strides = array<i32>} : memref<32x128xf32, #tpu.memory_space<vmem>>, vector<32x128xf32>,
    return
  }
  func.func @transform_0(%arg0: i32) -> (i32, i32) {
    %c0_i32 = arith.constant 0 : i32
    %c0_i32_0 = arith.constant 0 : i32
    return %arg0, %c0_i32 : i32, i32
  }
  func.func @transform_1(%arg0: i32) -> (i32, i32) {
    %c0_i32 = arith.constant 0 : i32
    %c0_i32_0 = arith.constant 0 : i32
    return %arg0, %c0_i32 : i32, i32
  }
  func.func @transform_2(%arg0: i32) -> (i32, i32) {
    %c0_i32 = arith.constant 0 : i32
    %c0_i32_0 = arith.constant 0 : i32
    %c0_i32_1 = arith.constant 0 : i32
    return %c0_i32, %c0_i32_0 : i32, i32
  }
  func.func @transform_3(%arg0: i32) -> (i32, i32) {
    %c0_i32 = arith.constant 0 : i32
    %c0_i32_0 = arith.constant 0 : i32
    %c0_i32_1 = arith.constant 0 : i32
    return %c0_i32, %c0_i32_0 : i32, i32
  }
  func.func @transform_4(%arg0: i32) -> (i32, i32) {
    %c0_i32 = arith.constant 0 : i32
    %c0_i32_0 = arith.constant 0 : i32
    %c0_i32_1 = arith.constant 0 : i32
    return %c0_i32, %c0_i32_0 : i32, i32
  }
  func.func @transform_5(%arg0: i32) -> (i32, i32) {
    %c0_i32 = arith.constant 0 : i32
    %c0_i32_0 = arith.constant 0 : i32
    %c0_i32_1 = arith.constant 0 : i32
    return %c0_i32, %c0_i32_0 : i32, i32
  }
  func.func @transform_6(%arg0: i32) -> (i32, i32) {
    %c0_i32 = arith.constant 0 : i32
    %c0_i32_0 = arith.constant 0 : i32
    %c0_i32_1 = arith.constant 0 : i32
    return %c0_i32, %c0_i32_0 : i32, i32
  }
  func.func @transform_7(%arg0: i32) -> (i32, i32) {
    %c0_i32 = arith.constant 0 : i32
    %c0_i32_0 = arith.constant 0 : i32
    %c0_i32_1 = arith.constant 0 : i32
    return %c0_i32, %c0_i32_0 : i32, i32
  }
  func.func @transform_8(%arg0: i32) -> (i32, i32) {
    %c0_i32 = arith.constant 0 : i32
    %c0_i32_0 = arith.constant 0 : i32
    return %arg0, %c0_i32 : i32, i32
  }
}

module attributes {stable_mosaic.version = 11 : i64} {
  func.func @_attn_proj_kernel(%arg0: i32, %arg1: memref<8x4x4x8xbf16, #tpu.memory_space<vmem>>, %arg2: memref<8x4x4x8xbf16, #tpu.memory_space<vmem>>, %arg3: memref<8x4x4x8xbf16, #tpu.memory_space<vmem>>, %arg4: memref<8x4x4x4xf32, #tpu.memory_space<vmem>>, %arg5: memref<4x8x128xbf16, #tpu.memory_space<vmem>>, %arg6: memref<1x128xf32, #tpu.memory_space<vmem>>, %arg7: memref<8x4x128xbf16, #tpu.memory_space<vmem>>) attributes {dimension_semantics = [#tpu.dimension_semantics<parallel>], iteration_bounds = array<i64: 1>, scalar_prefetch = 0 : i64, scratch_operands = 0 : i64, tpu.core_type = #tpu.core_type<tc>, window_params = [{transform_indices = @transform_0, window_bounds = array<i64: 8, 4, 4, 8>}, {transform_indices = @transform_1, window_bounds = array<i64: 8, 4, 4, 8>}, {transform_indices = @transform_2, window_bounds = array<i64: 8, 4, 4, 8>}, {transform_indices = @transform_3, window_bounds = array<i64: 8, 4, 4, 4>}, {pipeline_mode = #tpu.pipeline_mode<synchronous>, transform_indices = @transform_4, window_bounds = array<i64: 4, 8, 128>}, {pipeline_mode = #tpu.pipeline_mode<synchronous>, transform_indices = @transform_5, window_bounds = array<i64: 1, 128>}, {transform_indices = @transform_6, window_bounds = array<i64: 8, 4, 128>}]} {
    %c0 = arith.constant 0 : index
    %c0_0 = arith.constant 0 : index
    %c0_1 = arith.constant 0 : index
    %c0_2 = arith.constant 0 : index
    %0 = vector.load %arg1[%c0, %c0_0, %c0_1, %c0_2] : memref<8x4x4x8xbf16, #tpu.memory_space<vmem>>, vector<8x4x4x8xbf16>
    %1 = vector.shape_cast %0 : vector<8x4x4x8xbf16> to vector<32x4x8xbf16>
    %c0_3 = arith.constant 0 : index
    %c0_4 = arith.constant 0 : index
    %c0_5 = arith.constant 0 : index
    %c0_6 = arith.constant 0 : index
    %2 = vector.load %arg2[%c0_3, %c0_4, %c0_5, %c0_6] : memref<8x4x4x8xbf16, #tpu.memory_space<vmem>>, vector<8x4x4x8xbf16>
    %3 = vector.shape_cast %2 : vector<8x4x4x8xbf16> to vector<32x4x8xbf16>
    %c0_7 = arith.constant 0 : index
    %c0_8 = arith.constant 0 : index
    %c0_9 = arith.constant 0 : index
    %c0_10 = arith.constant 0 : index
    %4 = vector.load %arg3[%c0_7, %c0_8, %c0_9, %c0_10] : memref<8x4x4x8xbf16, #tpu.memory_space<vmem>>, vector<8x4x4x8xbf16>
    %5 = vector.shape_cast %4 : vector<8x4x4x8xbf16> to vector<32x4x8xbf16>
    "tpu.trace_start"() <{level = 10 : i32, message = "bqd,bkd->bqk"}> : () -> ()
    %cst = arith.constant dense<0.000000e+00> : vector<32x4x4xf32>
    %6 = tpu.matmul %1, %3, %cst {dimension_numbers = #tpu.dot_dimension_numbers<[2], [2], [1], [1], [0, 0, 0, 1, 1, 1], [0], [0]>} : vector<32x4x8xbf16>, vector<32x4x8xbf16>, vector<32x4x4xf32> -> vector<32x4x4xf32>
    "tpu.trace_stop"() : () -> ()
    %c0_11 = arith.constant 0 : index
    %c0_12 = arith.constant 0 : index
    %c0_13 = arith.constant 0 : index
    %c0_14 = arith.constant 0 : index
    %7 = vector.load %arg4[%c0_11, %c0_12, %c0_13, %c0_14] : memref<8x4x4x4xf32, #tpu.memory_space<vmem>>, vector<8x4x4x4xf32>
    %8 = vector.shape_cast %7 : vector<8x4x4x4xf32> to vector<32x4x4xf32>
    %9 = arith.addf %6, %8 : vector<32x4x4xf32>
    %cst_15 = arith.constant dense<0xFF800000> : vector<32x4xf32>
    %10 = vector.multi_reduction <maximumf>, %9, %cst_15 [2] : vector<32x4x4xf32> to vector<32x4xf32>
    %11 = vector.shape_cast %10 : vector<32x4xf32> to vector<32x4x1xf32>
    %12 = vector.broadcast %11 : vector<32x4x1xf32> to vector<32x4x4xf32>
    %13 = arith.subf %9, %12 : vector<32x4x4xf32>
    %14 = math.exp %13 : vector<32x4x4xf32>
    %cst_16 = arith.constant dense<0.000000e+00> : vector<32x4xf32>
    %15 = vector.multi_reduction <add>, %14, %cst_16 [2] : vector<32x4x4xf32> to vector<32x4xf32>
    %16 = vector.shape_cast %15 : vector<32x4xf32> to vector<32x4x1xf32>
    %17 = vector.broadcast %16 : vector<32x4x1xf32> to vector<32x4x4xf32>
    %18 = arith.divf %14, %17 : vector<32x4x4xf32>
    %19 = arith.truncf %18 : vector<32x4x4xf32> to vector<32x4x4xbf16>
    "tpu.trace_start"() <{level = 10 : i32, message = "bqk,bkd->bqd"}> : () -> ()
    %cst_17 = arith.constant dense<0.000000e+00> : vector<32x4x8xf32>
    %20 = tpu.matmul %19, %5, %cst_17 {dimension_numbers = #tpu.dot_dimension_numbers<[2], [1], [1], [2], [0, 0, 0, 1, 1, 2], [0], [0]>} : vector<32x4x4xbf16>, vector<32x4x8xbf16>, vector<32x4x8xf32> -> vector<32x4x8xf32>
    "tpu.trace_stop"() : () -> ()
    %21 = vector.shape_cast %20 : vector<32x4x8xf32> to vector<8x4x4x8xf32>
    %c0_18 = arith.constant 0 : index
    %c0_19 = arith.constant 0 : index
    %c0_20 = arith.constant 0 : index
    %22 = vector.load %arg5[%c0_18, %c0_19, %c0_20] : memref<4x8x128xbf16, #tpu.memory_space<vmem>>, vector<4x8x128xbf16>
    %cst_21 = arith.constant 0.000000e+00 : f32
    %23 = vector.broadcast %cst_21 : f32 to vector<8x4x128xf32>
    %c0_22 = arith.constant 0 : index
    %c0_23 = arith.constant 0 : index
    %24 = vector.load %arg6[%c0_22, %c0_23] : memref<1x128xf32, #tpu.memory_space<vmem>>, vector<1x128xf32>
    %25 = vector.shape_cast %24 : vector<1x128xf32> to vector<1x1x128xf32>
    %26 = vector.broadcast %25 : vector<1x1x128xf32> to vector<8x4x128xf32>
    %27 = arith.addf %23, %26 : vector<8x4x128xf32>
    %28 = vector.extract_strided_slice %21 {offsets = [0, 0, 0, 0], sizes = [8, 1, 4, 8], strides = [1, 1, 1, 1]} : vector<8x4x4x8xf32> to vector<8x1x4x8xf32>
    %29 = vector.shape_cast %28 : vector<8x1x4x8xf32> to vector<8x4x8xf32>
    %30 = arith.truncf %29 : vector<8x4x8xf32> to vector<8x4x8xbf16>
    %31 = vector.extract_strided_slice %22 {offsets = [0, 0, 0], sizes = [1, 8, 128], strides = [1, 1, 1]} : vector<4x8x128xbf16> to vector<1x8x128xbf16>
    %32 = vector.shape_cast %31 : vector<1x8x128xbf16> to vector<8x128xbf16>
    "tpu.trace_start"() <{level = 10 : i32, message = "bnd,dc->bnc"}> : () -> ()
    %cst_24 = arith.constant dense<0.000000e+00> : vector<8x4x128xf32>
    %33 = tpu.matmul %30, %32, %cst_24 {dimension_numbers = #tpu.dot_dimension_numbers<[2], [0], [0, 1], [1], [0, 0, 0, 1, 1, 1], [], []>} : vector<8x4x8xbf16>, vector<8x128xbf16>, vector<8x4x128xf32> -> vector<8x4x128xf32>
    "tpu.trace_stop"() : () -> ()
    %34 = arith.addf %27, %33 : vector<8x4x128xf32>
    %35 = vector.extract_strided_slice %21 {offsets = [0, 1, 0, 0], sizes = [8, 1, 4, 8], strides = [1, 1, 1, 1]} : vector<8x4x4x8xf32> to vector<8x1x4x8xf32>
    %36 = vector.shape_cast %35 : vector<8x1x4x8xf32> to vector<8x4x8xf32>
    %37 = arith.truncf %36 : vector<8x4x8xf32> to vector<8x4x8xbf16>
    %38 = vector.extract_strided_slice %22 {offsets = [1, 0, 0], sizes = [1, 8, 128], strides = [1, 1, 1]} : vector<4x8x128xbf16> to vector<1x8x128xbf16>
    %39 = vector.shape_cast %38 : vector<1x8x128xbf16> to vector<8x128xbf16>
    "tpu.trace_start"() <{level = 10 : i32, message = "bnd,dc->bnc"}> : () -> ()
    %cst_25 = arith.constant dense<0.000000e+00> : vector<8x4x128xf32>
    %40 = tpu.matmul %37, %39, %cst_25 {dimension_numbers = #tpu.dot_dimension_numbers<[2], [0], [0, 1], [1], [0, 0, 0, 1, 1, 1], [], []>} : vector<8x4x8xbf16>, vector<8x128xbf16>, vector<8x4x128xf32> -> vector<8x4x128xf32>
    "tpu.trace_stop"() : () -> ()
    %41 = arith.addf %34, %40 : vector<8x4x128xf32>
    %42 = vector.extract_strided_slice %21 {offsets = [0, 2, 0, 0], sizes = [8, 1, 4, 8], strides = [1, 1, 1, 1]} : vector<8x4x4x8xf32> to vector<8x1x4x8xf32>
    %43 = vector.shape_cast %42 : vector<8x1x4x8xf32> to vector<8x4x8xf32>
    %44 = arith.truncf %43 : vector<8x4x8xf32> to vector<8x4x8xbf16>
    %45 = vector.extract_strided_slice %22 {offsets = [2, 0, 0], sizes = [1, 8, 128], strides = [1, 1, 1]} : vector<4x8x128xbf16> to vector<1x8x128xbf16>
    %46 = vector.shape_cast %45 : vector<1x8x128xbf16> to vector<8x128xbf16>
    "tpu.trace_start"() <{level = 10 : i32, message = "bnd,dc->bnc"}> : () -> ()
    %cst_26 = arith.constant dense<0.000000e+00> : vector<8x4x128xf32>
    %47 = tpu.matmul %44, %46, %cst_26 {dimension_numbers = #tpu.dot_dimension_numbers<[2], [0], [0, 1], [1], [0, 0, 0, 1, 1, 1], [], []>} : vector<8x4x8xbf16>, vector<8x128xbf16>, vector<8x4x128xf32> -> vector<8x4x128xf32>
    "tpu.trace_stop"() : () -> ()
    %48 = arith.addf %41, %47 : vector<8x4x128xf32>
    %49 = vector.extract_strided_slice %21 {offsets = [0, 3, 0, 0], sizes = [8, 1, 4, 8], strides = [1, 1, 1, 1]} : vector<8x4x4x8xf32> to vector<8x1x4x8xf32>
    %50 = vector.shape_cast %49 : vector<8x1x4x8xf32> to vector<8x4x8xf32>
    %51 = arith.truncf %50 : vector<8x4x8xf32> to vector<8x4x8xbf16>
    %52 = vector.extract_strided_slice %22 {offsets = [3, 0, 0], sizes = [1, 8, 128], strides = [1, 1, 1]} : vector<4x8x128xbf16> to vector<1x8x128xbf16>
    %53 = vector.shape_cast %52 : vector<1x8x128xbf16> to vector<8x128xbf16>
    "tpu.trace_start"() <{level = 10 : i32, message = "bnd,dc->bnc"}> : () -> ()
    %cst_27 = arith.constant dense<0.000000e+00> : vector<8x4x128xf32>
    %54 = tpu.matmul %51, %53, %cst_27 {dimension_numbers = #tpu.dot_dimension_numbers<[2], [0], [0, 1], [1], [0, 0, 0, 1, 1, 1], [], []>} : vector<8x4x8xbf16>, vector<8x128xbf16>, vector<8x4x128xf32> -> vector<8x4x128xf32>
    "tpu.trace_stop"() : () -> ()
    %55 = arith.addf %48, %54 : vector<8x4x128xf32>
    %56 = arith.truncf %55 : vector<8x4x128xf32> to vector<8x4x128xbf16>
    %c0_28 = arith.constant 0 : index
    %c0_29 = arith.constant 0 : index
    %c0_30 = arith.constant 0 : index
    %57 = vector.load %arg7[%c0_28, %c0_29, %c0_30] : memref<8x4x128xbf16, #tpu.memory_space<vmem>>, vector<8x4x128xbf16>
    tpu.vector_store %arg7[%c0_28, %c0_29, %c0_30], %56 {strides = array<i32>} : memref<8x4x128xbf16, #tpu.memory_space<vmem>>, vector<8x4x128xbf16>,
    return
  }
  func.func @transform_0(%arg0: i32) -> (i32, i32, i32, i32) {
    %c0_i32 = arith.constant 0 : i32
    %c0_i32_0 = arith.constant 0 : i32
    %c0_i32_1 = arith.constant 0 : i32
    %c0_i32_2 = arith.constant 0 : i32
    return %arg0, %c0_i32, %c0_i32_0, %c0_i32_1 : i32, i32, i32, i32
  }
  func.func @transform_1(%arg0: i32) -> (i32, i32, i32, i32) {
    %c0_i32 = arith.constant 0 : i32
    %c0_i32_0 = arith.constant 0 : i32
    %c0_i32_1 = arith.constant 0 : i32
    %c0_i32_2 = arith.constant 0 : i32
    return %arg0, %c0_i32, %c0_i32_0, %c0_i32_1 : i32, i32, i32, i32
  }
  func.func @transform_2(%arg0: i32) -> (i32, i32, i32, i32) {
    %c0_i32 = arith.constant 0 : i32
    %c0_i32_0 = arith.constant 0 : i32
    %c0_i32_1 = arith.constant 0 : i32
    %c0_i32_2 = arith.constant 0 : i32
    return %arg0, %c0_i32, %c0_i32_0, %c0_i32_1 : i32, i32, i32, i32
  }
  func.func @transform_3(%arg0: i32) -> (i32, i32, i32, i32) {
    %c0_i32 = arith.constant 0 : i32
    %c0_i32_0 = arith.constant 0 : i32
    %c0_i32_1 = arith.constant 0 : i32
    %c0_i32_2 = arith.constant 0 : i32
    return %arg0, %c0_i32, %c0_i32_0, %c0_i32_1 : i32, i32, i32, i32
  }
  func.func @transform_4(%arg0: i32) -> (i32, i32, i32) {
    %c0_i32 = arith.constant 0 : i32
    %c0_i32_0 = arith.constant 0 : i32
    %c0_i32_1 = arith.constant 0 : i32
    %c0_i32_2 = arith.constant 0 : i32
    return %c0_i32, %c0_i32_0, %c0_i32_1 : i32, i32, i32
  }
  func.func @transform_5(%arg0: i32) -> (i32, i32) {
    %c0_i32 = arith.constant 0 : i32
    %c0_i32_0 = arith.constant 0 : i32
    %c0_i32_1 = arith.constant 0 : i32
    return %c0_i32, %c0_i32_0 : i32, i32
  }
  func.func @transform_6(%arg0: i32) -> (i32, i32, i32) {
    %c0_i32 = arith.constant 0 : i32
    %c0_i32_0 = arith.constant 0 : i32
    %c0_i32_1 = arith.constant 0 : i32
    return %arg0, %c0_i32, %c0_i32_0 : i32, i32, i32
  }
}

module attributes {stable_mosaic.version = 11 : i64} {
  func.func @_add_ln_mlp_kernel(%arg0: i32, %arg1: memref<32x128xf32, #tpu.memory_space<vmem>>, %arg2: memref<32x128xbf16, #tpu.memory_space<vmem>>, %arg3: memref<1x32xf32, #tpu.memory_space<vmem>>, %arg4: memref<1x32xf32, #tpu.memory_space<vmem>>, %arg5: memref<32x128xbf16, #tpu.memory_space<vmem>>, %arg6: memref<1x128xf32, #tpu.memory_space<vmem>>, %arg7: memref<128x128xbf16, #tpu.memory_space<vmem>>, %arg8: memref<1x128xf32, #tpu.memory_space<vmem>>, %arg9: memref<32x128xf32, #tpu.memory_space<vmem>>) attributes {dimension_semantics = [#tpu.dimension_semantics<parallel>], iteration_bounds = array<i64: 1>, scalar_prefetch = 0 : i64, scratch_operands = 0 : i64, tpu.core_type = #tpu.core_type<tc>, window_params = [{transform_indices = @transform_0, window_bounds = array<i64: 32, 128>}, {transform_indices = @transform_1, window_bounds = array<i64: 32, 128>}, {pipeline_mode = #tpu.pipeline_mode<synchronous>, transform_indices = @transform_2, window_bounds = array<i64: 1, 32>}, {pipeline_mode = #tpu.pipeline_mode<synchronous>, transform_indices = @transform_3, window_bounds = array<i64: 1, 32>}, {pipeline_mode = #tpu.pipeline_mode<synchronous>, transform_indices = @transform_4, window_bounds = array<i64: 32, 128>}, {pipeline_mode = #tpu.pipeline_mode<synchronous>, transform_indices = @transform_5, window_bounds = array<i64: 1, 128>}, {pipeline_mode = #tpu.pipeline_mode<synchronous>, transform_indices = @transform_6, window_bounds = array<i64: 128, 128>}, {pipeline_mode = #tpu.pipeline_mode<synchronous>, transform_indices = @transform_7, window_bounds = array<i64: 1, 128>}, {transform_indices = @transform_8, window_bounds = array<i64: 32, 128>}]} {
    %c0 = arith.constant 0 : index
    %c0_0 = arith.constant 0 : index
    %0 = vector.load %arg1[%c0, %c0_0] : memref<32x128xf32, #tpu.memory_space<vmem>>, vector<32x128xf32>
    %c0_1 = arith.constant 0 : index
    %c0_2 = arith.constant 0 : index
    %1 = vector.load %arg2[%c0_1, %c0_2] : memref<32x128xbf16, #tpu.memory_space<vmem>>, vector<32x128xbf16>
    %2 = arith.extf %1 : vector<32x128xbf16> to vector<32x128xf32>
    %3 = arith.addf %0, %2 : vector<32x128xf32>
    %4 = vector.extract_strided_slice %3 {offsets = [0, 0], sizes = [32, 32], strides = [1, 1]} : vector<32x128xf32> to vector<32x32xf32>
    %c0_3 = arith.constant 0 : index
    %c0_4 = arith.constant 0 : index
    %5 = vector.load %arg3[%c0_3, %c0_4] : memref<1x32xf32, #tpu.memory_space<vmem>>, vector<1x32xf32>
    %c0_5 = arith.constant 0 : index
    %c0_6 = arith.constant 0 : index
    %6 = vector.load %arg4[%c0_5, %c0_6] : memref<1x32xf32, #tpu.memory_space<vmem>>, vector<1x32xf32>
    %cst = arith.constant dense<0.000000e+00> : vector<32xf32>
    %7 = vector.multi_reduction <add>, %4, %cst [1] : vector<32x32xf32> to vector<32xf32>
    %8 = vector.shape_cast %7 : vector<32xf32> to vector<32x1xf32>
    %cst_7 = arith.constant 3.200000e+01 : f32
    %9 = vector.broadcast %cst_7 : f32 to vector<32x1xf32>
    %10 = arith.divf %8, %9 : vector<32x1xf32>
    %11 = vector.broadcast %10 : vector<32x1xf32> to vector<32x32xf32>
    %12 = arith.subf %4, %11 : vector<32x32xf32>
    %13 = arith.mulf %12, %12 : vector<32x32xf32>
    %cst_8 = arith.constant dense<0.000000e+00> : vector<32xf32>
    %14 = vector.multi_reduction <add>, %13, %cst_8 [1] : vector<32x32xf32> to vector<32xf32>
    %15 = vector.shape_cast %14 : vector<32xf32> to vector<32x1xf32>
    %cst_9 = arith.constant 3.200000e+01 : f32
    %16 = vector.broadcast %cst_9 : f32 to vector<32x1xf32>
    %17 = arith.divf %15, %16 : vector<32x1xf32>
    %18 = vector.broadcast %10 : vector<32x1xf32> to vector<32x32xf32>
    %19 = arith.subf %4, %18 : vector<32x32xf32>
    %cst_10 = arith.constant 9.99999974E-6 : f32
    %20 = vector.broadcast %cst_10 : f32 to vector<32x1xf32>
    %21 = arith.addf %17, %20 : vector<32x1xf32>
    %22 = math.rsqrt %21 : vector<32x1xf32>
    %23 = vector.broadcast %22 : vector<32x1xf32> to vector<32x32xf32>
    %24 = arith.mulf %19, %23 : vector<32x32xf32>
    %25 = vector.broadcast %5 : vector<1x32xf32> to vector<32x32xf32>
    %26 = arith.mulf %24, %25 : vector<32x32xf32>
    %27 = vector.broadcast %6 : vector<1x32xf32> to vector<32x32xf32>
    %28 = arith.addf %26, %27 : vector<32x32xf32>
    %29 = arith.truncf %28 : vector<32x32xf32> to vector<32x32xbf16>
    %c0_11 = arith.constant 0 : index
    %c0_12 = arith.constant 0 : index
    %30 = vector.load %arg5[%c0_11, %c0_12] : memref<32x128xbf16, #tpu.memory_space<vmem>>, vector<32x128xbf16>
    %cst_13 = arith.constant dense<0.000000e+00> : vector<32x128xf32>
    %31 = tpu.matmul %29, %30, %cst_13 {dimension_numbers = #tpu.dot_dimension_numbers<[1], [0], [0], [1], [0, 0, 1, 1], [], []>} : vector<32x32xbf16>, vector<32x128xbf16>, vector<32x128xf32> -> vector<32x128xf32>
    %c0_14 = arith.constant 0 : index
    %c0_15 = arith.constant 0 : index
    %32 = vector.load %arg6[%c0_14, %c0_15] : memref<1x128xf32, #tpu.memory_space<vmem>>, vector<1x128xf32>
    %33 = vector.broadcast %32 : vector<1x128xf32> to vector<32x128xf32>
    %34 = arith.addf %31, %33 : vector<32x128xf32>
    %cst_16 = arith.constant 5.000000e-01 : f32
    %35 = vector.broadcast %cst_16 : f32 to vector<32x128xf32>
    %36 = arith.mulf %35, %34 : vector<32x128xf32>
    %cst_17 = arith.constant 0.707106769 : f32
    %37 = vector.broadcast %cst_17 : f32 to vector<32x128xf32>
    %38 = arith.mulf %34, %37 : vector<32x128xf32>
    %39 = math.erf %38 : vector<32x128xf32>
    %cst_18 = arith.constant 1.000000e+00 : f32
    %40 = vector.broadcast %cst_18 : f32 to vector<32x128xf32>
    %41 = arith.addf %40, %39 : vector<32x128xf32>
    %42 = arith.mulf %36, %41 : vector<32x128xf32>
    %43 = arith.truncf %42 : vector<32x128xf32> to vector<32x128xbf16>
    %c0_19 = arith.constant 0 : index
    %c0_20 = arith.constant 0 : index
    %44 = vector.load %arg7[%c0_19, %c0_20] : memref<128x128xbf16, #tpu.memory_space<vmem>>, vector<128x128xbf16>
    %cst_21 = arith.constant dense<0.000000e+00> : vector<32x128xf32>
    %45 = tpu.matmul %43, %44, %cst_21 {dimension_numbers = #tpu.dot_dimension_numbers<[1], [0], [0], [1], [0, 0, 1, 1], [], []>} : vector<32x128xbf16>, vector<128x128xbf16>, vector<32x128xf32> -> vector<32x128xf32>
    %c0_22 = arith.constant 0 : index
    %c0_23 = arith.constant 0 : index
    %46 = vector.load %arg8[%c0_22, %c0_23] : memref<1x128xf32, #tpu.memory_space<vmem>>, vector<1x128xf32>
    %47 = vector.broadcast %46 : vector<1x128xf32> to vector<32x128xf32>
    %48 = arith.addf %45, %47 : vector<32x128xf32>
    %49 = arith.addf %3, %48 : vector<32x128xf32>
    %c0_24 = arith.constant 0 : index
    %c0_25 = arith.constant 0 : index
    %50 = vector.load %arg9[%c0_24, %c0_25] : memref<32x128xf32, #tpu.memory_space<vmem>>, vector<32x128xf32>
    tpu.vector_store %arg9[%c0_24, %c0_25], %49 {strides = array<i32>} : memref<32x128xf32, #tpu.memory_space<vmem>>, vector<32x128xf32>,
    return
  }
  func.func @transform_0(%arg0: i32) -> (i32, i32) {
    %c0_i32 = arith.constant 0 : i32
    %c0_i32_0 = arith.constant 0 : i32
    return %arg0, %c0_i32 : i32, i32
  }
  func.func @transform_1(%arg0: i32) -> (i32, i32) {
    %c0_i32 = arith.constant 0 : i32
    %c0_i32_0 = arith.constant 0 : i32
    return %arg0, %c0_i32 : i32, i32
  }
  func.func @transform_2(%arg0: i32) -> (i32, i32) {
    %c0_i32 = arith.constant 0 : i32
    %c0_i32_0 = arith.constant 0 : i32
    %c0_i32_1 = arith.constant 0 : i32
    return %c0_i32, %c0_i32_0 : i32, i32
  }
  func.func @transform_3(%arg0: i32) -> (i32, i32) {
    %c0_i32 = arith.constant 0 : i32
    %c0_i32_0 = arith.constant 0 : i32
    %c0_i32_1 = arith.constant 0 : i32
    return %c0_i32, %c0_i32_0 : i32, i32
  }
  func.func @transform_4(%arg0: i32) -> (i32, i32) {
    %c0_i32 = arith.constant 0 : i32
    %c0_i32_0 = arith.constant 0 : i32
    %c0_i32_1 = arith.constant 0 : i32
    return %c0_i32, %c0_i32_0 : i32, i32
  }
  func.func @transform_5(%arg0: i32) -> (i32, i32) {
    %c0_i32 = arith.constant 0 : i32
    %c0_i32_0 = arith.constant 0 : i32
    %c0_i32_1 = arith.constant 0 : i32
    return %c0_i32, %c0_i32_0 : i32, i32
  }
  func.func @transform_6(%arg0: i32) -> (i32, i32) {
    %c0_i32 = arith.constant 0 : i32
    %c0_i32_0 = arith.constant 0 : i32
    %c0_i32_1 = arith.constant 0 : i32
    return %c0_i32, %c0_i32_0 : i32, i32
  }
  func.func @transform_7(%arg0: i32) -> (i32, i32) {
    %c0_i32 = arith.constant 0 : i32
    %c0_i32_0 = arith.constant 0 : i32
    %c0_i32_1 = arith.constant 0 : i32
    return %c0_i32, %c0_i32_0 : i32, i32
  }
  func.func @transform_8(%arg0: i32) -> (i32, i32) {
    %c0_i32 = arith.constant 0 : i32
    %c0_i32_0 = arith.constant 0 : i32
    return %arg0, %c0_i32 : i32, i32
  }
}

</mosaic_0001>

<bundles_post_ra>
// kernel: basic_layer_forward.6
= control target key start
LH: loop header
LB: loop body
LE: loop exit
PB: predicated region body
PF: predicated region fallthrough
CT: control target
= control target key end

     0   :  { %vm27_vm0 = vcmask 261120   ;;  %s326_s0 = inlined_call_operand.vmem [shape: f32[32,128], index: 0, kind: input, shape index: {}]   ;;  %s327_s3 = inlined_call_operand.vmem [shape: bf16[32,128], index: 3, kind: input, shape index: {}]   ;;  %s328_s1 = inlined_call_operand.vmem [shape: f32[1,32], index: 1, kind: input, shape index: {}]   ;;  %s329_s2 = inlined_call_operand.vmem [shape: f32[1,32], index: 2, kind: input, shape index: {}]   ;;  %s330_s4 = inlined_call_operand.vmem [shape: f32[1,128], index: 4, kind: input, shape index: {}]   ;;  %s331_s5 = inlined_call_operand.vmem [shape: bf16[32,128], index: 5, kind: output, shape index: {}]  }
   0x1   :  { %v21_v0 = vld [vmem:[%s326_s0] sm:$0xff]  ;;  %v23_v1 = vld [vmem:[%s326_s0 + $0x10] sm:$0xff]  ;;  %v22_v2 = vld [vmem:[%s326_s0 + $0x8] sm:$0xff] }
   0x2   :  { %v28_v3 = vsel %vm27_vm0, %v21_v0, 0.0  ;;  %v34_v4 = vsel %vm27_vm0, %v23_v1, 0.0  ;;  %v24_v5 = vld [vmem:[%s326_s0 + $0x18] sm:$0xff]  ;;  %v31_v6 = vsel %vm27_vm0, %v22_v2, 0.0  ;;  %v243_v28 = vld [vmem:[%s327_s3 + $0x8] sm:$0xff]   ;;  %v244_v29 = vld [vmem:[%s327_s3] sm:$0xff]  }
   0x3   :  { %29 = vadd.xlane.f32.xlu0 %v28_v3  ;;  %35 = vadd.xlane.f32.xlu1 %v34_v4  ;;  %v37_v7 = vsel %vm27_vm0, %v24_v5, 0.0  ;;  %v205_v44 = vld [vmem:[%s328_s1] ss:$0 sm:$0xff] }
   0x4   :  { %235 = vmatprep.subr.bf16.mxu0 %v243_v28  ;;  %v206_v49 = vld [vmem:[%s329_s2] ss:$0 sm:$0xff] }
   0x5   :  { %236 = vmatpush3.bf16.msra.mxu0 %v243_v28  ;;  %v207_v63 = vld [vmem:[%s330_s4] ss:$0 sm:$0xff] }
   0x6   :  { %237 = vmatprep.subr.bf16.mxu0 %v244_v29 }
   0x7   :  { %32 = vadd.xlane.f32.xlu0 %v31_v6  ;;  %38 = vadd.xlane.f32.xlu1 %v37_v7 }
   0x9   :  { %238 = vmatpush3.bf16.msra.mxu0 %v244_v29 }
  0x8c   :  { %v30_v8 = vpop.xlane.xlu0 %29  ;;  %v36_v9 = vpop.xlane.xlu1 %35 }
  0x8d   :  { %v41_v10 = vmul.f32 0.03125, %v30_v8  ;;  %v43_v11 = vmul.f32 0.03125, %v36_v9 }
  0x8f   :  { %v45_v12 = vsub.f32 %v21_v0, %v41_v10  ;;  %v47_v13 = vsub.f32 %v23_v1, %v43_v11 }
  0x90   :  { %v33_v14 = vpop.xlane.xlu0 %32  ;;  %v39_v15 = vpop.xlane.xlu1 %38 }
  0x91   :  { %v42_v16 = vmul.f32 0.03125, %v33_v14  ;;  %v44_v17 = vmul.f32 0.03125, %v39_v15  ;;  %v49_v18 = vmul.f32 %v45_v12, %v45_v12  ;;  %v51_v19 = vmul.f32 %v47_v13, %v47_v13 }
  0x93   :  { %v46_v20 = vsub.f32 %v22_v2, %v42_v16  ;;  %v48_v21 = vsub.f32 %v24_v5, %v44_v17  ;;  %v53_v22 = vsel %vm27_vm0, %v49_v18, 0.0  ;;  %v59_v23 = vsel %vm27_vm0, %v51_v19, 0.0 }
  0x94   :  { %54 = vadd.xlane.f32.xlu0 %v53_v22 }
  0x95   :  { %v50_v24 = vmul.f32 %v46_v20, %v46_v20  ;;  %v52_v25 = vmul.f32 %v48_v21, %v48_v21 }
  0x97   :  { %v56_v26 = vsel %vm27_vm0, %v50_v24, 0.0  ;;  %v62_v27 = vsel %vm27_vm0, %v52_v25, 0.0 }
  0x98   :  { %60 = vadd.xlane.f32.xlu0 %v59_v23  ;;  %57 = vadd.xlane.f32.xlu1 %v56_v26 }
  0x9c   :  { %63 = vadd.xlane.f32.xlu1 %v62_v27 }
 0x11d   :  { %v55_v30 = vpop.xlane.xlu0 %54 }
 0x11e   :  { %v65_v31 = vmul.f32 0.03125, %v55_v30 }
 0x120   :  { %v69_v32 = vadd.f32 1e-05, %v65_v31 }
 0x121   :  { %v58_v33 = vpop.xlane.xlu1 %57  ;;  %v61_v34 = vpop.xlane.xlu0 %60 }
 0x122   :  { %245 = vrsqrt.f32 %v69_v32  ;;  %v66_v35 = vmul.f32 0.03125, %v58_v33  ;;  %v67_v36 = vmul.f32 0.03125, %v61_v34 }
 0x124   :  { %v70_v37 = vadd.f32 1e-05, %v66_v35  ;;  %v71_v38 = vadd.f32 1e-05, %v67_v36 }
 0x125   :  { %v64_v39 = vpop.xlane.xlu1 %63 }
 0x126   :  { %247 = vrsqrt.f32 %v70_v37  ;;  %v68_v40 = vmul.f32 0.03125, %v64_v39 }
 0x127   :  { %249 = vrsqrt.f32 %v71_v38 }
 0x128   :  { %v72_v41 = vadd.f32 1e-05, %v68_v40 }
 0x12a   :  { %251 = vrsqrt.f32 %v72_v41 }
 0x12f   :  { %v246_v42 = vpop.eup %245 }
 0x130   :  { %v77_v43 = vmul.f32 %v246_v42, %v45_v12 }
 0x132   :  { %v87_v48 = vmul.f32 %v205_v44, %v77_v43 }
 0x133   :  { %v248_v45 = vpop.eup %247 }
 0x134   :  { %v250_v46 = vpop.eup %249  ;;  %v78_v47 = vmul.f32 %v248_v45, %v46_v20  ;;  %v97_v53 = vadd.f32 %v206_v49, %v87_v48 }
 0x135   :  { %v79_v50 = vmul.f32 %v250_v46, %v47_v13 }
 0x136   :  { %v88_v51 = vmul.f32 %v205_v44, %v78_v47 }
 0x137   :  { %v252_v52 = vpop.eup %251  ;;  %v89_v56 = vmul.f32 %v205_v44, %v79_v50 }
 0x138   :  { %v98_v54 = vadd.f32 %v206_v49, %v88_v51  ;;  %v80_v55 = vmul.f32 %v252_v52, %v48_v21 }
 0x139   :  { %v99_v59 = vadd.f32 %v206_v49, %v89_v56 }
 0x13a   :  { %v101_v57 = vpack.c.bf16 %v98_v54, %v97_v53  ;;  %v90_v58 = vmul.f32 %v205_v44, %v80_v55 }
 0x13c   :  { %239 = vmatprep.mubr.msk.bf16.mxu0 %vm27_vm0, %v101_v57  ;;  %v100_v60 = vadd.f32 %v206_v49, %v90_v58 }
 0x13e   :  { %v102_v61 = vpack.c.bf16 %v100_v60, %v99_v59 }
 0x140   :  { %240 = vmatmul.mubr.msk.bf16.vlgmr.msra.gmra.mxu0 %vm27_vm0, %v102_v61 }
 0x200   :  { %v241_v62 = vpop.f32.mrf.mxu0 }
 0x201   :  { %v175_v2 = vadd.f32 %v241_v62, %v207_v63 }
 0x202   :  { %v166_v0 = vpop.f32.mrf.mxu0 }
 0x203   :  { %v167_v5 = vadd.f32 %v207_v63, %v166_v0 }
 0x204   :  { %v242_v1 = vpop.f32.mrf.mxu0 }
 0x205   :  { %v178_v3 = vadd.f32 %v242_v1, %v207_v63 }
 0x206   :  { %v169_v4 = vpop.f32.mrf.mxu0 }
 0x207   :  { %v228_v6 = vpack.c.bf16 %v178_v3, %v175_v2  ;;  %v170_v7 = vadd.f32 %v207_v63, %v169_v4 }
 0x209   :  { %230 = vst [vmem:[%s331_s5 + $0x8] sm:$0xff] %v228_v6   ;;  %v223_v8 = vpack.c.bf16 %v170_v7, %v167_v5 }
 0x20b   :  { %224 = vst [vmem:[%s331_s5] sm:$0xff] %v223_v8  }

// kernel: basic_layer_forward.8
= control target key start
LH: loop header
LB: loop body
LE: loop exit
PB: predicated region body
PF: predicated region fallthrough
CT: control target
= control target key end

     0   :  { %vm48_vm0 = vcmask 261120   ;;  %s596_s0 = inlined_call_operand.vmem [shape: f32[32,128], index: 0, kind: input, shape index: {}]   ;;  %s597_s1 = inlined_call_operand.vmem [shape: bf16[32,128], index: 1, kind: input, shape index: {}]   ;;  %s598_s4 = inlined_call_operand.vmem [shape: bf16[32,128], index: 4, kind: input, shape index: {}]   ;;  %s599_s2 = inlined_call_operand.vmem [shape: f32[1,32], index: 2, kind: input, shape index: {}]   ;;  %s600_s3 = inlined_call_operand.vmem [shape: f32[1,32], index: 3, kind: input, shape index: {}]   ;;  %s601_s6 = inlined_call_operand.vmem [shape: bf16[128,128], index: 6, kind: input, shape index: {}]   ;;  %s602_s5 = inlined_call_operand.vmem [shape: f32[1,128], index: 5, kind: input, shape index: {}]   ;;  %s603_s7 = inlined_call_operand.vmem [shape: f32[1,128], index: 7, kind: input, shape index: {}]   ;;  %s604_s8 = inlined_call_operand.vmem [shape: f32[32,128], index: 8, kind: output, shape index: {}]  }
   0x1   :  { %v30_v0 = vld [vmem:[%s596_s0] sm:$0xff]  ;;  %v32_v2 = vld [vmem:[%s596_s0 + $0x10] sm:$0xff]  ;;  %v380_v4 = vld [vmem:[%s597_s1 + $0x8] sm:$0xff]  }
   0x2   :  { %v373_v1 = vld [vmem:[%s597_s1] sm:$0xff]   ;;  %v31_v5 = vld [vmem:[%s596_s0 + $0x8] sm:$0xff]  ;;  %v33_v7 = vld [vmem:[%s596_s0 + $0x18] sm:$0xff]  ;;  %v378_v8 = vunpack.c.l.bf16 %v380_v4  ;;  %v379_v9 = vunpack.c.h.bf16 %v380_v4 }
   0x3   :  { %v374_v3 = vunpack.c.l.bf16 %v373_v1  ;;  %v375_v6 = vunpack.c.h.bf16 %v373_v1  ;;  %v423_v38 = vld [vmem:[%s598_s4 + $0x8] sm:$0xff]   ;;  %v424_v39 = vld [vmem:[%s598_s4] sm:$0xff]  }
   0x4   :  { %v516_v12 = vadd.f32 %v378_v8, %v32_v2  ;;  %v518_v13 = vadd.f32 %v379_v9, %v33_v7  ;;  %395 = vmatprep.subr.bf16.mxu0 %v423_v38  ;;  %v356_v54 = vld [vmem:[%s599_s2] ss:$0 sm:$0xff]  ;;  %v425_v8 = vld [vmem:[%s601_s6 + $0x38] sm:$0xff]   ;;  %v426_v9 = vld [vmem:[%s601_s6 + $0x30] sm:$0xff]  }
   0x5   :  { %v512_v10 = vadd.f32 %v374_v3, %v30_v0  ;;  %v514_v11 = vadd.f32 %v375_v6, %v31_v5  ;;  %396 = vmatpush3.bf16.msra.mxu0 %v423_v38  ;;  %v357_v59 = vld [vmem:[%s600_s3] ss:$0 sm:$0xff]  ;;  %403 = vmatprep.subr.bf16.mxu1 %v425_v8 }
   0x6   :  { %v55_v15 = vsel %vm48_vm0, %v516_v12, 0.0  ;;  %v58_v17 = vsel %vm48_vm0, %v518_v13, 0.0  ;;  %397 = vmatprep.subr.bf16.mxu0 %v424_v39  ;;  %404 = vmatpush3.bf16.msra.mxu1 %v425_v8 }
   0x7   :  { %v49_v14 = vsel %vm48_vm0, %v512_v10, 0.0  ;;  %56 = vadd.xlane.f32.xlu1 %v55_v15  ;;  %v52_v16 = vsel %vm48_vm0, %v514_v11, 0.0  ;;  %405 = vmatprep.subr.bf16.mxu1 %v426_v9  ;;  %v428_v15 = vld [vmem:[%s601_s6 + $0x20] sm:$0xff]  }
   0x8   :  { %50 = vadd.xlane.f32.xlu0 %v49_v14  ;;  %v427_v14 = vld [vmem:[%s601_s6 + $0x28] sm:$0xff]  }
   0x9   :  { %398 = vmatpush3.bf16.msra.mxu0 %v424_v39 }
   0xa   :  { %406 = vmatpush3.bf16.msra.mxu1 %v426_v9 }
   0xb   :  { %59 = vadd.xlane.f32.xlu1 %v58_v17  ;;  %407 = vmatprep.subr.bf16.mxu1 %v427_v14  ;;  %v430_v17 = vld [vmem:[%s601_s6 + $0x10] sm:$0xff]  }
   0xc   :  { %53 = vadd.xlane.f32.xlu0 %v52_v16  ;;  %v429_v16 = vld [vmem:[%s601_s6 + $0x18] sm:$0xff]  }
   0xe   :  { %408 = vmatpush3.bf16.msra.mxu1 %v427_v14 }
   0xf   :  { %409 = vmatprep.subr.bf16.mxu1 %v428_v15 }
  0x12   :  { %410 = vmatpush3.bf16.msra.mxu1 %v428_v15 }
  0x13   :  { %411 = vmatprep.subr.bf16.mxu1 %v429_v16 }
  0x16   :  { %412 = vmatpush3.bf16.msra.mxu1 %v429_v16 }
  0x17   :  { %413 = vmatprep.subr.bf16.mxu1 %v430_v17 }
  0x1a   :  { %414 = vmatpush3.bf16.msra.mxu1 %v430_v17 }
  0x90   :  { %v57_v20 = vpop.xlane.xlu1 %56 }
  0x91   :  { %v51_v18 = vpop.xlane.xlu0 %50  ;;  %v64_v21 = vmul.f32 0.03125, %v57_v20  ;;  %v358_v20 = vld [vmem:[%s602_s5] ss:$0 sm:$0xff] }
  0x92   :  { %v62_v19 = vmul.f32 0.03125, %v51_v18  ;;  %v431_v18 = vld [vmem:[%s601_s6 + $0x8] sm:$0xff]  }
  0x93   :  { %v68_v23 = vsub.f32 %v516_v12, %v64_v21  ;;  %415 = vmatprep.subr.bf16.mxu1 %v431_v18 }
  0x94   :  { %v66_v22 = vsub.f32 %v512_v10, %v62_v19  ;;  %v60_v26 = vpop.xlane.xlu1 %59  ;;  %v432_v19 = vld [vmem:[%s601_s6] sm:$0xff]   ;;  %416 = vmatpush3.bf16.msra.mxu1 %v431_v18 }
  0x95   :  { %v54_v24 = vpop.xlane.xlu0 %53  ;;  %v65_v28 = vmul.f32 0.03125, %v60_v26  ;;  %v72_v29 = vmul.f32 %v68_v23, %v68_v23  ;;  %417 = vmatprep.subr.bf16.mxu1 %v432_v19 }
  0x96   :  { %v63_v25 = vmul.f32 0.03125, %v54_v24  ;;  %v70_v27 = vmul.f32 %v66_v22, %v66_v22 }
  0x97   :  { %v69_v32 = vsub.f32 %v518_v13, %v65_v28  ;;  %v80_v33 = vsel %vm48_vm0, %v72_v29, 0.0 }
  0x98   :  { %v67_v30 = vsub.f32 %v514_v11, %v63_v25  ;;  %v74_v31 = vsel %vm48_vm0, %v70_v27, 0.0  ;;  %418 = vmatpush3.bf16.msra.mxu1 %v432_v19 }
  0x99   :  { %75 = vadd.xlane.f32.xlu0 %v74_v31  ;;  %v73_v35 = vmul.f32 %v69_v32, %v69_v32 }
  0x9a   :  { %v71_v34 = vmul.f32 %v67_v30, %v67_v30 }
  0x9b   :  { %v83_v37 = vsel %vm48_vm0, %v73_v35, 0.0 }
  0x9c   :  { %v77_v36 = vsel %vm48_vm0, %v71_v34, 0.0 }
  0x9d   :  { %81 = vadd.xlane.f32.xlu0 %v80_v33  ;;  %78 = vadd.xlane.f32.xlu1 %v77_v36 }
  0xa1   :  { %84 = vadd.xlane.f32.xlu1 %v83_v37 }
 0x122   :  { %v76_v40 = vpop.xlane.xlu0 %75 }
 0x123   :  { %v86_v41 = vmul.f32 0.03125, %v76_v40 }
 0x125   :  { %v90_v42 = vadd.f32 1e-05, %v86_v41 }
 0x126   :  { %v79_v43 = vpop.xlane.xlu1 %78  ;;  %v82_v44 = vpop.xlane.xlu0 %81 }
 0x127   :  { %433 = vrsqrt.f32 %v90_v42  ;;  %v87_v45 = vmul.f32 0.03125, %v79_v43  ;;  %v88_v46 = vmul.f32 0.03125, %v82_v44 }
 0x129   :  { %v91_v47 = vadd.f32 1e-05, %v87_v45  ;;  %v92_v48 = vadd.f32 1e-05, %v88_v46 }
 0x12a   :  { %v85_v49 = vpop.xlane.xlu1 %84 }
 0x12b   :  { %435 = vrsqrt.f32 %v91_v47  ;;  %v89_v50 = vmul.f32 0.03125, %v85_v49 }
 0x12c   :  { %437 = vrsqrt.f32 %v92_v48 }
 0x12d   :  { %v93_v51 = vadd.f32 1e-05, %v89_v50 }
 0x12f   :  { %439 = vrsqrt.f32 %v93_v51  ;;  %v363_v51 = vld [vmem:[%s603_s7] ss:$0 sm:$0xff] }
 0x134   :  { %v434_v52 = vpop.eup %433 }
 0x135   :  { %v98_v53 = vmul.f32 %v434_v52, %v66_v22 }
 0x137   :  { %v108_v58 = vmul.f32 %v356_v54, %v98_v53 }
 0x138   :  { %v436_v55 = vpop.eup %435 }
 0x139   :  { %v438_v56 = vpop.eup %437  ;;  %v99_v57 = vmul.f32 %v436_v55, %v67_v30  ;;  %v118_v63 = vadd.f32 %v357_v59, %v108_v58 }
 0x13a   :  { %v100_v60 = vmul.f32 %v438_v56, %v68_v23 }
 0x13b   :  { %v109_v61 = vmul.f32 %v356_v54, %v99_v57 }
 0x13c   :  { %v440_v62 = vpop.eup %439  ;;  %v110_v2 = vmul.f32 %v356_v54, %v100_v60 }
 0x13d   :  { %v119_v0 = vadd.f32 %v357_v59, %v109_v61  ;;  %v101_v1 = vmul.f32 %v440_v62, %v69_v32 }
 0x13e   :  { %v120_v5 = vadd.f32 %v357_v59, %v110_v2 }
 0x13f   :  { %v122_v3 = vpack.c.bf16 %v119_v0, %v118_v63  ;;  %v111_v4 = vmul.f32 %v356_v54, %v101_v1 }
 0x141   :  { %399 = vmatprep.mubr.msk.bf16.mxu0 %vm48_vm0, %v122_v3  ;;  %v121_v6 = vadd.f32 %v357_v59, %v111_v4 }
 0x143   :  { %v123_v7 = vpack.c.bf16 %v121_v6, %v120_v5 }
 0x145   :  { %400 = vmatmul.mubr.msk.bf16.vlgmr.msra.gmra.mxu0 %vm48_vm0, %v123_v7 }
 0x205   :  { %v401_v21 = vpop.f32.mrf.mxu0 }
 0x206   :  { %v196_v22 = vadd.f32 %v401_v21, %v358_v20 }
 0x207   :  { %v187_v23 = vpop.f32.mrf.mxu0 }
 0x208   :  { %v188_v24 = vadd.f32 %v358_v20, %v187_v23  ;;  %v208_v25 = vmul.f32 0.70710677, %v196_v22  ;;  %v204_v44 = vmul.f32 0.5, %v196_v22 }
 0x209   :  { %v402_v26 = vpop.f32.mrf.mxu0 }
 0x20a   :  { %v206_v27 = vmul.f32 0.70710677, %v188_v24  ;;  %v199_v28 = vadd.f32 %v402_v26, %v358_v20  ;;  %v202_v41 = vmul.f32 0.5, %v188_v24 }
 0x20b   :  { %v190_v29 = vpop.f32.mrf.mxu0 }
 0x20c   :  { %441 = verf.f32 %v206_v27  ;;  %v209_v30 = vmul.f32 0.70710677, %v199_v28  ;;  %v191_v31 = vadd.f32 %v358_v20, %v190_v29  ;;  %v205_v40 = vmul.f32 0.5, %v199_v28 }
 0x20d   :  { %443 = verf.f32 %v208_v25 }
 0x20e   :  { %445 = verf.f32 %v209_v30  ;;  %v207_v32 = vmul.f32 0.70710677, %v191_v31  ;;  %v203_v42 = vmul.f32 0.5, %v191_v31 }
 0x210   :  { %447 = verf.f32 %v207_v32 }
 0x219   :  { %v442_v33 = vpop.eup %441 }
 0x21a   :  { %v444_v34 = vpop.eup %443  ;;  %v214_v37 = vadd.f32 1.0, %v442_v33 }
 0x21b   :  { %v446_v35 = vpop.eup %445  ;;  %v216_v39 = vadd.f32 1.0, %v444_v34 }
 0x21c   :  { %v217_v36 = vadd.f32 1.0, %v446_v35  ;;  %v218_v46 = vmul.f32 %v214_v37, %v202_v41 }
 0x21d   :  { %v448_v38 = vpop.eup %447  ;;  %v220_v48 = vmul.f32 %v216_v39, %v204_v44 }
 0x21e   :  { %v215_v43 = vadd.f32 1.0, %v448_v38  ;;  %v221_v45 = vmul.f32 %v217_v36, %v205_v40 }
 0x220   :  { %v219_v47 = vmul.f32 %v215_v43, %v203_v42  ;;  %v223_v50 = vpack.c.bf16 %v221_v45, %v220_v48 }
 0x222   :  { %v222_v49 = vpack.c.bf16 %v219_v47, %v218_v46 }
 0x224   :  { %419 = vmatprep.mubr.bf16.mxu1 %v222_v49 }
 0x225   :  { %420 = vmatmul.mubr.bf16.vlgmr.msra.gmra.mxu1 %v223_v50 }
 0x2e5   :  { %v421_v52 = vpop.f32.mrf.mxu1 }
 0x2e6   :  { %v338_v53 = vadd.f32 %v421_v52, %v363_v51 }
 0x2e7   :  { %v329_v54 = vpop.f32.mrf.mxu1 }
 0x2e8   :  { %v346_v55 = vadd.f32 %v338_v53, %v516_v12  ;;  %v330_v56 = vadd.f32 %v363_v51, %v329_v54 }
 0x2e9   :  { %v422_v57 = vpop.f32.mrf.mxu1 }
 0x2ea   :  { %350 = vst [vmem:[%s604_s8 + $0x10] sm:$0xff] %v346_v55  ;;  %v344_v58 = vadd.f32 %v330_v56, %v512_v10  ;;  %v341_v59 = vadd.f32 %v422_v57, %v363_v51 }
 0x2eb   :  { %v332_v60 = vpop.f32.mrf.mxu1 }
 0x2ec   :  { %348 = vst [vmem:[%s604_s8] sm:$0xff] %v344_v58  ;;  %v347_v61 = vadd.f32 %v341_v59, %v518_v13  ;;  %v333_v62 = vadd.f32 %v363_v51, %v332_v60 }
 0x2ee   :  { %351 = vst [vmem:[%s604_s8 + $0x18] sm:$0xff] %v347_v61  ;;  %v345_v12 = vadd.f32 %v333_v62, %v514_v11 }
 0x2f0   :  { %349 = vst [vmem:[%s604_s8 + $0x8] sm:$0xff] %v345_v12 }

// kernel: basic_layer_forward.11
= control target key start
LH: loop header
LB: loop body
LE: loop exit
PB: predicated region body
PF: predicated region fallthrough
CT: control target
= control target key end

     0   :  { %vm49_vm0 = vcmask 261120   ;;  %s628_s0 = inlined_call_operand.vmem [shape: f32[32,128], index: 0, kind: input, shape index: {}]   ;;  %s629_s1 = inlined_call_operand.vmem [shape: bf16[32,128], index: 1, kind: input, shape index: {}]   ;;  %s630_s2 = inlined_call_operand.vmem [shape: f32[1,32], index: 2, kind: input, shape index: {}]   ;;  %s631_s3 = inlined_call_operand.vmem [shape: f32[1,32], index: 3, kind: input, shape index: {}]   ;;  %s632_s4 = inlined_call_operand.vmem [shape: bf16[32,128], index: 4, kind: input, shape index: {}]   ;;  %s633_s5 = inlined_call_operand.vmem [shape: f32[1,128], index: 5, kind: input, shape index: {}]   ;;  %s634_s6 = inlined_call_operand.vmem [shape: bf16[128,128], index: 6, kind: input, shape index: {}]   ;;  %s635_s7 = inlined_call_operand.vmem [shape: f32[1,128], index: 7, kind: input, shape index: {}]   ;;  %s636_s8 = inlined_call_operand.hbm [shape: f32[32,128], index: 8, kind: output, shape index: {}]  }
   0x1   :  { %v31_v0 = vld [vmem:[%s628_s0] sm:$0xff]  ;;  %v33_v2 = vld [vmem:[%s628_s0 + $0x10] sm:$0xff]  ;;  %v393_v4 = vld [vmem:[%s629_s1 + $0x8] sm:$0xff]  }
   0x2   :  { %v386_v1 = vld [vmem:[%s629_s1] sm:$0xff]   ;;  %v32_v5 = vld [vmem:[%s628_s0 + $0x8] sm:$0xff]  ;;  %v34_v7 = vld [vmem:[%s628_s0 + $0x18] sm:$0xff]  ;;  %v391_v8 = vunpack.c.l.bf16 %v393_v4  ;;  %v392_v9 = vunpack.c.h.bf16 %v393_v4 }
   0x3   :  { %v387_v3 = vunpack.c.l.bf16 %v386_v1  ;;  %v388_v6 = vunpack.c.h.bf16 %v386_v1 }
   0x4   :  { %v557_v12 = vadd.f32 %v391_v8, %v33_v2  ;;  %v559_v13 = vadd.f32 %v392_v9, %v34_v7 }
   0x5   :  { %v553_v10 = vadd.f32 %v387_v3, %v31_v0  ;;  %v555_v11 = vadd.f32 %v388_v6, %v32_v5 }
   0x6   :  { %v56_v16 = vsel %vm49_vm0, %v557_v12, 0.0  ;;  %v59_v17 = vsel %vm49_vm0, %v559_v13, 0.0 }
   0x7   :  { %v50_v14 = vsel %vm49_vm0, %v553_v10, 0.0  ;;  %v53_v15 = vsel %vm49_vm0, %v555_v11, 0.0  ;;  %57 = vadd.xlane.f32.xlu1 %v56_v16 }
   0x8   :  { %51 = vadd.xlane.f32.xlu0 %v50_v14 }
   0x9   :  { %13 = vsyncpa [#allocation3], 0  ;;  %v439_v38 = vld [vmem:[%s632_s4 + $0x8] sm:$0xff]   ;;  %v440_v39 = vld [vmem:[%s632_s4] sm:$0xff]   ;;  %s487_s16 = smov [#allocation2]  }
   0xa   :  { %408 = vmatprep.subr.bf16.mxu0 %v439_v38  ;;  %v369_v54 = vld [vmem:[%s630_s2] ss:$0 sm:$0xff]  ;;  %v441_v8 = vld [vmem:[%s634_s6 + $0x38] sm:$0xff]   ;;  %v442_v9 = vld [vmem:[%s634_s6 + $0x30] sm:$0xff]   ;;  %s358_s0 = sshll.u32 %s487_s16, 4  ;;  %s359_s0 = int_to_ptr.vmem [resolvable:$true] %s358_s0 }
   0xb   :  { %60 = vadd.xlane.f32.xlu1 %v59_v17  ;;  %409 = vmatpush3.bf16.msra.mxu0 %v439_v38  ;;  %v370_v59 = vld [vmem:[%s631_s3] ss:$0 sm:$0xff]  ;;  %v443_v14 = vld [vmem:[%s634_s6 + $0x28] sm:$0xff]   ;;  %v445_v16 = vld [vmem:[%s634_s6 + $0x18] sm:$0xff]   ;;  %p470_p1 = scmp.lt.s32.totalorder %s359_s0, %s359_s0 }
   0xc   :  { %54 = vadd.xlane.f32.xlu0 %v53_v15  ;;  %410 = vmatprep.subr.bf16.mxu0 %v440_v39  ;;  %v444_v15 = vld [vmem:[%s634_s6 + $0x20] sm:$0xff]   ;;  %v446_v17 = vld [vmem:[%s634_s6 + $0x10] sm:$0xff]  }
   0xd   :  { %416 = vmatprep.subr.bf16.mxu1 %v441_v8 }
   0xe   :  { %417 = vmatpush3.bf16.msra.mxu1 %v441_v8 }
   0xf   :  { %411 = vmatpush3.bf16.msra.mxu0 %v440_v39  ;;  %418 = vmatprep.subr.bf16.mxu1 %v442_v9 }
  0x12   :  { %419 = vmatpush3.bf16.msra.mxu1 %v442_v9 }
  0x13   :  { %420 = vmatprep.subr.bf16.mxu1 %v443_v14 }
  0x16   :  { %421 = vmatpush3.bf16.msra.mxu1 %v443_v14 }
  0x17   :  { %422 = vmatprep.subr.bf16.mxu1 %v444_v15 }
  0x1a   :  { %423 = vmatpush3.bf16.msra.mxu1 %v444_v15 }
  0x1b   :  { %424 = vmatprep.subr.bf16.mxu1 %v445_v16 }
  0x1e   :  { %425 = vmatpush3.bf16.msra.mxu1 %v445_v16 }
  0x1f   :  { %426 = vmatprep.subr.bf16.mxu1 %v446_v17 }
  0x22   :  { %427 = vmatpush3.bf16.msra.mxu1 %v446_v17 }
  0x90   :  { %v58_v20 = vpop.xlane.xlu1 %57 }
  0x91   :  { %v52_v18 = vpop.xlane.xlu0 %51  ;;  %v65_v21 = vmul.f32 0.03125, %v58_v20  ;;  %v371_v20 = vld [vmem:[%s633_s5] ss:$0 sm:$0xff] }
  0x92   :  { %v63_v19 = vmul.f32 0.03125, %v52_v18  ;;  %v447_v18 = vld [vmem:[%s634_s6 + $0x8] sm:$0xff]  }
  0x93   :  { %v69_v23 = vsub.f32 %v557_v12, %v65_v21  ;;  %428 = vmatprep.subr.bf16.mxu1 %v447_v18 }
  0x94   :  { %v67_v22 = vsub.f32 %v553_v10, %v63_v19  ;;  %v61_v26 = vpop.xlane.xlu1 %60  ;;  %v448_v19 = vld [vmem:[%s634_s6] sm:$0xff]   ;;  %429 = vmatpush3.bf16.msra.mxu1 %v447_v18 }
  0x95   :  { %v55_v24 = vpop.xlane.xlu0 %54  ;;  %v66_v28 = vmul.f32 0.03125, %v61_v26  ;;  %v73_v29 = vmul.f32 %v69_v23, %v69_v23  ;;  %430 = vmatprep.subr.bf16.mxu1 %v448_v19 }
  0x96   :  { %v64_v25 = vmul.f32 0.03125, %v55_v24  ;;  %v71_v27 = vmul.f32 %v67_v22, %v67_v22 }
  0x97   :  { %v70_v32 = vsub.f32 %v559_v13, %v66_v28  ;;  %v81_v33 = vsel %vm49_vm0, %v73_v29, 0.0 }
  0x98   :  { %v68_v30 = vsub.f32 %v555_v11, %v64_v25  ;;  %v75_v31 = vsel %vm49_vm0, %v71_v27, 0.0  ;;  %431 = vmatpush3.bf16.msra.mxu1 %v448_v19 }
  0x99   :  { %76 = vadd.xlane.f32.xlu0 %v75_v31  ;;  %v74_v35 = vmul.f32 %v70_v32, %v70_v32 }
  0x9a   :  { %v72_v34 = vmul.f32 %v68_v30, %v68_v30 }
  0x9b   :  { %v84_v37 = vsel %vm49_vm0, %v74_v35, 0.0 }
  0x9c   :  { %v78_v36 = vsel %vm49_vm0, %v72_v34, 0.0 }
  0x9d   :  { %82 = vadd.xlane.f32.xlu0 %v81_v33  ;;  %79 = vadd.xlane.f32.xlu1 %v78_v36 }
  0xa1   :  { %85 = vadd.xlane.f32.xlu1 %v84_v37 }
 0x122   :  { %v77_v40 = vpop.xlane.xlu0 %76 }
 0x123   :  { %v87_v41 = vmul.f32 0.03125, %v77_v40 }
 0x125   :  { %v91_v42 = vadd.f32 1e-05, %v87_v41 }
 0x126   :  { %v80_v43 = vpop.xlane.xlu1 %79  ;;  %v83_v44 = vpop.xlane.xlu0 %82 }
 0x127   :  { %449 = vrsqrt.f32 %v91_v42  ;;  %v88_v45 = vmul.f32 0.03125, %v80_v43  ;;  %v89_v46 = vmul.f32 0.03125, %v83_v44 }
 0x129   :  { %v92_v47 = vadd.f32 1e-05, %v88_v45  ;;  %v93_v48 = vadd.f32 1e-05, %v89_v46 }
 0x12a   :  { %v86_v49 = vpop.xlane.xlu1 %85 }
 0x12b   :  { %451 = vrsqrt.f32 %v92_v47  ;;  %v90_v50 = vmul.f32 0.03125, %v86_v49 }
 0x12c   :  { %453 = vrsqrt.f32 %v93_v48 }
 0x12d   :  { %v94_v51 = vadd.f32 1e-05, %v90_v50 }
 0x12f   :  { %455 = vrsqrt.f32 %v94_v51  ;;  %v376_v51 = vld [vmem:[%s635_s7] ss:$0 sm:$0xff]  ;;  %s465_s7 = scalar_lea.vmem %s359_s0, 512 }
 0x130   :  { %p466_p0 = scmp.ne.s32.totalorder %s359_s0, %s465_s7  ;;  %p471_p2 = scmp.lt.s32.totalorder %s465_s7, %s465_s7 }
 0x132   :  { %p472_p3 = por %p471_p2, %p470_p1 }
 0x134   :  { %v450_v52 = vpop.eup %449  ;;  %p473_p4 = pnand %p472_p3, %p466_p0 }
 0x135   :  { %v99_v53 = vmul.f32 %v450_v52, %v67_v22 }
 0x137   :  { %v109_v58 = vmul.f32 %v369_v54, %v99_v53 }
 0x138   :  { %v452_v55 = vpop.eup %451 }
 0x139   :  { %v454_v56 = vpop.eup %453  ;;  %v100_v57 = vmul.f32 %v452_v55, %v68_v30  ;;  %v119_v63 = vadd.f32 %v370_v59, %v109_v58 }
 0x13a   :  { %v101_v60 = vmul.f32 %v454_v56, %v69_v23 }
 0x13b   :  { %v110_v61 = vmul.f32 %v369_v54, %v100_v57 }
 0x13c   :  { %v456_v62 = vpop.eup %455  ;;  %v111_v2 = vmul.f32 %v369_v54, %v101_v60 }
 0x13d   :  { %v120_v0 = vadd.f32 %v370_v59, %v110_v61  ;;  %v102_v1 = vmul.f32 %v456_v62, %v70_v32 }
 0x13e   :  { %v121_v5 = vadd.f32 %v370_v59, %v111_v2 }
 0x13f   :  { %v123_v3 = vpack.c.bf16 %v120_v0, %v119_v63  ;;  %v112_v4 = vmul.f32 %v369_v54, %v102_v1 }
 0x141   :  { %412 = vmatprep.mubr.msk.bf16.mxu0 %vm49_vm0, %v123_v3  ;;  %v122_v6 = vadd.f32 %v370_v59, %v112_v4 }
 0x143   :  { %v124_v7 = vpack.c.bf16 %v122_v6, %v121_v5 }
 0x145   :  { %413 = vmatmul.mubr.msk.bf16.vlgmr.msra.gmra.mxu0 %vm49_vm0, %v124_v7 }
 0x205   :  { %v414_v21 = vpop.f32.mrf.mxu0 }
 0x206   :  { %v197_v22 = vadd.f32 %v414_v21, %v371_v20 }
 0x207   :  { %v188_v23 = vpop.f32.mrf.mxu0 }
 0x208   :  { %v189_v24 = vadd.f32 %v371_v20, %v188_v23  ;;  %v209_v25 = vmul.f32 0.70710677, %v197_v22  ;;  %v205_v44 = vmul.f32 0.5, %v197_v22 }
 0x209   :  { %v415_v26 = vpop.f32.mrf.mxu0 }
 0x20a   :  { %v207_v27 = vmul.f32 0.70710677, %v189_v24  ;;  %v200_v28 = vadd.f32 %v415_v26, %v371_v20  ;;  %v203_v41 = vmul.f32 0.5, %v189_v24 }
 0x20b   :  { %v191_v29 = vpop.f32.mrf.mxu0 }
 0x20c   :  { %457 = verf.f32 %v207_v27  ;;  %v210_v30 = vmul.f32 0.70710677, %v200_v28  ;;  %v192_v31 = vadd.f32 %v371_v20, %v191_v29  ;;  %v206_v40 = vmul.f32 0.5, %v200_v28 }
 0x20d   :  { %459 = verf.f32 %v209_v25 }
 0x20e   :  { %461 = verf.f32 %v210_v30  ;;  %v208_v32 = vmul.f32 0.70710677, %v192_v31  ;;  %v204_v42 = vmul.f32 0.5, %v192_v31 }
 0x210   :  { %463 = verf.f32 %v208_v32 }
 0x219   :  { %v458_v33 = vpop.eup %457 }
 0x21a   :  { %v460_v34 = vpop.eup %459  ;;  %v215_v37 = vadd.f32 1.0, %v458_v33 }
 0x21b   :  { %v462_v35 = vpop.eup %461  ;;  %v217_v39 = vadd.f32 1.0, %v460_v34 }
 0x21c   :  { %v218_v36 = vadd.f32 1.0, %v462_v35  ;;  %v219_v46 = vmul.f32 %v215_v37, %v203_v41 }
 0x21d   :  { %v464_v38 = vpop.eup %463  ;;  %v221_v48 = vmul.f32 %v217_v39, %v205_v44 }
 0x21e   :  { %v216_v43 = vadd.f32 1.0, %v464_v38  ;;  %v222_v45 = vmul.f32 %v218_v36, %v206_v40 }
 0x220   :  { %v220_v47 = vmul.f32 %v216_v43, %v204_v42  ;;  %v224_v50 = vpack.c.bf16 %v222_v45, %v221_v48 }
 0x222   :  { %v223_v49 = vpack.c.bf16 %v220_v47, %v219_v46 }
 0x224   :  { %432 = vmatprep.mubr.bf16.mxu1 %v223_v49 }
 0x225   :  { %433 = vmatmul.mubr.bf16.vlgmr.msra.gmra.mxu1 %v224_v50 }
 0x2e5   :  { %v434_v52 = vpop.f32.mrf.mxu1 }
 0x2e6   :  { %v339_v53 = vadd.f32 %v434_v52, %v376_v51 }
 0x2e7   :  { %v330_v54 = vpop.f32.mrf.mxu1 }
 0x2e8   :  { %v347_v55 = vadd.f32 %v339_v53, %v557_v12  ;;  %v331_v56 = vadd.f32 %v376_v51, %v330_v54 }
 0x2e9   :  { %v435_v57 = vpop.f32.mrf.mxu1 }
 0x2ea   :  { %351 = vst [vmem:[#allocation2 + $0x10] sm:$0xff] %v347_v55  ;;  %v345_v58 = vadd.f32 %v331_v56, %v553_v10  ;;  %v342_v59 = vadd.f32 %v435_v57, %v376_v51 }
 0x2eb   :  { %v333_v60 = vpop.f32.mrf.mxu1 }
 0x2ec   :  { %349 = vst [vmem:[#allocation2] sm:$0xff] %v345_v58  ;;  %v348_v61 = vadd.f32 %v342_v59, %v559_v13  ;;  %v334_v62 = vadd.f32 %v376_v51, %v333_v60 }
 0x2ee   :  { %352 = vst [vmem:[#allocation2 + $0x18] sm:$0xff] %v348_v61  ;;  %v346_v63 = vadd.f32 %v334_v62, %v555_v11 }
 0x2f0   :  { %350 = vst [vmem:[#allocation2 + $0x8] sm:$0xff] %v346_v63 }
 0x2f1   :  { %476 = shalt.err (!%p473_p4)
}
 0x2f2   :  { %s488_s1 = smov 128   ;;  %s489_s17 = smov 8  }
 0x2f3   :  { %364 = dma.vmem_to_hbm [thread:$0]  %s359_s0, 512, %s636_s8, [#allocation3], %s488_s1, %s488_s1, %s489_s17  }
 0x2f4   :  { %485 = dma.done.wait [#allocation3], 512  }
 0x2f5   :  { %486 = vsyncadd [#allocation3], 4294966784 }
 0x2f6   :  { %368 = vsyncpa [#allocation3], 1 }

// kernel: basic_layer_forward.7
= control target key start
LH: loop header
LB: loop body
LE: loop exit
PB: predicated region body
PF: predicated region fallthrough
CT: control target
= control target key end

     0   :  { %vm152_vm0 = vcmask 64512   ;;  %v4801_v0 = vmov 0.0   ;;  %vm4802_vm1 = vmmov 0   ;;  %vm1625_vm2 = vcmask 27648   ;;  %s5970_s1 = inlined_call_operand.vmem [shape: bf16[8,4,4,8], index: 1, kind: input, shape index: {}]   ;;  %s5971_s0 = inlined_call_operand.vmem [shape: bf16[8,4,4,8], index: 0, kind: input, shape index: {}]   ;;  %s5972_s3 = inlined_call_operand.vmem [shape: f32[8,4,4,4], index: 3, kind: input, shape index: {}]   ;;  %s5973_s2 = inlined_call_operand.vmem [shape: bf16[8,4,4,8], index: 2, kind: input, shape index: {}]   ;;  %s5974_s4 = inlined_call_operand.vmem [shape: bf16[4,8,128], index: 4, kind: input, shape index: {}]   ;;  %s5975_s5 = inlined_call_operand.vmem [shape: f32[1,128], index: 5, kind: input, shape index: {}]   ;;  %s5976_s6 = inlined_call_operand.vmem [shape: bf16[8,4,128], index: 6, kind: output, shape index: {}]  }
   0x1   :  { %4258 = vmatprep.subr.bf16.mxu0 %v4801_v0  ;;  %4264 = vmatprep.subr.bf16.mxu1 %v4801_v0  ;;  %v56_v1 = vld [vmem:[%s5970_s1] sm:$0x3]  ;;  %v57_v2 = vld [vmem:[%s5970_s1 + $0x2] sm:$0x3]  ;;  %v58_v5 = vld [vmem:[%s5970_s1 + $0x4] sm:$0x3] }
   0x2   :  { %v157_v3 = vsel %vm152_vm0, %v56_v1, 0  ;;  %v203_v4 = vsel %vm152_vm0, %v57_v2, 0  ;;  %4260 = vmatprep.mubr.msk.bf16.mxu0 %vm4802_vm1, %v4801_v0  ;;  %4266 = vmatprep.mubr.msk.bf16.mxu1 %vm4802_vm1, %v4801_v0  ;;  %v59_v6 = vld [vmem:[%s5970_s1 + $0x6] sm:$0x3]  ;;  %v24_v7 = vld [vmem:[%s5971_s0] sm:$0x3] }
   0x3   :  { %4259 = vmatpush3.bf16.xpose.msra.mxu0 %v157_v3  ;;  %4265 = vmatpush3.bf16.xpose.msra.mxu1 %v203_v4  ;;  %v25_v8 = vld [vmem:[%s5971_s0 + $0x2] sm:$0x3]  ;;  %v249_v9 = vsel %vm152_vm0, %v58_v5, 0  ;;  %v295_v10 = vsel %vm152_vm0, %v59_v6, 0  ;;  %v60_v11 = vld [vmem:[%s5970_s1 + $0x8] sm:$0x3] }
   0x4   :  { %4270 = vmatprep.subr.bf16.mxu0 %v4801_v0  ;;  %4276 = vmatprep.subr.bf16.mxu1 %v4801_v0  ;;  %v61_v12 = vld [vmem:[%s5970_s1 + $0xa] sm:$0x3]  ;;  %v26_v13 = vld [vmem:[%s5971_s0 + $0x4] sm:$0x3]  ;;  %v27_v14 = vld [vmem:[%s5971_s0 + $0x6] sm:$0x3] }
   0x5   :  { %v341_v15 = vsel %vm152_vm0, %v60_v11, 0  ;;  %v387_v16 = vsel %vm152_vm0, %v61_v12, 0  ;;  %v62_v17 = vld [vmem:[%s5970_s1 + $0xc] sm:$0x3]  ;;  %v63_v18 = vld [vmem:[%s5970_s1 + $0xe] sm:$0x3] }
   0x6   :  { %v28_v19 = vld [vmem:[%s5971_s0 + $0x8] sm:$0x3]  ;;  %v29_v20 = vld [vmem:[%s5971_s0 + $0xa] sm:$0x3]  ;;  %v433_v21 = vsel %vm152_vm0, %v62_v17, 0  ;;  %v479_v22 = vsel %vm152_vm0, %v63_v18, 0 }
   0x7   :  { %v64_v23 = vld [vmem:[%s5970_s1 + $0x10] sm:$0x3]  ;;  %v65_v24 = vld [vmem:[%s5970_s1 + $0x12] sm:$0x3]  ;;  %v30_v25 = vld [vmem:[%s5971_s0 + $0xc] sm:$0x3] }
   0x8   :  { %v31_v26 = vld [vmem:[%s5971_s0 + $0xe] sm:$0x3]  ;;  %v525_v27 = vsel %vm152_vm0, %v64_v23, 0  ;;  %v571_v28 = vsel %vm152_vm0, %v65_v24, 0  ;;  %v66_v29 = vld [vmem:[%s5970_s1 + $0x14] sm:$0x3] }
   0x9   :  { %v67_v30 = vld [vmem:[%s5970_s1 + $0x16] sm:$0x3]  ;;  %v32_v31 = vld [vmem:[%s5971_s0 + $0x10] sm:$0x3]  ;;  %v33_v32 = vld [vmem:[%s5971_s0 + $0x12] sm:$0x3] }
   0xa   :  { %4261 = vmatmul.mubr.msk.bf16.vlgmr.msra.gmra.mxu0 %vm152_vm0, %v24_v7  ;;  %4267 = vmatmul.mubr.msk.bf16.vlgmr.msra.gmra.mxu1 %vm152_vm0, %v25_v8  ;;  %v617_v33 = vsel %vm152_vm0, %v66_v29, 0  ;;  %v663_v34 = vsel %vm152_vm0, %v67_v30, 0  ;;  %v68_v35 = vld [vmem:[%s5970_s1 + $0x18] sm:$0x3]  ;;  %v69_v36 = vld [vmem:[%s5970_s1 + $0x1a] sm:$0x3] }
   0xb   :  { %4271 = vmatpush3.bf16.xpose.msra.mxu0 %v249_v9  ;;  %4277 = vmatpush3.bf16.xpose.msra.mxu1 %v295_v10  ;;  %v34_v37 = vld [vmem:[%s5971_s0 + $0x14] sm:$0x3]  ;;  %v35_v38 = vld [vmem:[%s5971_s0 + $0x16] sm:$0x3]  ;;  %v709_v39 = vsel %vm152_vm0, %v68_v35, 0  ;;  %v755_v40 = vsel %vm152_vm0, %v69_v36, 0 }
   0xc   :  { %4272 = vmatprep.mubr.msk.bf16.mxu0 %vm4802_vm1, %v4801_v0  ;;  %4278 = vmatprep.mubr.msk.bf16.mxu1 %vm4802_vm1, %v4801_v0  ;;  %v70_v41 = vld [vmem:[%s5970_s1 + $0x1c] sm:$0x3]  ;;  %v71_v42 = vld [vmem:[%s5970_s1 + $0x1e] sm:$0x3]  ;;  %v36_v43 = vld [vmem:[%s5971_s0 + $0x18] sm:$0x3] }
   0xd   :  { %4282 = vmatprep.subr.bf16.mxu0 %v4801_v0  ;;  %4288 = vmatprep.subr.bf16.mxu1 %v4801_v0  ;;  %v37_v44 = vld [vmem:[%s5971_s0 + $0x1a] sm:$0x3]  ;;  %v801_v45 = vsel %vm152_vm0, %v70_v41, 0  ;;  %v847_v46 = vsel %vm152_vm0, %v71_v42, 0  ;;  %v72_v47 = vld [vmem:[%s5970_s1 + $0x20] sm:$0x3] }
   0xe   :  { %v73_v48 = vld [vmem:[%s5970_s1 + $0x22] sm:$0x3]  ;;  %v38_v49 = vld [vmem:[%s5971_s0 + $0x1c] sm:$0x3]  ;;  %v39_v50 = vld [vmem:[%s5971_s0 + $0x1e] sm:$0x3] }
   0xf   :  { %v893_v51 = vsel %vm152_vm0, %v72_v47, 0  ;;  %v939_v52 = vsel %vm152_vm0, %v73_v48, 0  ;;  %v74_v53 = vld [vmem:[%s5970_s1 + $0x24] sm:$0x3]  ;;  %v75_v54 = vld [vmem:[%s5970_s1 + $0x26] sm:$0x3] }
  0x10   :  { %v40_v55 = vld [vmem:[%s5971_s0 + $0x20] sm:$0x3]  ;;  %v41_v56 = vld [vmem:[%s5971_s0 + $0x22] sm:$0x3]  ;;  %v985_v57 = vsel %vm152_vm0, %v74_v53, 0  ;;  %v1031_v58 = vsel %vm152_vm0, %v75_v54, 0 }
  0x11   :  { %v76_v59 = vld [vmem:[%s5970_s1 + $0x28] sm:$0x3]  ;;  %v77_v60 = vld [vmem:[%s5970_s1 + $0x2a] sm:$0x3]  ;;  %v42_v61 = vld [vmem:[%s5971_s0 + $0x24] sm:$0x3] }
  0x12   :  { %4273 = vmatmul.mubr.msk.bf16.vlgmr.msra.gmra.mxu0 %vm152_vm0, %v26_v13  ;;  %4279 = vmatmul.mubr.msk.bf16.vlgmr.msra.gmra.mxu1 %vm152_vm0, %v27_v14  ;;  %v43_v62 = vld [vmem:[%s5971_s0 + $0x26] sm:$0x3]  ;;  %v1077_v63 = vsel %vm152_vm0, %v76_v59, 0  ;;  %v1123_v1 = vsel %vm152_vm0, %v77_v60, 0  ;;  %v78_v2 = vld [vmem:[%s5970_s1 + $0x2c] sm:$0x3] }
  0x13   :  { %4283 = vmatpush3.bf16.xpose.msra.mxu0 %v341_v15  ;;  %4289 = vmatpush3.bf16.xpose.msra.mxu1 %v387_v16  ;;  %v79_v3 = vld [vmem:[%s5970_s1 + $0x2e] sm:$0x3]  ;;  %v44_v4 = vld [vmem:[%s5971_s0 + $0x28] sm:$0x3]  ;;  %v45_v5 = vld [vmem:[%s5971_s0 + $0x2a] sm:$0x3] }
  0x14   :  { %4284 = vmatprep.mubr.msk.bf16.mxu0 %vm4802_vm1, %v4801_v0  ;;  %4290 = vmatprep.mubr.msk.bf16.mxu1 %vm4802_vm1, %v4801_v0  ;;  %v1169_v6 = vsel %vm152_vm0, %v78_v2, 0  ;;  %v1215_v7 = vsel %vm152_vm0, %v79_v3, 0  ;;  %v80_v8 = vld [vmem:[%s5970_s1 + $0x30] sm:$0x3]  ;;  %v81_v9 = vld [vmem:[%s5970_s1 + $0x32] sm:$0x3] }
  0x15   :  { %4294 = vmatprep.subr.bf16.mxu0 %v4801_v0  ;;  %4300 = vmatprep.subr.bf16.mxu1 %v4801_v0  ;;  %v46_v10 = vld [vmem:[%s5971_s0 + $0x2c] sm:$0x3]  ;;  %v47_v11 = vld [vmem:[%s5971_s0 + $0x2e] sm:$0x3]  ;;  %v1261_v12 = vsel %vm152_vm0, %v80_v8, 0  ;;  %v1307_v13 = vsel %vm152_vm0, %v81_v9, 0 }
  0x16   :  { %v82_v14 = vld [vmem:[%s5970_s1 + $0x34] sm:$0x3]  ;;  %v83_v15 = vld [vmem:[%s5970_s1 + $0x36] sm:$0x3]  ;;  %v48_v16 = vld [vmem:[%s5971_s0 + $0x30] sm:$0x3] }
  0x17   :  { %v49_v17 = vld [vmem:[%s5971_s0 + $0x32] sm:$0x3]  ;;  %v1353_v18 = vsel %vm152_vm0, %v82_v14, 0  ;;  %v51_v23 = vld [vmem:[%s5971_s0 + $0x36] sm:$0x3]  ;;  %vm2014_vm3 = vcmask 1041408  }
  0x18   :  { %v53_v29 = vld [vmem:[%s5971_s0 + $0x3a] sm:$0x3]  ;;  %v121_v35 = vld [vmem:[%s5972_s3 + $0x4] sm:$0xf]  ;;  %v123_v48 = vld [vmem:[%s5972_s3 + $0xc] sm:$0xf] }
  0x19   :  { %v127_v14 = vld [vmem:[%s5972_s3 + $0x1c] sm:$0xf]  ;;  %vm2010_vm4 = vcmask 31744   ;;  %vm3552_vm5 = vcmask 1043456  }
  0x1a   :  { %4285 = vmatmul.mubr.msk.bf16.vlgmr.msra.gmra.mxu0 %vm152_vm0, %v28_v19  ;;  %4291 = vmatmul.mubr.msk.bf16.vlgmr.msra.gmra.mxu1 %vm152_vm0, %v29_v20  ;;  %v1399_v19 = vsel %vm152_vm0, %v83_v15, 0  ;;  %v84_v20 = vld [vmem:[%s5970_s1 + $0x38] sm:$0x3] }
  0x1b   :  { %4295 = vmatpush3.bf16.xpose.msra.mxu0 %v433_v21  ;;  %4301 = vmatpush3.bf16.xpose.msra.mxu1 %v479_v22  ;;  %v85_v21 = vld [vmem:[%s5970_s1 + $0x3a] sm:$0x3]  ;;  %v50_v22 = vld [vmem:[%s5971_s0 + $0x34] sm:$0x3]  ;;  %v1445_v24 = vsel %vm152_vm0, %v84_v20, 0 }
  0x1c   :  { %4296 = vmatprep.mubr.msk.bf16.mxu0 %vm4802_vm1, %v4801_v0  ;;  %4302 = vmatprep.mubr.msk.bf16.mxu1 %vm4802_vm1, %v4801_v0 }
  0x1d   :  { %4306 = vmatprep.subr.bf16.mxu0 %v4801_v0  ;;  %4312 = vmatprep.subr.bf16.mxu1 %v4801_v0 }
  0x22   :  { %4297 = vmatmul.mubr.msk.bf16.vlgmr.msra.gmra.mxu0 %vm152_vm0, %v30_v25  ;;  %4303 = vmatmul.mubr.msk.bf16.vlgmr.msra.gmra.mxu1 %vm152_vm0, %v31_v26  ;;  %v1491_v25 = vsel %vm152_vm0, %v85_v21, 0  ;;  %v86_v26 = vld [vmem:[%s5970_s1 + $0x3c] sm:$0x3] }
  0x23   :  { %4307 = vmatpush3.bf16.xpose.msra.mxu0 %v525_v27  ;;  %4313 = vmatpush3.bf16.xpose.msra.mxu1 %v571_v28  ;;  %v87_v27 = vld [vmem:[%s5970_s1 + $0x3e] sm:$0x3]  ;;  %v52_v28 = vld [vmem:[%s5971_s0 + $0x38] sm:$0x3]  ;;  %v1537_v30 = vsel %vm152_vm0, %v86_v26, 0 }
  0x24   :  { %4308 = vmatprep.mubr.msk.bf16.mxu0 %vm4802_vm1, %v4801_v0  ;;  %4314 = vmatprep.mubr.msk.bf16.mxu1 %vm4802_vm1, %v4801_v0 }
  0x25   :  { %4318 = vmatprep.subr.bf16.mxu0 %v4801_v0  ;;  %4324 = vmatprep.subr.bf16.mxu1 %v4801_v0 }
  0x2a   :  { %4309 = vmatmul.mubr.msk.bf16.vlgmr.msra.gmra.mxu0 %vm152_vm0, %v32_v31  ;;  %4315 = vmatmul.mubr.msk.bf16.vlgmr.msra.gmra.mxu1 %vm152_vm0, %v33_v32  ;;  %v1583_v31 = vsel %vm152_vm0, %v87_v27, 0  ;;  %v54_v32 = vld [vmem:[%s5971_s0 + $0x3c] sm:$0x3]  ;;  %v128_v27 = vld [vmem:[%s5972_s3 + $0x20] sm:$0xf] }
  0x2b   :  { %4319 = vmatpush3.bf16.xpose.msra.mxu0 %v617_v33  ;;  %4325 = vmatpush3.bf16.xpose.msra.mxu1 %v663_v34  ;;  %v55_v33 = vld [vmem:[%s5971_s0 + $0x3e] sm:$0x3]  ;;  %v120_v34 = vld [vmem:[%s5972_s3] sm:$0xf] }
  0x2c   :  { %4320 = vmatprep.mubr.msk.bf16.mxu0 %vm4802_vm1, %v4801_v0  ;;  %4326 = vmatprep.mubr.msk.bf16.mxu1 %vm4802_vm1, %v4801_v0 }
  0x2d   :  { %4330 = vmatprep.subr.bf16.mxu0 %v4801_v0  ;;  %4336 = vmatprep.subr.bf16.mxu1 %v4801_v0 }
  0x32   :  { %4321 = vmatmul.mubr.msk.bf16.vlgmr.msra.gmra.mxu0 %vm152_vm0, %v34_v37  ;;  %4327 = vmatmul.mubr.msk.bf16.vlgmr.msra.gmra.mxu1 %vm152_vm0, %v35_v38 }
  0x33   :  { %4331 = vmatpush3.bf16.xpose.msra.mxu0 %v709_v39  ;;  %4337 = vmatpush3.bf16.xpose.msra.mxu1 %v755_v40 }
  0x34   :  { %4332 = vmatprep.mubr.msk.bf16.mxu0 %vm4802_vm1, %v4801_v0  ;;  %4338 = vmatprep.mubr.msk.bf16.mxu1 %vm4802_vm1, %v4801_v0 }
  0x35   :  { %4342 = vmatprep.subr.bf16.mxu0 %v4801_v0  ;;  %4348 = vmatprep.subr.bf16.mxu1 %v4801_v0 }
  0x3a   :  { %4333 = vmatmul.mubr.msk.bf16.vlgmr.msra.gmra.mxu0 %vm152_vm0, %v36_v43  ;;  %4339 = vmatmul.mubr.msk.bf16.vlgmr.msra.gmra.mxu1 %vm152_vm0, %v37_v44 }
  0x3b   :  { %4343 = vmatpush3.bf16.xpose.msra.mxu0 %v801_v45  ;;  %4349 = vmatpush3.bf16.xpose.msra.mxu1 %v847_v46 }
  0x3c   :  { %4344 = vmatprep.mubr.msk.bf16.mxu0 %vm4802_vm1, %v4801_v0  ;;  %4350 = vmatprep.mubr.msk.bf16.mxu1 %vm4802_vm1, %v4801_v0 }
  0x3d   :  { %4354 = vmatprep.subr.bf16.mxu0 %v4801_v0  ;;  %4360 = vmatprep.subr.bf16.mxu1 %v4801_v0 }
  0x42   :  { %4345 = vmatmul.mubr.msk.bf16.vlgmr.msra.gmra.mxu0 %vm152_vm0, %v38_v49  ;;  %4351 = vmatmul.mubr.msk.bf16.vlgmr.msra.gmra.mxu1 %vm152_vm0, %v39_v50  ;;  %v122_v49 = vld [vmem:[%s5972_s3 + $0x8] sm:$0xf] }
  0x43   :  { %4355 = vmatpush3.bf16.xpose.msra.mxu0 %v893_v51  ;;  %4361 = vmatpush3.bf16.xpose.msra.mxu1 %v939_v52 }
  0x44   :  { %4356 = vmatprep.mubr.msk.bf16.mxu0 %vm4802_vm1, %v4801_v0  ;;  %4362 = vmatprep.mubr.msk.bf16.mxu1 %vm4802_vm1, %v4801_v0 }
  0x45   :  { %4366 = vmatprep.subr.bf16.mxu0 %v4801_v0  ;;  %4372 = vmatprep.subr.bf16.mxu1 %v4801_v0 }
  0x4a   :  { %4357 = vmatmul.mubr.msk.bf16.vlgmr.msra.gmra.mxu0 %vm152_vm0, %v40_v55  ;;  %4363 = vmatmul.mubr.msk.bf16.vlgmr.msra.gmra.mxu1 %vm152_vm0, %v41_v56 }
  0x4b   :  { %4367 = vmatpush3.bf16.xpose.msra.mxu0 %v985_v57  ;;  %4373 = vmatpush3.bf16.xpose.msra.mxu1 %v1031_v58 }
  0x4c   :  { %4368 = vmatprep.mubr.msk.bf16.mxu0 %vm4802_vm1, %v4801_v0  ;;  %4374 = vmatprep.mubr.msk.bf16.mxu1 %vm4802_vm1, %v4801_v0 }
  0x4d   :  { %4378 = vmatprep.subr.bf16.mxu0 %v4801_v0  ;;  %4384 = vmatprep.subr.bf16.mxu1 %v4801_v0 }
  0x52   :  { %4369 = vmatmul.mubr.msk.bf16.vlgmr.msra.gmra.mxu0 %vm152_vm0, %v42_v61  ;;  %4375 = vmatmul.mubr.msk.bf16.vlgmr.msra.gmra.mxu1 %vm152_vm0, %v43_v62  ;;  %v125_v62 = vld [vmem:[%s5972_s3 + $0x14] sm:$0xf] }
  0x53   :  { %4379 = vmatpush3.bf16.xpose.msra.mxu0 %v1077_v63  ;;  %4385 = vmatpush3.bf16.xpose.msra.mxu1 %v1123_v1  ;;  %v124_v63 = vld [vmem:[%s5972_s3 + $0x10] sm:$0xf] }
  0x54   :  { %4380 = vmatprep.mubr.msk.bf16.mxu0 %vm4802_vm1, %v4801_v0  ;;  %4386 = vmatprep.mubr.msk.bf16.mxu1 %vm4802_vm1, %v4801_v0 }
  0x55   :  { %4390 = vmatprep.subr.bf16.mxu0 %v4801_v0  ;;  %4396 = vmatprep.subr.bf16.mxu1 %v4801_v0 }
  0x5a   :  { %4381 = vmatmul.mubr.msk.bf16.vlgmr.msra.gmra.mxu0 %vm152_vm0, %v44_v4  ;;  %4387 = vmatmul.mubr.msk.bf16.vlgmr.msra.gmra.mxu1 %vm152_vm0, %v45_v5 }
  0x5b   :  { %4391 = vmatpush3.bf16.xpose.msra.mxu0 %v1169_v6  ;;  %4397 = vmatpush3.bf16.xpose.msra.mxu1 %v1215_v7 }
  0x5c   :  { %4392 = vmatprep.mubr.msk.bf16.mxu0 %vm4802_vm1, %v4801_v0  ;;  %4398 = vmatprep.mubr.msk.bf16.mxu1 %vm4802_vm1, %v4801_v0 }
  0x5d   :  { %4402 = vmatprep.subr.bf16.mxu0 %v4801_v0  ;;  %4408 = vmatprep.subr.bf16.mxu1 %v4801_v0 }
  0x62   :  { %4393 = vmatmul.mubr.msk.bf16.vlgmr.msra.gmra.mxu0 %vm152_vm0, %v46_v10  ;;  %4399 = vmatmul.mubr.msk.bf16.vlgmr.msra.gmra.mxu1 %vm152_vm0, %v47_v11 }
  0x63   :  { %4403 = vmatpush3.bf16.xpose.msra.mxu0 %v1261_v12  ;;  %4409 = vmatpush3.bf16.xpose.msra.mxu1 %v1307_v13  ;;  %v126_v13 = vld [vmem:[%s5972_s3 + $0x18] sm:$0xf] }
  0x64   :  { %4404 = vmatprep.mubr.msk.bf16.mxu0 %vm4802_vm1, %v4801_v0  ;;  %4410 = vmatprep.mubr.msk.bf16.mxu1 %vm4802_vm1, %v4801_v0 }
  0x65   :  { %4414 = vmatprep.subr.bf16.mxu0 %v4801_v0  ;;  %4420 = vmatprep.subr.bf16.mxu1 %v4801_v0 }
  0x6a   :  { %4405 = vmatmul.mubr.msk.bf16.vlgmr.msra.gmra.mxu0 %vm152_vm0, %v48_v16  ;;  %4411 = vmatmul.mubr.msk.bf16.vlgmr.msra.gmra.mxu1 %vm152_vm0, %v49_v17 }
  0x6b   :  { %4415 = vmatpush3.bf16.xpose.msra.mxu0 %v1353_v18  ;;  %4421 = vmatpush3.bf16.xpose.msra.mxu1 %v1399_v19 }
  0x6c   :  { %4416 = vmatprep.mubr.msk.bf16.mxu0 %vm4802_vm1, %v4801_v0  ;;  %4422 = vmatprep.mubr.msk.bf16.mxu1 %vm4802_vm1, %v4801_v0 }
  0x6d   :  { %4426 = vmatprep.subr.bf16.mxu0 %v4801_v0  ;;  %4432 = vmatprep.subr.bf16.mxu1 %v4801_v0 }
  0x72   :  { %4417 = vmatmul.mubr.msk.bf16.vlgmr.msra.gmra.mxu0 %vm152_vm0, %v50_v22  ;;  %4423 = vmatmul.mubr.msk.bf16.vlgmr.msra.gmra.mxu1 %vm152_vm0, %v51_v23 }
  0x73   :  { %4427 = vmatpush3.bf16.xpose.msra.mxu0 %v1445_v24  ;;  %4433 = vmatpush3.bf16.xpose.msra.mxu1 %v1491_v25 }
  0x74   :  { %4428 = vmatprep.mubr.msk.bf16.mxu0 %vm4802_vm1, %v4801_v0  ;;  %4434 = vmatprep.mubr.msk.bf16.mxu1 %vm4802_vm1, %v4801_v0 }
  0x75   :  { %4438 = vmatprep.subr.bf16.mxu0 %v4801_v0  ;;  %4444 = vmatprep.subr.bf16.mxu1 %v4801_v0 }
  0x7a   :  { %4429 = vmatmul.mubr.msk.bf16.vlgmr.msra.gmra.mxu0 %vm152_vm0, %v52_v28  ;;  %4435 = vmatmul.mubr.msk.bf16.vlgmr.msra.gmra.mxu1 %vm152_vm0, %v53_v29  ;;  %v129_v28 = vld [vmem:[%s5972_s3 + $0x24] sm:$0xf] }
  0x7b   :  { %4439 = vmatpush3.bf16.xpose.msra.mxu0 %v1537_v30  ;;  %4445 = vmatpush3.bf16.xpose.msra.mxu1 %v1583_v31 }
  0x7c   :  { %4440 = vmatprep.mubr.msk.bf16.mxu0 %vm4802_vm1, %v4801_v0  ;;  %4446 = vmatprep.mubr.msk.bf16.mxu1 %vm4802_vm1, %v4801_v0 }
  0x7d   :  { %4450 = vmatprep.subr.bf16.mxu0 %v4801_v0  ;;  %4456 = vmatprep.subr.bf16.mxu1 %v4801_v0 }
  0x82   :  { %4441 = vmatmul.mubr.msk.bf16.vlgmr.msra.gmra.mxu0 %vm152_vm0, %v54_v32  ;;  %4447 = vmatmul.mubr.msk.bf16.vlgmr.msra.gmra.mxu1 %vm152_vm0, %v55_v33 }
  0x83   :  { %4452 = vmatprep.mubr.msk.bf16.mxu0 %vm4802_vm1, %v4801_v0  ;;  %4458 = vmatprep.mubr.msk.bf16.mxu1 %vm4802_vm1, %v4801_v0 }
  0xca   :  { %v193_v36 = vpop.f32.mrf.mxu0  ;;  %v239_v37 = vpop.f32.mrf.mxu1 }
  0xcb   :  { %v5203_v38 = vadd.f32 %v193_v36, %v120_v34  ;;  %v5205_v39 = vadd.f32 %v239_v37, %v121_v35 }
  0xcc   :  { %v4262_v40 = vpop.f32.mrf.mxu0  ;;  %v4268_v41 = vpop.f32.mrf.mxu1 }
  0xcd   :  { %v1626_v42 = vsel %vm1625_vm2, %v5203_v38, -inf  ;;  %v1629_v45 = vsel %vm1625_vm2, %v5205_v39, -inf }
  0xce   :  { %v242_v43 = vpop.f32.mrf.mxu1  ;;  %1627 = vmax.xlane.f32.xlu0 %v1626_v42  ;;  %v196_v44 = vpop.f32.mrf.mxu0 }
  0xcf   :  { %v130_v43 = vld [vmem:[%s5972_s3 + $0x28] sm:$0xf]  ;;  %v131_v44 = vld [vmem:[%s5972_s3 + $0x2c] sm:$0xf] }
  0xd0   :  { %v4263_v46 = vpop.f32.mrf.mxu0  ;;  %v4269_v47 = vpop.f32.mrf.mxu1 }
  0xd2   :  { %v331_v50 = vpop.f32.mrf.mxu1  ;;  %1630 = vmax.xlane.f32.xlu0 %v1629_v45  ;;  %v285_v51 = vpop.f32.mrf.mxu0 }
  0xd3   :  { %v5217_v52 = vadd.f32 %v331_v50, %v123_v48  ;;  %v5219_v53 = vadd.f32 %v285_v51, %v122_v49 }
  0xd4   :  { %v4274_v54 = vpop.f32.mrf.mxu0  ;;  %v4280_v55 = vpop.f32.mrf.mxu1 }
  0xd5   :  { %v1632_v56 = vsel %vm1625_vm2, %v5219_v53, -inf  ;;  %v1635_v59 = vsel %vm1625_vm2, %v5217_v52, -inf }
  0xd6   :  { %v334_v57 = vpop.f32.mrf.mxu1  ;;  %1633 = vmax.xlane.f32.xlu1 %v1632_v56  ;;  %v288_v58 = vpop.f32.mrf.mxu0 }
  0xd8   :  { %v4275_v60 = vpop.f32.mrf.mxu0  ;;  %v4281_v61 = vpop.f32.mrf.mxu1 }
  0xd9   :  { %v133_v60 = vld [vmem:[%s5972_s3 + $0x34] sm:$0xf] }
  0xda   :  { %v423_v1 = vpop.f32.mrf.mxu1  ;;  %1636 = vmax.xlane.f32.xlu1 %v1635_v59  ;;  %v377_v2 = vpop.f32.mrf.mxu0  ;;  %v132_v59 = vld [vmem:[%s5972_s3 + $0x30] sm:$0xf] }
  0xdb   :  { %v5231_v3 = vadd.f32 %v423_v1, %v125_v62  ;;  %v5233_v4 = vadd.f32 %v377_v2, %v124_v63 }
  0xdc   :  { %v4286_v5 = vpop.f32.mrf.mxu0  ;;  %v4292_v6 = vpop.f32.mrf.mxu1 }
  0xdd   :  { %v1641_v7 = vsel %vm1625_vm2, %v5231_v3, -inf  ;;  %v1638_v8 = vsel %vm1625_vm2, %v5233_v4, -inf }
  0xde   :  { %v426_v9 = vpop.f32.mrf.mxu1  ;;  %1642 = vmax.xlane.f32.xlu1 %v1641_v7  ;;  %1639 = vmax.xlane.f32.xlu0 %v1638_v8  ;;  %v380_v10 = vpop.f32.mrf.mxu0 }
  0xe0   :  { %v4287_v11 = vpop.f32.mrf.mxu0  ;;  %v4293_v12 = vpop.f32.mrf.mxu1 }
  0xe1   :  { %v134_v12 = vld [vmem:[%s5972_s3 + $0x38] sm:$0xf] }
  0xe2   :  { %v469_v15 = vpop.f32.mrf.mxu0  ;;  %v515_v16 = vpop.f32.mrf.mxu1 }
  0xe3   :  { %v5245_v17 = vadd.f32 %v469_v15, %v126_v13  ;;  %v5247_v18 = vadd.f32 %v515_v16, %v127_v14  ;;  %v135_v13 = vld [vmem:[%s5972_s3 + $0x3c] sm:$0xf] }
  0xe4   :  { %v4298_v19 = vpop.f32.mrf.mxu0  ;;  %v4304_v20 = vpop.f32.mrf.mxu1 }
  0xe5   :  { %v1647_v21 = vsel %vm1625_vm2, %v5247_v18, -inf  ;;  %v1644_v22 = vsel %vm1625_vm2, %v5245_v17, -inf }
  0xe6   :  { %v518_v23 = vpop.f32.mrf.mxu1  ;;  %1648 = vmax.xlane.f32.xlu1 %v1647_v21  ;;  %1645 = vmax.xlane.f32.xlu0 %v1644_v22  ;;  %v472_v24 = vpop.f32.mrf.mxu0 }
  0xe8   :  { %v4299_v25 = vpop.f32.mrf.mxu0  ;;  %v4305_v26 = vpop.f32.mrf.mxu1 }
  0xea   :  { %v561_v29 = vpop.f32.mrf.mxu0  ;;  %v607_v30 = vpop.f32.mrf.mxu1 }
  0xeb   :  { %v5259_v31 = vadd.f32 %v561_v29, %v128_v27  ;;  %v5261_v32 = vadd.f32 %v607_v30, %v129_v28  ;;  %v136_v28 = vld [vmem:[%s5972_s3 + $0x40] sm:$0xf]  ;;  %v137_v29 = vld [vmem:[%s5972_s3 + $0x44] sm:$0xf] }
  0xec   :  { %v4310_v33 = vpop.f32.mrf.mxu0  ;;  %v4316_v34 = vpop.f32.mrf.mxu1 }
  0xed   :  { %v1653_v35 = vsel %vm1625_vm2, %v5261_v32, -inf  ;;  %v1650_v36 = vsel %vm1625_vm2, %v5259_v31, -inf }
  0xee   :  { %v610_v37 = vpop.f32.mrf.mxu1  ;;  %1654 = vmax.xlane.f32.xlu1 %v1653_v35  ;;  %1651 = vmax.xlane.f32.xlu0 %v1650_v36  ;;  %v564_v40 = vpop.f32.mrf.mxu0 }
  0xf0   :  { %v4311_v41 = vpop.f32.mrf.mxu0  ;;  %v4317_v42 = vpop.f32.mrf.mxu1 }
  0xf2   :  { %v653_v45 = vpop.f32.mrf.mxu0  ;;  %v699_v46 = vpop.f32.mrf.mxu1 }
  0xf3   :  { %v5273_v47 = vadd.f32 %v653_v45, %v130_v43  ;;  %v5275_v48 = vadd.f32 %v699_v46, %v131_v44  ;;  %v138_v46 = vld [vmem:[%s5972_s3 + $0x48] sm:$0xf] }
  0xf4   :  { %v4322_v49 = vpop.f32.mrf.mxu0  ;;  %v4328_v50 = vpop.f32.mrf.mxu1 }
  0xf5   :  { %v1659_v51 = vsel %vm1625_vm2, %v5275_v48, -inf  ;;  %v1656_v54 = vsel %vm1625_vm2, %v5273_v47, -inf  ;;  %v139_v49 = vld [vmem:[%s5972_s3 + $0x4c] sm:$0xf] }
  0xf6   :  { %v702_v55 = vpop.f32.mrf.mxu1  ;;  %1660 = vmax.xlane.f32.xlu1 %v1659_v51  ;;  %1657 = vmax.xlane.f32.xlu0 %v1656_v54  ;;  %v656_v56 = vpop.f32.mrf.mxu0 }
  0xf8   :  { %v4323_v57 = vpop.f32.mrf.mxu0  ;;  %v4329_v58 = vpop.f32.mrf.mxu1 }
  0xfa   :  { %v745_v61 = vpop.f32.mrf.mxu0  ;;  %v791_v62 = vpop.f32.mrf.mxu1 }
  0xfb   :  { %v5287_v63 = vadd.f32 %v745_v61, %v132_v59  ;;  %v5289_v1 = vadd.f32 %v791_v62, %v133_v60 }
  0xfc   :  { %v4334_v2 = vpop.f32.mrf.mxu0  ;;  %v4340_v5 = vpop.f32.mrf.mxu1 }
  0xfd   :  { %v1665_v6 = vsel %vm1625_vm2, %v5289_v1, -inf  ;;  %v1662_v7 = vsel %vm1625_vm2, %v5287_v63, -inf  ;;  %v140_v5 = vld [vmem:[%s5972_s3 + $0x50] sm:$0xf] }
  0xfe   :  { %v794_v8 = vpop.f32.mrf.mxu1  ;;  %1666 = vmax.xlane.f32.xlu1 %v1665_v6  ;;  %1663 = vmax.xlane.f32.xlu0 %v1662_v7  ;;  %v748_v9 = vpop.f32.mrf.mxu0  ;;  %v141_v6 = vld [vmem:[%s5972_s3 + $0x54] sm:$0xf] }
 0x100   :  { %v4335_v10 = vpop.f32.mrf.mxu0  ;;  %v4341_v11 = vpop.f32.mrf.mxu1 }
 0x102   :  { %v837_v14 = vpop.f32.mrf.mxu0  ;;  %v883_v15 = vpop.f32.mrf.mxu1 }
 0x103   :  { %v5301_v16 = vadd.f32 %v837_v14, %v134_v12  ;;  %v5303_v19 = vadd.f32 %v883_v15, %v135_v13 }
 0x104   :  { %v4346_v20 = vpop.f32.mrf.mxu0  ;;  %v4352_v21 = vpop.f32.mrf.mxu1 }
 0x105   :  { %v1671_v22 = vsel %vm1625_vm2, %v5303_v19, -inf  ;;  %v1668_v23 = vsel %vm1625_vm2, %v5301_v16, -inf }
 0x106   :  { %v886_v24 = vpop.f32.mrf.mxu1  ;;  %1672 = vmax.xlane.f32.xlu1 %v1671_v22  ;;  %1669 = vmax.xlane.f32.xlu0 %v1668_v23  ;;  %v840_v25 = vpop.f32.mrf.mxu0  ;;  %v142_v23 = vld [vmem:[%s5972_s3 + $0x58] sm:$0xf] }
 0x107   :  { %v143_v24 = vld [vmem:[%s5972_s3 + $0x5c] sm:$0xf] }
 0x108   :  { %v4347_v26 = vpop.f32.mrf.mxu0  ;;  %v4353_v27 = vpop.f32.mrf.mxu1 }
 0x10a   :  { %v929_v30 = vpop.f32.mrf.mxu0  ;;  %v975_v33 = vpop.f32.mrf.mxu1 }
 0x10b   :  { %v5315_v34 = vadd.f32 %v929_v30, %v136_v28  ;;  %v5317_v35 = vadd.f32 %v975_v33, %v137_v29 }
 0x10c   :  { %v4358_v36 = vpop.f32.mrf.mxu0  ;;  %v4364_v37 = vpop.f32.mrf.mxu1 }
 0x10d   :  { %v1677_v40 = vsel %vm1625_vm2, %v5317_v35, -inf  ;;  %v1674_v41 = vsel %vm1625_vm2, %v5315_v34, -inf }
 0x10e   :  { %v978_v42 = vpop.f32.mrf.mxu1  ;;  %1678 = vmax.xlane.f32.xlu1 %v1677_v40  ;;  %1675 = vmax.xlane.f32.xlu0 %v1674_v41  ;;  %v932_v43 = vpop.f32.mrf.mxu0 }
 0x10f   :  { %v145_v43 = vld [vmem:[%s5972_s3 + $0x64] sm:$0xf] }
 0x110   :  { %v4359_v44 = vpop.f32.mrf.mxu0  ;;  %v4365_v45 = vpop.f32.mrf.mxu1 }
 0x111   :  { %v144_v44 = vld [vmem:[%s5972_s3 + $0x60] sm:$0xf] }
 0x112   :  { %v1021_v50 = vpop.f32.mrf.mxu0  ;;  %v1067_v51 = vpop.f32.mrf.mxu1 }
 0x113   :  { %v5329_v54 = vadd.f32 %v1021_v50, %v138_v46  ;;  %v5331_v55 = vadd.f32 %v1067_v51, %v139_v49 }
 0x114   :  { %v4370_v56 = vpop.f32.mrf.mxu0  ;;  %v4376_v57 = vpop.f32.mrf.mxu1 }
 0x115   :  { %v1683_v58 = vsel %vm1625_vm2, %v5331_v55, -inf  ;;  %v1680_v59 = vsel %vm1625_vm2, %v5329_v54, -inf }
 0x116   :  { %v1070_v60 = vpop.f32.mrf.mxu1  ;;  %1684 = vmax.xlane.f32.xlu1 %v1683_v58  ;;  %1681 = vmax.xlane.f32.xlu0 %v1680_v59  ;;  %v1024_v61 = vpop.f32.mrf.mxu0 }
 0x118   :  { %v4371_v62 = vpop.f32.mrf.mxu0  ;;  %v4377_v2 = vpop.f32.mrf.mxu1 }
 0x119   :  { %v147_v2 = vld [vmem:[%s5972_s3 + $0x6c] sm:$0xf] }
 0x11a   :  { %v1113_v7 = vpop.f32.mrf.mxu0  ;;  %v1159_v8 = vpop.f32.mrf.mxu1 }
 0x11b   :  { %v5343_v9 = vadd.f32 %v1113_v7, %v140_v5  ;;  %v5345_v10 = vadd.f32 %v1159_v8, %v141_v6  ;;  %v146_v5 = vld [vmem:[%s5972_s3 + $0x68] sm:$0xf] }
 0x11c   :  { %v4382_v11 = vpop.f32.mrf.mxu0  ;;  %v4388_v12 = vpop.f32.mrf.mxu1 }
 0x11d   :  { %v1689_v13 = vsel %vm1625_vm2, %v5345_v10, -inf  ;;  %v1686_v14 = vsel %vm1625_vm2, %v5343_v9, -inf }
 0x11e   :  { %v1162_v15 = vpop.f32.mrf.mxu1  ;;  %1690 = vmax.xlane.f32.xlu1 %v1689_v13  ;;  %1687 = vmax.xlane.f32.xlu0 %v1686_v14  ;;  %v1116_v20 = vpop.f32.mrf.mxu0 }
 0x120   :  { %v4383_v21 = vpop.f32.mrf.mxu0  ;;  %v4389_v22 = vpop.f32.mrf.mxu1 }
 0x122   :  { %v1205_v25 = vpop.f32.mrf.mxu0  ;;  %v1251_v26 = vpop.f32.mrf.mxu1 }
 0x123   :  { %v5357_v27 = vadd.f32 %v1205_v25, %v142_v23  ;;  %v5359_v28 = vadd.f32 %v1251_v26, %v143_v24  ;;  %v149_v24 = vld [vmem:[%s5972_s3 + $0x74] sm:$0xf]  ;;  %v148_v25 = vld [vmem:[%s5972_s3 + $0x70] sm:$0xf] }
 0x124   :  { %v4394_v29 = vpop.f32.mrf.mxu0  ;;  %v4400_v30 = vpop.f32.mrf.mxu1 }
 0x125   :  { %v1692_v33 = vsel %vm1625_vm2, %v5357_v27, -inf  ;;  %v1695_v40 = vsel %vm1625_vm2, %v5359_v28, -inf }
 0x126   :  { %v1254_v36 = vpop.f32.mrf.mxu1  ;;  %1693 = vmax.xlane.f32.xlu0 %v1692_v33  ;;  %v1208_v37 = vpop.f32.mrf.mxu0 }
 0x128   :  { %v4395_v41 = vpop.f32.mrf.mxu0  ;;  %v4401_v42 = vpop.f32.mrf.mxu1 }
 0x12a   :  { %v1343_v45 = vpop.f32.mrf.mxu1  ;;  %1696 = vmax.xlane.f32.xlu0 %v1695_v40  ;;  %v1297_v46 = vpop.f32.mrf.mxu0 }
 0x12b   :  { %v5371_v49 = vadd.f32 %v1343_v45, %v145_v43  ;;  %v5373_v50 = vadd.f32 %v1297_v46, %v144_v44  ;;  %v151_v46 = vld [vmem:[%s5972_s3 + $0x7c] sm:$0xf] }
 0x12c   :  { %v4406_v51 = vpop.f32.mrf.mxu0  ;;  %v4412_v56 = vpop.f32.mrf.mxu1 }
 0x12d   :  { %v1698_v57 = vsel %vm1625_vm2, %v5373_v50, -inf  ;;  %v1701_v60 = vsel %vm1625_vm2, %v5371_v49, -inf  ;;  %v150_v51 = vld [vmem:[%s5972_s3 + $0x78] sm:$0xf] }
 0x12e   :  { %v1346_v58 = vpop.f32.mrf.mxu1  ;;  %1699 = vmax.xlane.f32.xlu0 %v1698_v57  ;;  %v1300_v59 = vpop.f32.mrf.mxu0 }
 0x130   :  { %v4407_v61 = vpop.f32.mrf.mxu0  ;;  %v4413_v62 = vpop.f32.mrf.mxu1 }
 0x132   :  { %v1435_v6 = vpop.f32.mrf.mxu1  ;;  %1702 = vmax.xlane.f32.xlu0 %v1701_v60  ;;  %v1389_v7 = vpop.f32.mrf.mxu0 }
 0x133   :  { %v5385_v8 = vadd.f32 %v1435_v6, %v147_v2  ;;  %v5387_v11 = vadd.f32 %v1389_v7, %v146_v5 }
 0x134   :  { %v4418_v12 = vpop.f32.mrf.mxu0  ;;  %v4424_v13 = vpop.f32.mrf.mxu1 }
 0x135   :  { %v1704_v14 = vsel %vm1625_vm2, %v5387_v11, -inf  ;;  %v1707_v21 = vsel %vm1625_vm2, %v5385_v8, -inf }
 0x136   :  { %v1438_v15 = vpop.f32.mrf.mxu1  ;;  %1705 = vmax.xlane.f32.xlu0 %v1704_v14  ;;  %v1392_v20 = vpop.f32.mrf.mxu0 }
 0x138   :  { %v4419_v22 = vpop.f32.mrf.mxu0  ;;  %v4425_v23 = vpop.f32.mrf.mxu1 }
 0x13a   :  { %v1527_v26 = vpop.f32.mrf.mxu1  ;;  %1708 = vmax.xlane.f32.xlu0 %v1707_v21  ;;  %v1481_v29 = vpop.f32.mrf.mxu0 }
 0x13b   :  { %v5399_v30 = vadd.f32 %v1527_v26, %v149_v24  ;;  %v5401_v33 = vadd.f32 %v1481_v29, %v148_v25 }
 0x13c   :  { %v4430_v36 = vpop.f32.mrf.mxu0  ;;  %v4436_v37 = vpop.f32.mrf.mxu1 }
 0x13d   :  { %v1710_v40 = vsel %vm1625_vm2, %v5401_v33, -inf  ;;  %v1713_v43 = vsel %vm1625_vm2, %v5399_v30, -inf }
 0x13e   :  { %v1530_v41 = vpop.f32.mrf.mxu1  ;;  %1711 = vmax.xlane.f32.xlu0 %v1710_v40  ;;  %v1484_v42 = vpop.f32.mrf.mxu0 }
 0x140   :  { %v4431_v44 = vpop.f32.mrf.mxu0  ;;  %v4437_v45 = vpop.f32.mrf.mxu1 }
 0x142   :  { %v1619_v56 = vpop.f32.mrf.mxu1  ;;  %1714 = vmax.xlane.f32.xlu0 %v1713_v43  ;;  %v1573_v57 = vpop.f32.mrf.mxu0 }
 0x143   :  { %v5413_v58 = vadd.f32 %v1619_v56, %v151_v46  ;;  %v5415_v59 = vadd.f32 %v1573_v57, %v150_v51 }
 0x144   :  { %v4442_v60 = vpop.f32.mrf.mxu0  ;;  %v4448_v61 = vpop.f32.mrf.mxu1 }
 0x145   :  { %v1716_v62 = vsel %vm1625_vm2, %v5415_v59, -inf  ;;  %v1719_v6 = vsel %vm1625_vm2, %v5413_v58, -inf }
 0x146   :  { %v1622_v2 = vpop.f32.mrf.mxu1  ;;  %1717 = vmax.xlane.f32.xlu0 %v1716_v62  ;;  %v1576_v5 = vpop.f32.mrf.mxu0 }
 0x148   :  { %v4443_v7 = vpop.f32.mrf.mxu0  ;;  %v4449_v12 = vpop.f32.mrf.mxu1 }
 0x14a   :  { %1720 = vmax.xlane.f32.xlu0 %v1719_v6 }
 0x157   :  { %v1628_v13 = vpop.xlane.xlu0 %1627 }
 0x158   :  { %v1722_v14 = vsub.f32 %v5203_v38, %v1628_v13 }
 0x15a   :  { %v1754_v15 = vmul.f32 1.442695, %v1722_v14 }
 0x15b   :  { %v1631_v20 = vpop.xlane.xlu0 %1630 }
 0x15c   :  { %4673 = vpow2.f32 %v1754_v15  ;;  %v1723_v21 = vsub.f32 %v5205_v39, %v1631_v20 }
 0x15e   :  { %v1756_v22 = vmul.f32 1.442695, %v1723_v21 }
 0x15f   :  { %v1634_v23 = vpop.xlane.xlu1 %1633 }
 0x160   :  { %4675 = vpow2.f32 %v1756_v22  ;;  %v1724_v24 = vsub.f32 %v5219_v53, %v1634_v23 }
 0x162   :  { %v1758_v25 = vmul.f32 1.442695, %v1724_v24 }
 0x163   :  { %v1637_v26 = vpop.xlane.xlu1 %1636 }
 0x164   :  { %4677 = vpow2.f32 %v1758_v25  ;;  %v1725_v29 = vsub.f32 %v5217_v52, %v1637_v26  ;;  %v88_v26 = vld [vmem:[%s5973_s2] sm:$0x3] }
 0x166   :  { %v1760_v36 = vmul.f32 1.442695, %v1725_v29  ;;  %v89_v29 = vld [vmem:[%s5973_s2 + $0x2] sm:$0x3] }
 0x167   :  { %v1643_v37 = vpop.xlane.xlu1 %1642  ;;  %v1640_v40 = vpop.xlane.xlu0 %1639 }
 0x168   :  { %4679 = vpow2.f32 %v1760_v36  ;;  %v1727_v38 = vsub.f32 %v5231_v3, %v1643_v37  ;;  %v1726_v41 = vsub.f32 %v5233_v4, %v1640_v40  ;;  %v2062_v36 = vsel %vm2014_vm3, %v89_v29, 0 }
 0x169   :  { %v5427_v42 = vpop.eup %4673  ;;  %4457 = vmatpush3.bf16.msra.mxu1 %v2062_v36 }
 0x16a   :  { %v1762_v39 = vmul.f32 1.442695, %v1726_v41  ;;  %v1818_v43 = vsel %vm1625_vm2, %v5427_v42, 0.0  ;;  %v1764_v53 = vmul.f32 1.442695, %v1727_v38  ;;  %4468 = vmatprep.subr.bf16.mxu1 %v4801_v0 }
 0x16b   :  { %1819 = vadd.xlane.f32.xlu1 %v1818_v43 }
 0x16c   :  { %4681 = vpow2.f32 %v1762_v39 }
 0x16d   :  { %v5431_v44 = vpop.eup %4675  ;;  %4683 = vpow2.f32 %v1764_v53 }
 0x16e   :  { %v1821_v52 = vsel %vm1625_vm2, %v5431_v44, 0.0 }
 0x16f   :  { %1822 = vadd.xlane.f32.xlu1 %v1821_v52  ;;  %v1649_v45 = vpop.xlane.xlu1 %1648  ;;  %v1646_v3 = vpop.xlane.xlu0 %1645 }
 0x170   :  { %v1729_v4 = vsub.f32 %v5247_v18, %v1649_v45  ;;  %v1728_v46 = vsub.f32 %v5245_v17, %v1646_v3 }
 0x171   :  { %v5437_v51 = vpop.eup %4677 }
 0x172   :  { %v1766_v56 = vmul.f32 1.442695, %v1728_v46  ;;  %v1824_v57 = vsel %vm1625_vm2, %v5437_v51, 0.0  ;;  %v1768_v60 = vmul.f32 1.442695, %v1729_v4 }
 0x173   :  { %1825 = vadd.xlane.f32.xlu1 %v1824_v57 }
 0x174   :  { %4685 = vpow2.f32 %v1766_v56 }
 0x175   :  { %v5441_v61 = vpop.eup %4679  ;;  %4687 = vpow2.f32 %v1768_v60 }
 0x176   :  { %v1827_v62 = vsel %vm1625_vm2, %v5441_v61, 0.0 }
 0x177   :  { %1828 = vadd.xlane.f32.xlu1 %v1827_v62  ;;  %v1655_v2 = vpop.xlane.xlu1 %1654  ;;  %v1652_v18 = vpop.xlane.xlu0 %1651 }
 0x178   :  { %v1731_v17 = vsub.f32 %v5261_v32, %v1655_v2  ;;  %v1730_v5 = vsub.f32 %v5259_v31, %v1652_v18 }
 0x179   :  { %v5447_v6 = vpop.eup %4681 }
 0x17a   :  { %v1770_v7 = vmul.f32 1.442695, %v1730_v5  ;;  %v1772_v12 = vmul.f32 1.442695, %v1731_v17  ;;  %v1830_v13 = vsel %vm1625_vm2, %v5447_v6, 0.0  ;;  %v5451_v14 = vpop.eup %4683 }
 0x17b   :  { %1831 = vadd.xlane.f32.xlu1 %v1830_v13  ;;  %v1833_v20 = vsel %vm1625_vm2, %v5451_v14, 0.0 }
 0x17c   :  { %4689 = vpow2.f32 %v1770_v7 }
 0x17d   :  { %4691 = vpow2.f32 %v1772_v12 }
 0x17f   :  { %v1661_v15 = vpop.xlane.xlu1 %1660  ;;  %v1658_v21 = vpop.xlane.xlu0 %1657  ;;  %1834 = vadd.xlane.f32.xlu1 %v1833_v20 }
 0x180   :  { %v1733_v32 = vsub.f32 %v5275_v48, %v1661_v15  ;;  %v1732_v31 = vsub.f32 %v5273_v47, %v1658_v21  ;;  %v2016_v47 = vsel %vm2014_vm3, %v88_v26, 0 }
 0x181   :  { %v5457_v22 = vpop.eup %4685  ;;  %4451 = vmatpush3.bf16.msra.mxu0 %v2016_v47 }
 0x182   :  { %v1776_v23 = vmul.f32 1.442695, %v1733_v32  ;;  %v1774_v24 = vmul.f32 1.442695, %v1732_v31  ;;  %v1836_v25 = vsel %vm1625_vm2, %v5457_v22, 0.0  ;;  %v5467_v48 = vpop.eup %4687  ;;  %4462 = vmatprep.subr.bf16.mxu0 %v4801_v0 }
 0x183   :  { %1837 = vadd.xlane.f32.xlu1 %v1836_v25  ;;  %v1839_v40 = vsel %vm1625_vm2, %v5467_v48, 0.0 }
 0x184   :  { %4693 = vpow2.f32 %v1776_v23 }
 0x185   :  { %4695 = vpow2.f32 %v1774_v24 }
 0x187   :  { %v1667_v37 = vpop.xlane.xlu1 %1666  ;;  %v1664_v38 = vpop.xlane.xlu0 %1663  ;;  %1840 = vadd.xlane.f32.xlu1 %v1839_v40 }
 0x188   :  { %v1735_v41 = vsub.f32 %v5289_v1, %v1667_v37  ;;  %v1734_v39 = vsub.f32 %v5287_v63, %v1664_v38 }
 0x189   :  { %v5477_v43 = vpop.eup %4689 }
 0x18a   :  { %v1780_v53 = vmul.f32 1.442695, %v1735_v41  ;;  %v1778_v52 = vmul.f32 1.442695, %v1734_v39  ;;  %v1842_v45 = vsel %vm1625_vm2, %v5477_v43, 0.0  ;;  %v5481_v3 = vpop.eup %4691 }
 0x18b   :  { %1843 = vadd.xlane.f32.xlu1 %v1842_v45  ;;  %v1845_v46 = vsel %vm1625_vm2, %v5481_v3, 0.0 }
 0x18c   :  { %4697 = vpow2.f32 %v1780_v53 }
 0x18d   :  { %4699 = vpow2.f32 %v1778_v52 }
 0x18f   :  { %v1673_v4 = vpop.xlane.xlu1 %1672  ;;  %v1670_v1 = vpop.xlane.xlu0 %1669  ;;  %1846 = vadd.xlane.f32.xlu1 %v1845_v46 }
 0x190   :  { %v1737_v56 = vsub.f32 %v5303_v19, %v1673_v4  ;;  %v1736_v63 = vsub.f32 %v5301_v16, %v1670_v1 }
 0x191   :  { %v5487_v57 = vpop.eup %4693 }
 0x192   :  { %v5489_v60 = vpop.eup %4695  ;;  %v1784_v62 = vmul.f32 1.442695, %v1737_v56  ;;  %v1782_v2 = vmul.f32 1.442695, %v1736_v63  ;;  %v1851_v18 = vsel %vm1625_vm2, %v5487_v57, 0.0 }
 0x193   :  { %v1848_v17 = vsel %vm1625_vm2, %v5489_v60, 0.0  ;;  %1852 = vadd.xlane.f32.xlu1 %v1851_v18 }
 0x194   :  { %4701 = vpow2.f32 %v1784_v62  ;;  %1849 = vadd.xlane.f32.xlu0 %v1848_v17 }
 0x195   :  { %4703 = vpow2.f32 %v1782_v2 }
 0x197   :  { %v1679_v19 = vpop.xlane.xlu1 %1678  ;;  %v1676_v5 = vpop.xlane.xlu0 %1675 }
 0x198   :  { %v1739_v16 = vsub.f32 %v5317_v35, %v1679_v19  ;;  %v1738_v7 = vsub.f32 %v5315_v34, %v1676_v5 }
 0x199   :  { %v5497_v12 = vpop.eup %4697 }
 0x19a   :  { %v5499_v13 = vpop.eup %4699  ;;  %v1788_v15 = vmul.f32 1.442695, %v1739_v16  ;;  %v1786_v20 = vmul.f32 1.442695, %v1738_v7  ;;  %v1857_v21 = vsel %vm1625_vm2, %v5497_v12, 0.0 }
 0x19b   :  { %1858 = vadd.xlane.f32.xlu1 %v1857_v21  ;;  %v1854_v32 = vsel %vm1625_vm2, %v5499_v13, 0.0 }
 0x19c   :  { %4705 = vpow2.f32 %v1788_v15  ;;  %1855 = vadd.xlane.f32.xlu0 %v1854_v32 }
 0x19d   :  { %4707 = vpow2.f32 %v1786_v20 }
 0x19f   :  { %v1685_v31 = vpop.xlane.xlu1 %1684  ;;  %v1682_v35 = vpop.xlane.xlu0 %1681 }
 0x1a0   :  { %v1741_v34 = vsub.f32 %v5331_v55, %v1685_v31  ;;  %v1740_v23 = vsub.f32 %v5329_v54, %v1682_v35 }
 0x1a1   :  { %v5507_v24 = vpop.eup %4701 }
 0x1a2   :  { %v5509_v25 = vpop.eup %4703  ;;  %v1792_v26 = vmul.f32 1.442695, %v1741_v34  ;;  %v1790_v29 = vmul.f32 1.442695, %v1740_v23  ;;  %v1863_v47 = vsel %vm1625_vm2, %v5507_v24, 0.0 }
 0x1a3   :  { %1864 = vadd.xlane.f32.xlu1 %v1863_v47  ;;  %v1860_v36 = vsel %vm1625_vm2, %v5509_v25, 0.0 }
 0x1a4   :  { %4709 = vpow2.f32 %v1792_v26  ;;  %1861 = vadd.xlane.f32.xlu0 %v1860_v36 }
 0x1a5   :  { %4711 = vpow2.f32 %v1790_v29 }
 0x1a7   :  { %v1691_v37 = vpop.xlane.xlu1 %1690  ;;  %v1688_v55 = vpop.xlane.xlu0 %1687 }
 0x1a8   :  { %v1743_v54 = vsub.f32 %v5345_v10, %v1691_v37  ;;  %v1742_v40 = vsub.f32 %v5343_v9, %v1688_v55 }
 0x1a9   :  { %v5517_v38 = vpop.eup %4705 }
 0x1aa   :  { %v5519_v41 = vpop.eup %4707  ;;  %v1796_v39 = vmul.f32 1.442695, %v1743_v54  ;;  %v1794_v53 = vmul.f32 1.442695, %v1742_v40  ;;  %v1869_v52 = vsel %vm1625_vm2, %v5517_v38, 0.0 }
 0x1ab   :  { %1870 = vadd.xlane.f32.xlu1 %v1869_v52  ;;  %v1866_v45 = vsel %vm1625_vm2, %v5519_v41, 0.0 }
 0x1ac   :  { %4713 = vpow2.f32 %v1796_v39  ;;  %1867 = vadd.xlane.f32.xlu0 %v1866_v45 }
 0x1ad   :  { %4715 = vpow2.f32 %v1794_v53 }
 0x1af   :  { %v1694_v4 = vpop.xlane.xlu0 %1693 }
 0x1b0   :  { %v1744_v10 = vsub.f32 %v5357_v27, %v1694_v4 }
 0x1b1   :  { %v5526_v9 = vpop.eup %4709 }
 0x1b2   :  { %v5528_v46 = vpop.eup %4711  ;;  %v1798_v1 = vmul.f32 1.442695, %v1744_v10  ;;  %v1875_v56 = vsel %vm1625_vm2, %v5526_v9, 0.0 }
 0x1b3   :  { %1876 = vadd.xlane.f32.xlu1 %v1875_v56  ;;  %v1697_v63 = vpop.xlane.xlu0 %1696  ;;  %v1872_v62 = vsel %vm1625_vm2, %v5528_v46, 0.0 }
 0x1b4   :  { %4717 = vpow2.f32 %v1798_v1  ;;  %v1745_v2 = vsub.f32 %v5359_v28, %v1697_v63  ;;  %1873 = vadd.xlane.f32.xlu0 %v1872_v62 }
 0x1b6   :  { %v1800_v18 = vmul.f32 1.442695, %v1745_v2 }
 0x1b7   :  { %v1700_v17 = vpop.xlane.xlu0 %1699 }
 0x1b8   :  { %4719 = vpow2.f32 %v1800_v18  ;;  %v1746_v27 = vsub.f32 %v5373_v50, %v1700_v17 }
 0x1b9   :  { %v5536_v19 = vpop.eup %4713 }
 0x1ba   :  { %v5538_v5 = vpop.eup %4715  ;;  %v1802_v16 = vmul.f32 1.442695, %v1746_v27  ;;  %v1881_v7 = vsel %vm1625_vm2, %v5536_v19, 0.0 }
 0x1bb   :  { %1882 = vadd.xlane.f32.xlu1 %v1881_v7  ;;  %v1703_v15 = vpop.xlane.xlu0 %1702  ;;  %v1878_v20 = vsel %vm1625_vm2, %v5538_v5, 0.0 }
 0x1bc   :  { %4721 = vpow2.f32 %v1802_v16  ;;  %v1747_v28 = vsub.f32 %v5371_v49, %v1703_v15  ;;  %1879 = vadd.xlane.f32.xlu0 %v1878_v20 }
 0x1be   :  { %v1804_v21 = vmul.f32 1.442695, %v1747_v28 }
 0x1bf   :  { %v1706_v32 = vpop.xlane.xlu0 %1705 }
 0x1c0   :  { %4723 = vpow2.f32 %v1804_v21  ;;  %v1748_v50 = vsub.f32 %v5387_v11, %v1706_v32 }
 0x1c1   :  { %v5546_v31 = vpop.eup %4717 }
 0x1c2   :  { %v1806_v35 = vmul.f32 1.442695, %v1748_v50  ;;  %v1884_v34 = vsel %vm1625_vm2, %v5546_v31, 0.0 }
 0x1c3   :  { %v1709_v23 = vpop.xlane.xlu0 %1708  ;;  %1885 = vadd.xlane.f32.xlu0 %v1884_v34 }
 0x1c4   :  { %4725 = vpow2.f32 %v1806_v35  ;;  %v1749_v26 = vsub.f32 %v5385_v8, %v1709_v23  ;;  %v90_v35 = vld [vmem:[%s5973_s2 + $0x4] sm:$0x3] }
 0x1c5   :  { %v5551_v29 = vpop.eup %4719 }
 0x1c6   :  { %v1808_v49 = vmul.f32 1.442695, %v1749_v26  ;;  %v1887_v47 = vsel %vm1625_vm2, %v5551_v29, 0.0 }
 0x1c7   :  { %1888 = vadd.xlane.f32.xlu1 %v1887_v47  ;;  %v1712_v36 = vpop.xlane.xlu0 %1711 }
 0x1c8   :  { %4727 = vpow2.f32 %v1808_v49  ;;  %v1750_v11 = vsub.f32 %v5401_v33, %v1712_v36  ;;  %v2108_v49 = vsel %vm2014_vm3, %v90_v35, 0  ;;  %v91_v36 = vld [vmem:[%s5973_s2 + $0x6] sm:$0x3]  ;;  %v96_v35 = vld [vmem:[%s5973_s2 + $0x10] sm:$0x3] }
 0x1c9   :  { %v5556_v37 = vpop.eup %4721 }
 0x1ca   :  { %v1810_v55 = vmul.f32 1.442695, %v1750_v11  ;;  %v1890_v54 = vsel %vm1625_vm2, %v5556_v37, 0.0 }
 0x1cb   :  { %v1715_v40 = vpop.xlane.xlu0 %1714  ;;  %1891 = vadd.xlane.f32.xlu0 %v1890_v54  ;;  %v2154_v54 = vsel %vm2014_vm3, %v91_v36, 0  ;;  %v97_v36 = vld [vmem:[%s5973_s2 + $0x12] sm:$0x3] }
 0x1cc   :  { %4729 = vpow2.f32 %v1810_v55  ;;  %v1751_v8 = vsub.f32 %v5399_v30, %v1715_v40 }
 0x1cd   :  { %v5561_v39 = vpop.eup %4723 }
 0x1ce   :  { %v1812_v53 = vmul.f32 1.442695, %v1751_v8  ;;  %v1893_v52 = vsel %vm1625_vm2, %v5561_v39, 0.0  ;;  %v92_v8 = vld [vmem:[%s5973_s2 + $0x8] sm:$0x3] }
 0x1cf   :  { %1894 = vadd.xlane.f32.xlu1 %v1893_v52  ;;  %v1718_v45 = vpop.xlane.xlu0 %1717 }
 0x1d0   :  { %4731 = vpow2.f32 %v1812_v53  ;;  %v1752_v33 = vsub.f32 %v5415_v59, %v1718_v45  ;;  %v2200_v45 = vsel %vm2014_vm3, %v92_v8, 0 }
 0x1d1   :  { %v5566_v4 = vpop.eup %4725 }
 0x1d2   :  { %v1814_v10 = vmul.f32 1.442695, %v1752_v33  ;;  %v1896_v1 = vsel %vm1625_vm2, %v5566_v4, 0.0 }
 0x1d3   :  { %1897 = vadd.xlane.f32.xlu0 %v1896_v1  ;;  %v1721_v56 = vpop.xlane.xlu0 %1720 }
 0x1d4   :  { %4733 = vpow2.f32 %v1814_v10  ;;  %v1753_v30 = vsub.f32 %v5413_v58, %v1721_v56  ;;  %v93_v10 = vld [vmem:[%s5973_s2 + $0xa] sm:$0x3] }
 0x1d5   :  { %v5571_v63 = vpop.eup %4727 }
 0x1d6   :  { %v1816_v62 = vmul.f32 1.442695, %v1753_v30  ;;  %v1899_v2 = vsel %vm1625_vm2, %v5571_v63, 0.0  ;;  %v2246_v30 = vsel %vm2014_vm3, %v93_v10, 0 }
 0x1d7   :  { %1900 = vadd.xlane.f32.xlu1 %v1899_v2  ;;  %v94_v2 = vld [vmem:[%s5973_s2 + $0xc] sm:$0x3] }
 0x1d8   :  { %4735 = vpow2.f32 %v1816_v62 }
 0x1d9   :  { %v5575_v59 = vpop.eup %4729 }
 0x1da   :  { %v1902_v18 = vsel %vm1625_vm2, %v5575_v59, 0.0 }
 0x1db   :  { %1903 = vadd.xlane.f32.xlu0 %v1902_v18 }
 0x1dd   :  { %v5579_v17 = vpop.eup %4731 }
 0x1de   :  { %v1905_v27 = vsel %vm1625_vm2, %v5579_v17, 0.0 }
 0x1df   :  { %1906 = vadd.xlane.f32.xlu1 %v1905_v27 }
 0x1e1   :  { %v5583_v58 = vpop.eup %4733 }
 0x1e2   :  { %v1908_v16 = vsel %vm1625_vm2, %v5583_v58, 0.0 }
 0x1e3   :  { %1909 = vadd.xlane.f32.xlu0 %v1908_v16  ;;  %v2292_v16 = vsel %vm2014_vm3, %v94_v2, 0 }
 0x1e5   :  { %v5587_v7 = vpop.eup %4735 }
 0x1e6   :  { %v1911_v15 = vsel %vm1625_vm2, %v5587_v7, 0.0 }
 0x1e7   :  { %1912 = vadd.xlane.f32.xlu1 %v1911_v15 }
 0x1f4   :  { %v1820_v20 = vpop.xlane.xlu1 %1819 }
 0x1f5   :  { %4737 = vrcp.f32 %v1820_v20  ;;  %v95_v20 = vld [vmem:[%s5973_s2 + $0xe] sm:$0x3] }
 0x1f8   :  { %v1823_v28 = vpop.xlane.xlu1 %1822 }
 0x1f9   :  { %4739 = vrcp.f32 %v1823_v28 }
 0x1fc   :  { %v1826_v21 = vpop.xlane.xlu1 %1825 }
 0x1fd   :  { %4741 = vrcp.f32 %v1826_v21 }
 0x200   :  { %v1829_v32 = vpop.xlane.xlu1 %1828 }
 0x201   :  { %4743 = vrcp.f32 %v1829_v32  ;;  %v2338_v32 = vsel %vm2014_vm3, %v95_v20, 0 }
 0x202   :  { %v4738_v50 = vpop.eup %4737 }
 0x203   :  { %v1915_v34 = vmul.f32 %v4738_v50, %v5427_v42 }
 0x204   :  { %v1832_v23 = vpop.xlane.xlu1 %1831 }
 0x205   :  { %v1978_v26 = vpack.c.bf16 %v1915_v34, %v1915_v34  ;;  %4745 = vrcp.f32 %v1832_v23 }
 0x206   :  { %v4740_v47 = vpop.eup %4739 }
 0x207   :  { %4453 = vmatmul.mubr.msk.bf16.vlgmr.msra.gmra.mxu0 %vm2010_vm4, %v1978_v26  ;;  %v1917_v11 = vmul.f32 %v4740_v47, %v5431_v44 }
 0x208   :  { %4463 = vmatpush3.bf16.msra.mxu0 %v2108_v49  ;;  %4464 = vmatprep.mubr.msk.bf16.mxu0 %vm4802_vm1, %v4801_v0  ;;  %v1835_v42 = vpop.xlane.xlu1 %1834  ;;  %v2384_v49 = vsel %vm2014_vm3, %v96_v35, 0 }
 0x209   :  { %v1979_v55 = vpack.c.bf16 %v1917_v11, %v1917_v11  ;;  %4474 = vmatprep.subr.bf16.mxu0 %v4801_v0  ;;  %4747 = vrcp.f32 %v1835_v42  ;;  %v2430_v42 = vsel %vm2014_vm3, %v97_v36, 0 }
 0x20a   :  { %v4742_v40 = vpop.eup %4741 }
 0x20b   :  { %4459 = vmatmul.mubr.msk.bf16.vlgmr.msra.gmra.mxu1 %vm2010_vm4, %v1979_v55  ;;  %v1919_v44 = vmul.f32 %v4742_v40, %v5437_v51 }
 0x20c   :  { %4469 = vmatpush3.bf16.msra.mxu1 %v2154_v54  ;;  %4470 = vmatprep.mubr.msk.bf16.mxu1 %vm4802_vm1, %v4801_v0  ;;  %v1838_v53 = vpop.xlane.xlu1 %1837  ;;  %v98_v54 = vld [vmem:[%s5973_s2 + $0x14] sm:$0x3] }
 0x20d   :  { %v1980_v52 = vpack.c.bf16 %v1919_v44, %v1919_v44  ;;  %4480 = vmatprep.subr.bf16.mxu1 %v4801_v0  ;;  %4749 = vrcp.f32 %v1838_v53  ;;  %v2476_v53 = vsel %vm2014_vm3, %v98_v54, 0 }
 0x20e   :  { %v4744_v33 = vpop.eup %4743 }
 0x20f   :  { %4465 = vmatmul.mubr.msk.bf16.vlgmr.msra.gmra.mxu0 %vm2010_vm4, %v1980_v52  ;;  %v1921_v51 = vmul.f32 %v4744_v33, %v5441_v61 }
 0x210   :  { %4475 = vmatpush3.bf16.msra.mxu0 %v2200_v45  ;;  %4476 = vmatprep.mubr.msk.bf16.mxu0 %vm4802_vm1, %v4801_v0  ;;  %v1841_v1 = vpop.xlane.xlu1 %1840  ;;  %v99_v45 = vld [vmem:[%s5973_s2 + $0x16] sm:$0x3] }
 0x211   :  { %v1981_v56 = vpack.c.bf16 %v1921_v51, %v1921_v51  ;;  %4486 = vmatprep.subr.bf16.mxu0 %v4801_v0  ;;  %4751 = vrcp.f32 %v1841_v1  ;;  %v2522_v10 = vsel %vm2014_vm3, %v99_v45, 0 }
 0x212   :  { %v4746_v62 = vpop.eup %4745 }
 0x213   :  { %4471 = vmatmul.mubr.msk.bf16.vlgmr.msra.gmra.mxu1 %vm2010_vm4, %v1981_v56  ;;  %v1923_v61 = vmul.f32 %v4746_v62, %v5447_v6 }
 0x214   :  { %4481 = vmatpush3.bf16.msra.mxu1 %v2246_v30  ;;  %4482 = vmatprep.mubr.msk.bf16.mxu1 %vm4802_vm1, %v4801_v0  ;;  %v1844_v18 = vpop.xlane.xlu1 %1843  ;;  %v100_v30 = vld [vmem:[%s5973_s2 + $0x18] sm:$0x3] }
 0x215   :  { %4492 = vmatprep.subr.bf16.mxu1 %v4801_v0  ;;  %4753 = vrcp.f32 %v1844_v18  ;;  %v1982_v27 = vpack.c.bf16 %v1923_v61, %v1923_v61  ;;  %v2568_v18 = vsel %vm2014_vm3, %v100_v30, 0  ;;  %v108_v30 = vld [vmem:[%s5973_s2 + $0x28] sm:$0x3] }
 0x216   :  { %v4748_v15 = vpop.eup %4747 }
 0x217   :  { %4477 = vmatmul.mubr.msk.bf16.vlgmr.msra.gmra.mxu0 %vm2010_vm4, %v1982_v27  ;;  %v1925_v28 = vmul.f32 %v4748_v15, %v5451_v14  ;;  %v101_v27 = vld [vmem:[%s5973_s2 + $0x1a] sm:$0x3] }
 0x218   :  { %v1847_v6 = vpop.xlane.xlu1 %1846  ;;  %4487 = vmatpush3.bf16.msra.mxu0 %v2292_v16  ;;  %4488 = vmatprep.mubr.msk.bf16.mxu0 %vm4802_vm1, %v4801_v0  ;;  %v2614_v15 = vsel %vm2014_vm3, %v101_v27, 0 }
 0x219   :  { %4755 = vrcp.f32 %v1847_v6  ;;  %v1983_v21 = vpack.c.bf16 %v1925_v28, %v1925_v28  ;;  %4498 = vmatprep.subr.bf16.mxu0 %v4801_v0  ;;  %v102_v6 = vld [vmem:[%s5973_s2 + $0x1c] sm:$0x3] }
 0x21a   :  { %v4750_v50 = vpop.eup %4749  ;;  %v2660_v35 = vsel %vm2014_vm3, %v102_v6, 0 }
 0x21b   :  { %4483 = vmatmul.mubr.msk.bf16.vlgmr.msra.gmra.mxu1 %vm2010_vm4, %v1983_v21  ;;  %v1927_v14 = vmul.f32 %v4750_v50, %v5457_v22 }
 0x21c   :  { %4493 = vmatpush3.bf16.msra.mxu1 %v2338_v32  ;;  %v1853_v34 = vpop.xlane.xlu1 %1852  ;;  %4494 = vmatprep.mubr.msk.bf16.mxu1 %vm4802_vm1, %v4801_v0 }
 0x21d   :  { %v1850_v23 = vpop.xlane.xlu0 %1849  ;;  %4757 = vrcp.f32 %v1853_v34  ;;  %v1984_v26 = vpack.c.bf16 %v1927_v14, %v1927_v14  ;;  %4504 = vmatprep.subr.bf16.mxu1 %v4801_v0 }
 0x21e   :  { %v4752_v47 = vpop.eup %4751  ;;  %4759 = vrcp.f32 %v1850_v23 }
 0x21f   :  { %4489 = vmatmul.mubr.msk.bf16.vlgmr.msra.gmra.mxu0 %vm2010_vm4, %v1984_v26  ;;  %v1929_v22 = vmul.f32 %v4752_v47, %v5467_v48  ;;  %v104_v47 = vld [vmem:[%s5973_s2 + $0x20] sm:$0x3] }
 0x220   :  { %4499 = vmatpush3.bf16.msra.mxu0 %v2384_v49  ;;  %4500 = vmatprep.mubr.msk.bf16.mxu0 %vm4802_vm1, %v4801_v0 }
 0x221   :  { %v1985_v11 = vpack.c.bf16 %v1929_v22, %v1929_v22  ;;  %4510 = vmatprep.subr.bf16.mxu0 %v4801_v0 }
 0x222   :  { %v4754_v55 = vpop.eup %4753 }
 0x223   :  { %4495 = vmatmul.mubr.msk.bf16.vlgmr.msra.gmra.mxu1 %vm2010_vm4, %v1985_v11  ;;  %v1931_v8 = vmul.f32 %v4754_v55, %v5477_v43 }
 0x224   :  { %v1859_v40 = vpop.xlane.xlu1 %1858  ;;  %4505 = vmatpush3.bf16.msra.mxu1 %v2430_v42  ;;  %4506 = vmatprep.mubr.msk.bf16.mxu1 %vm4802_vm1, %v4801_v0  ;;  %v2752_v42 = vsel %vm2014_vm3, %v104_v47, 0 }
 0x225   :  { %4761 = vrcp.f32 %v1859_v40  ;;  %v1856_v48 = vpop.xlane.xlu0 %1855  ;;  %v1986_v44 = vpack.c.bf16 %v1931_v8, %v1931_v8  ;;  %4516 = vmatprep.subr.bf16.mxu1 %v4801_v0 }
 0x226   :  { %4763 = vrcp.f32 %v1856_v48  ;;  %v4756_v52 = vpop.eup %4755 }
 0x227   :  { %4501 = vmatmul.mubr.msk.bf16.vlgmr.msra.gmra.mxu0 %vm2010_vm4, %v1986_v44  ;;  %v1933_v43 = vmul.f32 %v4756_v52, %v5481_v3  ;;  %v106_v44 = vld [vmem:[%s5973_s2 + $0x24] sm:$0x3] }
 0x228   :  { %4511 = vmatpush3.bf16.msra.mxu0 %v2476_v53  ;;  %4512 = vmatprep.mubr.msk.bf16.mxu0 %vm4802_vm1, %v4801_v0 }
 0x229   :  { %v1987_v33 = vpack.c.bf16 %v1933_v43, %v1933_v43  ;;  %4522 = vmatprep.subr.bf16.mxu0 %v4801_v0  ;;  %v2844_v43 = vsel %vm2014_vm3, %v106_v44, 0 }
 0x22a   :  { %v4758_v51 = vpop.eup %4757 }
 0x22b   :  { %v4760_v1 = vpop.eup %4759  ;;  %4507 = vmatmul.mubr.msk.bf16.vlgmr.msra.gmra.mxu1 %vm2010_vm4, %v1987_v33  ;;  %v1937_v2 = vmul.f32 %v4758_v51, %v5487_v57 }
 0x22c   :  { %v1865_v56 = vpop.xlane.xlu1 %1864  ;;  %4517 = vmatpush3.bf16.msra.mxu1 %v2522_v10  ;;  %v1935_v62 = vmul.f32 %v4760_v1, %v5489_v60  ;;  %4518 = vmatprep.mubr.msk.bf16.mxu1 %vm4802_vm1, %v4801_v0 }
 0x22d   :  { %4765 = vrcp.f32 %v1865_v56  ;;  %v1862_v3 = vpop.xlane.xlu0 %1861  ;;  %4528 = vmatprep.subr.bf16.mxu1 %v4801_v0  ;;  %v1989_v60 = vpack.c.bf16 %v1937_v2, %v1937_v2  ;;  %v2936_v2 = vsel %vm2014_vm3, %v108_v30, 0 }
 0x22e   :  { %4767 = vrcp.f32 %v1862_v3  ;;  %v1988_v61 = vpack.c.bf16 %v1935_v62, %v1935_v62 }
 0x230   :  { %4513 = vmatmul.mubr.msk.bf16.vlgmr.msra.gmra.mxu0 %vm2010_vm4, %v1988_v61 }
 0x231   :  { %4523 = vmatpush3.bf16.msra.mxu0 %v2568_v18  ;;  %4524 = vmatprep.mubr.msk.bf16.mxu0 %vm4802_vm1, %v4801_v0 }
 0x232   :  { %v4762_v16 = vpop.eup %4761  ;;  %4534 = vmatprep.subr.bf16.mxu0 %v4801_v0 }
 0x233   :  { %v4764_v57 = vpop.eup %4763  ;;  %4519 = vmatmul.mubr.msk.bf16.vlgmr.msra.gmra.mxu1 %vm2010_vm4, %v1989_v60  ;;  %v1941_v50 = vmul.f32 %v4762_v16, %v5497_v12 }
 0x234   :  { %v1871_v20 = vpop.xlane.xlu1 %1870  ;;  %v1939_v28 = vmul.f32 %v4764_v57, %v5499_v13  ;;  %4529 = vmatpush3.bf16.msra.mxu1 %v2614_v15  ;;  %4530 = vmatprep.mubr.msk.bf16.mxu1 %vm4802_vm1, %v4801_v0  ;;  %v103_v13 = vld [vmem:[%s5973_s2 + $0x1e] sm:$0x3]  ;;  %v110_v57 = vld [vmem:[%s5973_s2 + $0x2c] sm:$0x3] }
 0x235   :  { %4769 = vrcp.f32 %v1871_v20  ;;  %v1868_v21 = vpop.xlane.xlu0 %1867  ;;  %4540 = vmatprep.subr.bf16.mxu1 %v4801_v0  ;;  %v1991_v34 = vpack.c.bf16 %v1941_v50, %v1941_v50  ;;  %v2706_v23 = vsel %vm2014_vm3, %v103_v13, 0  ;;  %v3028_v6 = vsel %vm2014_vm3, %v110_v57, 0 }
 0x236   :  { %4771 = vrcp.f32 %v1868_v21  ;;  %v1990_v32 = vpack.c.bf16 %v1939_v28, %v1939_v28 }
 0x238   :  { %4525 = vmatmul.mubr.msk.bf16.vlgmr.msra.gmra.mxu0 %vm2010_vm4, %v1990_v32 }
 0x239   :  { %4535 = vmatpush3.bf16.msra.mxu0 %v2660_v35  ;;  %4536 = vmatprep.mubr.msk.bf16.mxu0 %vm4802_vm1, %v4801_v0 }
 0x23a   :  { %v4766_v14 = vpop.eup %4765  ;;  %4546 = vmatprep.subr.bf16.mxu0 %v4801_v0 }
 0x23b   :  { %v4768_v26 = vpop.eup %4767  ;;  %4531 = vmatmul.mubr.msk.bf16.vlgmr.msra.gmra.mxu1 %vm2010_vm4, %v1991_v34  ;;  %v1945_v11 = vmul.f32 %v4766_v14, %v5507_v24  ;;  %v112_v14 = vld [vmem:[%s5973_s2 + $0x30] sm:$0x3] }
 0x23c   :  { %v1877_v12 = vpop.xlane.xlu1 %1876  ;;  %v1943_v49 = vmul.f32 %v4768_v26, %v5509_v25  ;;  %4541 = vmatpush3.bf16.msra.mxu1 %v2706_v23  ;;  %4542 = vmatprep.mubr.msk.bf16.mxu1 %vm4802_vm1, %v4801_v0  ;;  %v105_v25 = vld [vmem:[%s5973_s2 + $0x22] sm:$0x3] }
 0x23d   :  { %4773 = vrcp.f32 %v1877_v12  ;;  %v1874_v36 = vpop.xlane.xlu0 %1873  ;;  %4552 = vmatprep.subr.bf16.mxu1 %v4801_v0  ;;  %v1993_v54 = vpack.c.bf16 %v1945_v11, %v1945_v11  ;;  %v2798_v40 = vsel %vm2014_vm3, %v105_v25, 0  ;;  %v113_v12 = vld [vmem:[%s5973_s2 + $0x32] sm:$0x3] }
 0x23e   :  { %4775 = vrcp.f32 %v1874_v36  ;;  %v1992_v22 = vpack.c.bf16 %v1943_v49, %v1943_v49 }
 0x240   :  { %4537 = vmatmul.mubr.msk.bf16.vlgmr.msra.gmra.mxu0 %vm2010_vm4, %v1992_v22  ;;  %v3166_v22 = vsel %vm2014_vm3, %v113_v12, 0 }
 0x241   :  { %4547 = vmatpush3.bf16.msra.mxu0 %v2752_v42  ;;  %4548 = vmatprep.mubr.msk.bf16.mxu0 %vm4802_vm1, %v4801_v0  ;;  %v114_v42 = vld [vmem:[%s5973_s2 + $0x34] sm:$0x3] }
 0x242   :  { %v4770_v55 = vpop.eup %4769  ;;  %4558 = vmatprep.subr.bf16.mxu0 %v4801_v0 }
 0x243   :  { %v4772_v8 = vpop.eup %4771  ;;  %4543 = vmatmul.mubr.msk.bf16.vlgmr.msra.gmra.mxu1 %vm2010_vm4, %v1993_v54  ;;  %v1949_v45 = vmul.f32 %v4770_v55, %v5517_v38  ;;  %v3212_v54 = vsel %vm2014_vm3, %v114_v42, 0 }
 0x244   :  { %v1883_v24 = vpop.xlane.xlu1 %1882  ;;  %v1947_v48 = vmul.f32 %v4772_v8, %v5519_v41  ;;  %4553 = vmatpush3.bf16.msra.mxu1 %v2798_v40  ;;  %4554 = vmatprep.mubr.msk.bf16.mxu1 %vm4802_vm1, %v4801_v0  ;;  %v107_v41 = vld [vmem:[%s5973_s2 + $0x26] sm:$0x3]  ;;  %v115_v40 = vld [vmem:[%s5973_s2 + $0x36] sm:$0x3] }
 0x245   :  { %4777 = vrcp.f32 %v1883_v24  ;;  %v1880_v53 = vpop.xlane.xlu0 %1879  ;;  %4564 = vmatprep.subr.bf16.mxu1 %v4801_v0  ;;  %v1995_v10 = vpack.c.bf16 %v1949_v45, %v1949_v45  ;;  %v2890_v51 = vsel %vm2014_vm3, %v107_v41, 0  ;;  %v3258_v44 = vsel %vm2014_vm3, %v115_v40, 0 }
 0x246   :  { %4779 = vrcp.f32 %v1880_v53  ;;  %v1994_v52 = vpack.c.bf16 %v1947_v48, %v1947_v48 }
 0x248   :  { %4549 = vmatmul.mubr.msk.bf16.vlgmr.msra.gmra.mxu0 %vm2010_vm4, %v1994_v52  ;;  %v116_v52 = vld [vmem:[%s5973_s2 + $0x38] sm:$0x3] }
 0x249   :  { %4559 = vmatpush3.bf16.msra.mxu0 %v2844_v43  ;;  %4560 = vmatprep.mubr.msk.bf16.mxu0 %vm4802_vm1, %v4801_v0  ;;  %v3304_v41 = vsel %vm2014_vm3, %v116_v52, 0 }
 0x24a   :  { %v4774_v33 = vpop.eup %4773  ;;  %4570 = vmatprep.subr.bf16.mxu0 %v4801_v0 }
 0x24b   :  { %v4776_v1 = vpop.eup %4775  ;;  %4555 = vmatmul.mubr.msk.bf16.vlgmr.msra.gmra.mxu1 %vm2010_vm4, %v1995_v10  ;;  %v1953_v62 = vmul.f32 %v4774_v33, %v5526_v9  ;;  %v117_v33 = vld [vmem:[%s5973_s2 + $0x3a] sm:$0x3] }
 0x24c   :  { %v1886_v38 = vpop.xlane.xlu0 %1885  ;;  %v1951_v56 = vmul.f32 %v4776_v1, %v5528_v46  ;;  %4565 = vmatpush3.bf16.msra.mxu1 %v2890_v51  ;;  %4566 = vmatprep.mubr.msk.bf16.mxu1 %vm4802_vm1, %v4801_v0  ;;  %v109_v46 = vld [vmem:[%s5973_s2 + $0x2a] sm:$0x3] }
 0x24d   :  { %4781 = vrcp.f32 %v1886_v38  ;;  %4576 = vmatprep.subr.bf16.mxu1 %v4801_v0  ;;  %v1997_v27 = vpack.c.bf16 %v1953_v62, %v1953_v62  ;;  %v2982_v16 = vsel %vm2014_vm3, %v109_v46, 0  ;;  %v3350_v38 = vsel %vm2014_vm3, %v117_v33, 0 }
 0x24e   :  { %v1996_v3 = vpack.c.bf16 %v1951_v56, %v1951_v56  ;;  %v118_v56 = vld [vmem:[%s5973_s2 + $0x3c] sm:$0x3] }
 0x250   :  { %v1889_v61 = vpop.xlane.xlu1 %1888  ;;  %4561 = vmatmul.mubr.msk.bf16.vlgmr.msra.gmra.mxu0 %vm2010_vm4, %v1996_v3 }
 0x251   :  { %4783 = vrcp.f32 %v1889_v61  ;;  %4571 = vmatpush3.bf16.msra.mxu0 %v2936_v2  ;;  %4572 = vmatprep.mubr.msk.bf16.mxu0 %vm4802_vm1, %v4801_v0  ;;  %v119_v2 = vld [vmem:[%s5973_s2 + $0x3e] sm:$0x3] }
 0x252   :  { %v4778_v18 = vpop.eup %4777  ;;  %4582 = vmatprep.subr.bf16.mxu0 %v4801_v0 }
 0x253   :  { %v4780_v9 = vpop.eup %4779  ;;  %4567 = vmatmul.mubr.msk.bf16.vlgmr.msra.gmra.mxu1 %vm2010_vm4, %v1997_v27  ;;  %v1957_v28 = vmul.f32 %v4778_v18, %v5536_v19  ;;  %v3442_v18 = vsel %vm2014_vm3, %v119_v2, 0 }
 0x254   :  { %v1892_v60 = vpop.xlane.xlu0 %1891  ;;  %v1955_v15 = vmul.f32 %v4780_v9, %v5538_v5  ;;  %4577 = vmatpush3.bf16.msra.mxu1 %v2982_v16  ;;  %4578 = vmatprep.mubr.msk.bf16.mxu1 %vm4802_vm1, %v4801_v0  ;;  %v111_v5 = vld [vmem:[%s5973_s2 + $0x2e] sm:$0x3] }
 0x255   :  { %4785 = vrcp.f32 %v1892_v60  ;;  %4588 = vmatprep.subr.bf16.mxu1 %v4801_v0  ;;  %v1999_v50 = vpack.c.bf16 %v1957_v28, %v1957_v28  ;;  %v3074_v35 = vsel %vm2014_vm3, %v111_v5, 0  ;;  %v3487_v28 = vld [vmem:[%s5974_s4 + $0xc] sm:$0xf] }
 0x256   :  { %v1998_v20 = vpack.c.bf16 %v1955_v15, %v1955_v15  ;;  %v3484_v15 = vld [vmem:[%s5974_s4] sm:$0xf]  ;;  %v5879_v5 = vsel %vm3552_vm5, %v3487_v28, 0 }
 0x258   :  { %v1895_v21 = vpop.xlane.xlu1 %1894  ;;  %4573 = vmatmul.mubr.msk.bf16.vlgmr.msra.gmra.mxu0 %vm2010_vm4, %v1998_v20 }
 0x259   :  { %4787 = vrcp.f32 %v1895_v21  ;;  %4583 = vmatpush3.bf16.msra.mxu0 %v3028_v6  ;;  %4584 = vmatprep.mubr.msk.bf16.mxu0 %vm4802_vm1, %v4801_v0 }
 0x25a   :  { %v4782_v32 = vpop.eup %4781  ;;  %4594 = vmatprep.subr.bf16.mxu0 %v4801_v0 }
 0x25b   :  { %v1959_v19 = vmul.f32 %v4782_v32, %v5546_v31  ;;  %4579 = vmatmul.mubr.msk.bf16.vlgmr.msra.gmra.mxu1 %vm2010_vm4, %v1999_v50  ;;  %v3120_v31 = vsel %vm2014_vm3, %v112_v14, 0 }
 0x25c   :  { %v1898_v13 = vpop.xlane.xlu0 %1897  ;;  %4589 = vmatpush3.bf16.msra.mxu1 %v3074_v35  ;;  %4590 = vmatprep.mubr.msk.bf16.mxu1 %vm4802_vm1, %v4801_v0 }
 0x25d   :  { %4789 = vrcp.f32 %v1898_v13  ;;  %v2000_v34 = vpack.c.bf16 %v1959_v19, %v1959_v19  ;;  %4600 = vmatprep.subr.bf16.mxu1 %v4801_v0 }
 0x25e   :  { %v4784_v23 = vpop.eup %4783 }
 0x25f   :  { %v1961_v26 = vmul.f32 %v4784_v23, %v5551_v29 }
 0x260   :  { %v1901_v49 = vpop.xlane.xlu1 %1900  ;;  %4585 = vmatmul.mubr.msk.bf16.vlgmr.msra.gmra.mxu0 %vm2010_vm4, %v2000_v34 }
 0x261   :  { %4791 = vrcp.f32 %v1901_v49  ;;  %v2001_v47 = vpack.c.bf16 %v1961_v26, %v1961_v26  ;;  %4595 = vmatpush3.bf16.msra.mxu0 %v3120_v31  ;;  %4596 = vmatprep.mubr.msk.bf16.mxu0 %vm4802_vm1, %v4801_v0 }
 0x262   :  { %v4786_v36 = vpop.eup %4785  ;;  %4606 = vmatprep.subr.bf16.mxu0 %v4801_v0 }
 0x263   :  { %v1963_v11 = vmul.f32 %v4786_v36, %v5556_v37  ;;  %4591 = vmatmul.mubr.msk.bf16.vlgmr.msra.gmra.mxu1 %vm2010_vm4, %v2001_v47 }
 0x264   :  { %v1904_v29 = vpop.xlane.xlu0 %1903  ;;  %4601 = vmatpush3.bf16.msra.mxu1 %v3166_v22  ;;  %4602 = vmatprep.mubr.msk.bf16.mxu1 %vm4802_vm1, %v4801_v0 }
 0x265   :  { %v2002_v25 = vpack.c.bf16 %v1963_v11, %v1963_v11  ;;  %4793 = vrcp.f32 %v1904_v29  ;;  %4612 = vmatprep.subr.bf16.mxu1 %v4801_v0 }
 0x266   :  { %v4788_v55 = vpop.eup %4787 }
 0x267   :  { %v1965_v37 = vmul.f32 %v4788_v55, %v5561_v39 }
 0x268   :  { %v1907_v8 = vpop.xlane.xlu1 %1906  ;;  %4597 = vmatmul.mubr.msk.bf16.vlgmr.msra.gmra.mxu0 %vm2010_vm4, %v2002_v25 }
 0x269   :  { %v2003_v24 = vpack.c.bf16 %v1965_v37, %v1965_v37  ;;  %4795 = vrcp.f32 %v1907_v8  ;;  %4607 = vmatpush3.bf16.msra.mxu0 %v3212_v54  ;;  %4608 = vmatprep.mubr.msk.bf16.mxu0 %vm4802_vm1, %v4801_v0 }
 0x26a   :  { %v4790_v48 = vpop.eup %4789  ;;  %4618 = vmatprep.subr.bf16.mxu0 %v4801_v0 }
 0x26b   :  { %v1967_v39 = vmul.f32 %v4790_v48, %v5566_v4  ;;  %4603 = vmatmul.mubr.msk.bf16.vlgmr.msra.gmra.mxu1 %vm2010_vm4, %v2003_v24 }
 0x26c   :  { %v1910_v53 = vpop.xlane.xlu0 %1909  ;;  %4613 = vmatpush3.bf16.msra.mxu1 %v3258_v44  ;;  %4614 = vmatprep.mubr.msk.bf16.mxu1 %vm4802_vm1, %v4801_v0 }
 0x26d   :  { %v2004_v45 = vpack.c.bf16 %v1967_v39, %v1967_v39  ;;  %4797 = vrcp.f32 %v1910_v53  ;;  %4624 = vmatprep.subr.bf16.mxu1 %v4801_v0 }
 0x26e   :  { %v4792_v43 = vpop.eup %4791 }
 0x26f   :  { %v1969_v4 = vmul.f32 %v4792_v43, %v5571_v63 }
 0x270   :  { %v1913_v10 = vpop.xlane.xlu1 %1912  ;;  %4609 = vmatmul.mubr.msk.bf16.vlgmr.msra.gmra.mxu0 %vm2010_vm4, %v2004_v45 }
 0x271   :  { %v2005_v51 = vpack.c.bf16 %v1969_v4, %v1969_v4  ;;  %4799 = vrcp.f32 %v1913_v10  ;;  %4619 = vmatpush3.bf16.msra.mxu0 %v3304_v41  ;;  %4620 = vmatprep.mubr.msk.bf16.mxu0 %vm4802_vm1, %v4801_v0 }
 0x272   :  { %v4794_v1 = vpop.eup %4793  ;;  %4630 = vmatprep.subr.bf16.mxu0 %v4801_v0 }
 0x273   :  { %v1971_v63 = vmul.f32 %v4794_v1, %v5575_v59  ;;  %4615 = vmatmul.mubr.msk.bf16.vlgmr.msra.gmra.mxu1 %vm2010_vm4, %v2005_v51  ;;  %v3396_v59 = vsel %vm2014_vm3, %v118_v56, 0  ;;  %v3517_v56 = vlaneseq }
 0x274   :  { %4625 = vmatpush3.bf16.msra.mxu1 %v3350_v38  ;;  %4626 = vmatprep.mubr.msk.bf16.mxu1 %vm4802_vm1, %v4801_v0  ;;  %v4803_v38 = vmov 1983009808  }
 0x275   :  { %v2006_v30 = vpack.c.bf16 %v1971_v63, %v1971_v63  ;;  %4636 = vmatprep.subr.bf16.mxu1 %v4801_v0  ;;  %v3515_v63 = vunpack.c.l.s4 %v4803_v38 }
 0x276   :  { %v4796_v3 = vpop.eup %4795 }
 0x277   :  { %v1973_v62 = vmul.f32 %v4796_v3, %v5579_v17  ;;  %v3516_v2 = vunpack.c.0.s8 %v3515_v63 }
 0x278   :  { %4621 = vmatmul.mubr.msk.bf16.vlgmr.msra.gmra.mxu0 %vm2010_vm4, %v2006_v30 }
 0x279   :  { %v2007_v46 = vpack.c.bf16 %v1973_v62, %v1973_v62  ;;  %4631 = vmatpush3.bf16.msra.mxu0 %v3396_v59  ;;  %4632 = vmatprep.mubr.msk.bf16.mxu0 %vm4802_vm1, %v4801_v0 }
 0x27a   :  { %v4798_v61 = vpop.eup %4797  ;;  %4666 = vmatprep.subr.msk.bf16.mxu0 %vm3552_vm5, %v3484_v15 }
 0x27b   :  { %v1975_v27 = vmul.f32 %v4798_v61, %v5583_v58  ;;  %4627 = vmatmul.mubr.msk.bf16.vlgmr.msra.gmra.mxu1 %vm2010_vm4, %v2007_v46  ;;  %v3554_v58 = vsel %vm3552_vm5, %v3484_v15, 0  ;;  %v3518_v46 = vshrl.u32 %v3517_v56, 7 }
 0x27c   :  { %4637 = vmatpush3.bf16.msra.mxu1 %v3442_v18  ;;  %4638 = vmatprep.mubr.msk.bf16.mxu1 %vm4802_vm1, %v4801_v0  ;;  %v3485_v0 = vld [vmem:[%s5974_s4 + $0x4] sm:$0xf] }
 0x27d   :  { %v2008_v17 = vpack.c.bf16 %v1975_v27, %v1975_v27  ;;  %4667 = vmatprep.subr.msk.bf16.mxu1 %vm3552_vm5, %v3485_v0  ;;  %v3682_v57 = vsel %vm3552_vm5, %v3485_v0, 0 }
 0x27e   :  { %v4800_v16 = vpop.eup %4799 }
 0x27f   :  { %v1977_v9 = vmul.f32 %v4800_v16, %v5587_v7  ;;  %v3486_v7 = vld [vmem:[%s5974_s4 + $0x8] sm:$0xf] }
 0x280   :  { %4633 = vmatmul.mubr.msk.bf16.vlgmr.msra.gmra.mxu0 %vm2010_vm4, %v2008_v17  ;;  %v5872_v20 = vsel %vm3552_vm5, %v3486_v7, 0 }
 0x281   :  { %v2009_v60 = vpack.c.bf16 %v1977_v9, %v1977_v9  ;;  %4643 = vmatpush3.bf16.msra.mxu0 %v3554_v58  ;;  %v5890_v9 = vsub.s32 %v3516_v2, %v3518_v46 }
 0x282   :  { %4668 = vmatprep.subr.msk.bf16.mxu0 %vm3552_vm5, %v3486_v7 }
 0x283   :  { %4639 = vmatmul.mubr.msk.bf16.vlgmr.msra.gmra.mxu1 %vm2010_vm4, %v2009_v60 }
 0x284   :  { %4649 = vmatpush3.bf16.msra.mxu1 %v3682_v57 }
 0x285   :  { %4669 = vmatprep.subr.msk.bf16.mxu1 %vm3552_vm5, %v3487_v28 }
 0x2c7   :  { %v5877_v6 = vpop.f32.mrf.mxu0 }
 0x2c9   :  { %v4454_v21 = vpop.f32.mrf.mxu0 }
 0x2cb   :  { %v2055_v32 = vpop.f32.mrf.mxu0  ;;  %v5881_v50 = vpop.f32.mrf.mxu1 }
 0x2cd   :  { %v4455_v35 = vpop.f32.mrf.mxu0  ;;  %v4460_v19 = vpop.f32.mrf.mxu1 }
 0x2cf   :  { %v2101_v13 = vpop.f32.mrf.mxu1  ;;  %v5883_v14 = vpop.f32.mrf.mxu0 }
 0x2d1   :  { %v4461_v34 = vpop.f32.mrf.mxu1  ;;  %v4466_v23 = vpop.f32.mrf.mxu0 }
 0x2d3   :  { %v2147_v31 = vpop.f32.mrf.mxu0  ;;  %v5885_v26 = vpop.f32.mrf.mxu1 }
 0x2d5   :  { %v4467_v12 = vpop.f32.mrf.mxu0  ;;  %v4472_v49 = vpop.f32.mrf.mxu1 }
 0x2d7   :  { %v2193_v47 = vpop.f32.mrf.mxu1  ;;  %v2236_v36 = vpop.f32.mrf.mxu0 }
 0x2d8   :  { %v4094_v16 = vpack.c.bf16 %v2236_v36, %v5877_v6 }
 0x2d9   :  { %v4473_v22 = vpop.f32.mrf.mxu1  ;;  %v4478_v11 = vpop.f32.mrf.mxu0 }
 0x2da   :  { %v3520_v28 = vrot.slane %v4094_v16, %v5890_v9 }
 0x2db   :  { %v2239_v29 = vpop.f32.mrf.mxu0  ;;  %v2282_v42 = vpop.f32.mrf.mxu1 }
 0x2dc   :  { %v4100_v57 = vpack.c.bf16 %v2282_v42, %v5881_v50 }
 0x2dd   :  { %v4479_v25 = vpop.f32.mrf.mxu0  ;;  %v4484_v55 = vpop.f32.mrf.mxu1 }
 0x2de   :  { %v3649_v6 = vrot.slane %v4100_v57, %v5890_v9 }
 0x2df   :  { %v2285_v37 = vpop.f32.mrf.mxu1  ;;  %v2328_v54 = vpop.f32.mrf.mxu0 }
 0x2e0   :  { %v4106_v40 = vpack.c.bf16 %v2328_v54, %v5883_v14 }
 0x2e1   :  { %v4485_v8 = vpop.f32.mrf.mxu1  ;;  %v4490_v24 = vpop.f32.mrf.mxu0 }
 0x2e2   :  { %v5900_v36 = vrot.slane %v4106_v40, %v5890_v9 }
 0x2e3   :  { %v2331_v48 = vpop.f32.mrf.mxu0  ;;  %v2374_v44 = vpop.f32.mrf.mxu1 }
 0x2e4   :  { %v4112_v39 = vpack.c.bf16 %v2374_v44, %v5885_v26 }
 0x2e5   :  { %v4491_v53 = vpop.f32.mrf.mxu0  ;;  %v4496_v52 = vpop.f32.mrf.mxu1 }
 0x2e6   :  { %v5908_v37 = vrot.slane %v4112_v39, %v5890_v9 }
 0x2e7   :  { %v2377_v45 = vpop.f32.mrf.mxu1  ;;  %v2420_v43 = vpop.f32.mrf.mxu0 }
 0x2e9   :  { %v4497_v4 = vpop.f32.mrf.mxu1  ;;  %v4502_v41 = vpop.f32.mrf.mxu0 }
 0x2eb   :  { %v2423_v33 = vpop.f32.mrf.mxu0  ;;  %v2466_v10 = vpop.f32.mrf.mxu1 }
 0x2ed   :  { %v4503_v51 = vpop.f32.mrf.mxu0  ;;  %v4508_v1 = vpop.f32.mrf.mxu1 }
 0x2ef   :  { %v2469_v30 = vpop.f32.mrf.mxu1 }
 0x2f0   :  { %v2512_v3 = vpop.f32.mrf.mxu0 }
 0x2f1   :  { %v4509_v62 = vpop.f32.mrf.mxu1 }
 0x2f2   :  { %v4514_v59 = vpop.f32.mrf.mxu0 }
 0x2f3   :  { %v2558_v61 = vpop.f32.mrf.mxu1 }
 0x2f4   :  { %v2515_v18 = vpop.f32.mrf.mxu0 }
 0x2f5   :  { %v4520_v27 = vpop.f32.mrf.mxu1 }
 0x2f6   :  { %v4515_v17 = vpop.f32.mrf.mxu0 }
 0x2f7   :  { %v2561_v60 = vpop.f32.mrf.mxu1 }
 0x2f8   :  { %v2604_v15 = vpop.f32.mrf.mxu0 }
 0x2f9   :  { %v4095_v58 = vpack.c.bf16 %v2604_v15, %v2420_v43  ;;  %v4521_v0 = vpop.f32.mrf.mxu1 }
 0x2fa   :  { %v4526_v7 = vpop.f32.mrf.mxu0 }
 0x2fb   :  { %v3527_v21 = vrot.slane %v4095_v58, %v5890_v9  ;;  %v2650_v32 = vpop.f32.mrf.mxu1 }
 0x2fc   :  { %v2607_v35 = vpop.f32.mrf.mxu0  ;;  %v4101_v19 = vpack.c.bf16 %v2650_v32, %v2466_v10 }
 0x2fd   :  { %v3528_v13 = vcombine.low %v3520_v28, %v3527_v21  ;;  %v4532_v14 = vpop.f32.mrf.mxu1 }
 0x2fe   :  { %v3656_v34 = vrot.slane %v4101_v19, %v5890_v9  ;;  %v4527_v23 = vpop.f32.mrf.mxu0 }
 0x2ff   :  { %4644 = vmatprep.mubr.msk.bf16.mxu0 %vm152_vm0, %v3528_v13  ;;  %v2653_v31 = vpop.f32.mrf.mxu1 }
 0x300   :  { %v3657_v26 = vcombine.low %v3649_v6, %v3656_v34  ;;  %v2696_v50 = vpop.f32.mrf.mxu0 }
 0x301   :  { %v4107_v12 = vpack.c.bf16 %v2696_v50, %v2512_v3  ;;  %v4533_v49 = vpop.f32.mrf.mxu1 }
 0x302   :  { %v4538_v47 = vpop.f32.mrf.mxu0  ;;  %4650 = vmatprep.mubr.msk.bf16.mxu1 %vm152_vm0, %v3657_v26 }
 0x303   :  { %v5903_v22 = vrot.slane %v4107_v12, %v5890_v9  ;;  %v2742_v11 = vpop.f32.mrf.mxu1 }
 0x304   :  { %v2699_v29 = vpop.f32.mrf.mxu0  ;;  %v4113_v42 = vpack.c.bf16 %v2742_v11, %v2558_v61 }
 0x305   :  { %v3785_v25 = vcombine.low %v5900_v36, %v5903_v22  ;;  %v4544_v55 = vpop.f32.mrf.mxu1 }
 0x306   :  { %v5911_v54 = vrot.slane %v4113_v42, %v5890_v9  ;;  %v4539_v8 = vpop.f32.mrf.mxu0 }
 0x307   :  { %v2745_v24 = vpop.f32.mrf.mxu1 }
 0x308   :  { %v3913_v40 = vcombine.low %v5908_v37, %v5911_v54  ;;  %v2788_v48 = vpop.f32.mrf.mxu0  ;;  %v4093_v54 = vld [vmem:[%s5975_s5] ss:$0 sm:$0xff] }
 0x309   :  { %v4545_v44 = vpop.f32.mrf.mxu1 }
 0x30a   :  { %v4550_v53 = vpop.f32.mrf.mxu0 }
 0x30b   :  { %v2834_v52 = vpop.f32.mrf.mxu1 }
 0x30c   :  { %v2791_v45 = vpop.f32.mrf.mxu0 }
 0x30d   :  { %v4556_v43 = vpop.f32.mrf.mxu1 }
 0x30e   :  { %v4551_v4 = vpop.f32.mrf.mxu0 }
 0x30f   :  { %v2837_v41 = vpop.f32.mrf.mxu1 }
 0x310   :  { %v5915_v33 = vpop.f32.mrf.mxu0 }
 0x311   :  { %v4557_v39 = vpop.f32.mrf.mxu1 }
 0x312   :  { %v4562_v10 = vpop.f32.mrf.mxu0 }
 0x313   :  { %v5917_v51 = vpop.f32.mrf.mxu1 }
 0x314   :  { %v2883_v1 = vpop.f32.mrf.mxu0 }
 0x315   :  { %v4568_v38 = vpop.f32.mrf.mxu1 }
 0x316   :  { %v4563_v63 = vpop.f32.mrf.mxu0 }
 0x317   :  { %v2929_v56 = vpop.f32.mrf.mxu1 }
 0x318   :  { %v2972_v30 = vpop.f32.mrf.mxu0 }
 0x319   :  { %v4569_v3 = vpop.f32.mrf.mxu1  ;;  %v4096_v49 = vpack.c.bf16 %v2972_v30, %v2788_v48 }
 0x31a   :  { %v4574_v62 = vpop.f32.mrf.mxu0 }
 0x31b   :  { %v3018_v59 = vpop.f32.mrf.mxu1  ;;  %v3537_v24 = vrot.slane %v4096_v49, %v5890_v9 }
 0x31c   :  { %v2975_v2 = vpop.f32.mrf.mxu0  ;;  %v4102_v55 = vpack.c.bf16 %v3018_v59, %v2834_v52 }
 0x31d   :  { %v4580_v46 = vpop.f32.mrf.mxu1 }
 0x31e   :  { %v4575_v61 = vpop.f32.mrf.mxu0  ;;  %v3666_v39 = vrot.slane %v4102_v55, %v5890_v9 }
 0x31f   :  { %v3021_v18 = vpop.f32.mrf.mxu1 }
 0x320   :  { %v3064_v27 = vpop.f32.mrf.mxu0 }
 0x321   :  { %v4581_v17 = vpop.f32.mrf.mxu1  ;;  %v4108_v1 = vpack.c.bf16 %v3064_v27, %v5915_v33 }
 0x322   :  { %v4586_v16 = vpop.f32.mrf.mxu0 }
 0x323   :  { %v3110_v60 = vpop.f32.mrf.mxu1  ;;  %v3794_v33 = vrot.slane %v4108_v1, %v5890_v9 }
 0x324   :  { %v3067_v15 = vpop.f32.mrf.mxu0  ;;  %v4114_v3 = vpack.c.bf16 %v3110_v60, %v5917_v51 }
 0x325   :  { %v4592_v58 = vpop.f32.mrf.mxu1 }
 0x326   :  { %v4587_v0 = vpop.f32.mrf.mxu0  ;;  %v3922_v51 = vrot.slane %v4114_v3, %v5890_v9 }
 0x327   :  { %v3113_v57 = vpop.f32.mrf.mxu1 }
 0x328   :  { %v3156_v7 = vpop.f32.mrf.mxu0 }
 0x329   :  { %v4593_v28 = vpop.f32.mrf.mxu1 }
 0x32a   :  { %v4598_v21 = vpop.f32.mrf.mxu0 }
 0x32b   :  { %v3202_v32 = vpop.f32.mrf.mxu1 }
 0x32c   :  { %v3159_v35 = vpop.f32.mrf.mxu0 }
 0x32d   :  { %v4604_v19 = vpop.f32.mrf.mxu1 }
 0x32e   :  { %v4599_v13 = vpop.f32.mrf.mxu0 }
 0x32f   :  { %v3205_v14 = vpop.f32.mrf.mxu1 }
 0x330   :  { %v3248_v6 = vpop.f32.mrf.mxu0 }
 0x331   :  { %v4605_v34 = vpop.f32.mrf.mxu1 }
 0x332   :  { %v4610_v23 = vpop.f32.mrf.mxu0 }
 0x333   :  { %v3294_v31 = vpop.f32.mrf.mxu1 }
 0x334   :  { %v3251_v26 = vpop.f32.mrf.mxu0 }
 0x335   :  { %v4616_v50 = vpop.f32.mrf.mxu1 }
 0x336   :  { %v4611_v12 = vpop.f32.mrf.mxu0 }
 0x337   :  { %v3297_v47 = vpop.f32.mrf.mxu1 }
 0x338   :  { %v3340_v11 = vpop.f32.mrf.mxu0 }
 0x339   :  { %v4097_v29 = vpack.c.bf16 %v3340_v11, %v3156_v7  ;;  %v4617_v42 = vpop.f32.mrf.mxu1 }
 0x33a   :  { %v4622_v8 = vpop.f32.mrf.mxu0 }
 0x33b   :  { %v3544_v44 = vrot.slane %v4097_v29, %v5890_v9  ;;  %v3386_v53 = vpop.f32.mrf.mxu1 }
 0x33c   :  { %v3343_v45 = vpop.f32.mrf.mxu0  ;;  %v4103_v43 = vpack.c.bf16 %v3386_v53, %v3202_v32 }
 0x33d   :  { %v3545_v4 = vcombine.low %v3537_v24, %v3544_v44  ;;  %v4628_v41 = vpop.f32.mrf.mxu1 }
 0x33e   :  { %v3673_v10 = vrot.slane %v4103_v43, %v5890_v9  ;;  %v4623_v48 = vpop.f32.mrf.mxu0 }
 0x33f   :  { %4645 = vmatmul.mubr.msk.bf16.vlgmr.msra.gmra.mxu0 %vm152_vm0, %v3545_v4  ;;  %v3389_v52 = vpop.f32.mrf.mxu1 }
 0x340   :  { %v3674_v38 = vcombine.low %v3666_v39, %v3673_v10  ;;  %v3432_v63 = vpop.f32.mrf.mxu0  ;;  %4656 = vmatprep.mubr.msk.bf16.mxu0 %vm152_vm0, %v3785_v25  ;;  %4655 = vmatpush3.bf16.msra.mxu0 %v5872_v20 }
 0x341   :  { %v4109_v56 = vpack.c.bf16 %v3432_v63, %v3248_v6  ;;  %v4629_v30 = vpop.f32.mrf.mxu1 }
 0x342   :  { %v4634_v62 = vpop.f32.mrf.mxu0  ;;  %4651 = vmatmul.mubr.msk.bf16.vlgmr.msra.gmra.mxu1 %vm152_vm0, %v3674_v38 }
 0x343   :  { %v3801_v59 = vrot.slane %v4109_v56, %v5890_v9  ;;  %v3478_v2 = vpop.f32.mrf.mxu1  ;;  %4661 = vmatpush3.bf16.msra.mxu1 %v5879_v5  ;;  %4662 = vmatprep.mubr.msk.bf16.mxu1 %vm152_vm0, %v3913_v40 }
 0x344   :  { %v3435_v20 = vpop.f32.mrf.mxu0  ;;  %v4115_v36 = vpack.c.bf16 %v3478_v2, %v3294_v31 }
 0x345   :  { %v3802_v22 = vcombine.low %v3794_v33, %v3801_v59  ;;  %v4640_v25 = vpop.f32.mrf.mxu1 }
 0x346   :  { %v3929_v46 = vrot.slane %v4115_v36, %v5890_v9  ;;  %v4635_v61 = vpop.f32.mrf.mxu0 }
 0x347   :  { %4657 = vmatmul.mubr.msk.bf16.vlgmr.msra.gmra.mxu0 %vm152_vm0, %v3802_v22  ;;  %v3481_v18 = vpop.f32.mrf.mxu1 }
 0x348   :  { %v3930_v27 = vcombine.low %v3922_v51, %v3929_v46 }
 0x349   :  { %v4641_v17 = vpop.f32.mrf.mxu1 }
 0x34a   :  { %4663 = vmatmul.mubr.msk.bf16.vlgmr.msra.gmra.mxu1 %vm152_vm0, %v3930_v27 }
 0x3ff   :  { %v4646_v5 = vpop.f32.mrf.mxu0 }
 0x400   :  { %v3611_v40 = vcombine.high %v4646_v5, %v4646_v5  ;;  %v3621_v57 = vadd.f32 %v4646_v5, %v4093_v54 }
 0x401   :  { %v3590_v37 = vpop.f32.mrf.mxu0 }
 0x402   :  { %v4652_v16 = vpop.f32.mrf.mxu1  ;;  %v3609_v60 = vcombine.high %v3590_v37, %v3590_v37  ;;  %v3622_v21 = vadd.f32 %v4093_v54, %v3611_v40  ;;  %v3617_v32 = vadd.f32 %v4093_v54, %v3590_v37 }
 0x403   :  { %v4647_v15 = vpop.f32.mrf.mxu0  ;;  %v3739_v9 = vcombine.high %v4652_v16, %v4652_v16  ;;  %v3749_v6 = vadd.f32 %v4652_v16, %v3621_v57 }
 0x404   :  { %v3612_v58 = vcombine.high %v4647_v15, %v4647_v15  ;;  %v3718_v0 = vpop.f32.mrf.mxu1  ;;  %v3618_v13 = vadd.f32 %v4093_v54, %v3609_v60  ;;  %v3623_v14 = vadd.f32 %v4647_v15, %v4093_v54 }
 0x405   :  { %v3593_v7 = vpop.f32.mrf.mxu0  ;;  %v3737_v28 = vcombine.high %v3718_v0, %v3718_v0  ;;  %v3750_v26 = vadd.f32 %v3739_v9, %v3622_v21  ;;  %v3745_v50 = vadd.f32 %v3718_v0, %v3617_v32 }
 0x406   :  { %v3610_v35 = vcombine.high %v3593_v7, %v3593_v7  ;;  %v4653_v19 = vpop.f32.mrf.mxu1  ;;  %v3624_v31 = vadd.f32 %v4093_v54, %v3612_v58  ;;  %v3619_v47 = vadd.f32 %v4093_v54, %v3593_v7 }
 0x407   :  { %v3740_v34 = vcombine.high %v4653_v19, %v4653_v19  ;;  %v4658_v23 = vpop.f32.mrf.mxu0  ;;  %v3746_v11 = vadd.f32 %v3737_v28, %v3618_v13  ;;  %v3751_v24 = vadd.f32 %v4653_v19, %v3623_v14 }
 0x408   :  { %v3867_v12 = vcombine.high %v4658_v23, %v4658_v23  ;;  %v3721_v49 = vpop.f32.mrf.mxu1  ;;  %v3877_v29 = vadd.f32 %v4658_v23, %v3749_v6  ;;  %v3620_v8 = vadd.f32 %v4093_v54, %v3610_v35 }
 0x409   :  { %v3738_v42 = vcombine.high %v3721_v49, %v3721_v49  ;;  %v3846_v55 = vpop.f32.mrf.mxu0  ;;  %v3752_v44 = vadd.f32 %v3740_v34, %v3624_v31  ;;  %v3747_v48 = vadd.f32 %v3721_v49, %v3619_v47 }
 0x40a   :  { %v3865_v53 = vcombine.high %v3846_v55, %v3846_v55  ;;  %v4664_v45 = vpop.f32.mrf.mxu1  ;;  %v3878_v43 = vadd.f32 %v3867_v12, %v3750_v26  ;;  %v3873_v4 = vadd.f32 %v3846_v55, %v3745_v50 }
 0x40b   :  { %v4659_v41 = vpop.f32.mrf.mxu0  ;;  %v3995_v39 = vcombine.high %v4664_v45, %v4664_v45  ;;  %v4005_v10 = vadd.f32 %v4664_v45, %v3877_v29  ;;  %v3748_v1 = vadd.f32 %v3738_v42, %v3620_v8 }
 0x40c   :  { %v3874_v52 = vadd.f32 %v3865_v53, %v3746_v11  ;;  %v3868_v38 = vcombine.high %v4659_v41, %v4659_v41  ;;  %v3974_v63 = vpop.f32.mrf.mxu1  ;;  %v3879_v59 = vadd.f32 %v4659_v41, %v3751_v24 }
 0x40d   :  { %v4006_v56 = vadd.f32 %v3995_v39, %v3878_v43  ;;  %v4013_v30 = vpack.c.bf16 %v4005_v10, %v4005_v10  ;;  %v3849_v3 = vpop.f32.mrf.mxu0  ;;  %v3993_v62 = vcombine.high %v3974_v63, %v3974_v63  ;;  %v4001_v33 = vadd.f32 %v3974_v63, %v3873_v4 }
 0x40e   :  { %v3880_v2 = vadd.f32 %v3868_v38, %v3752_v44  ;;  %v3866_v20 = vcombine.high %v3849_v3, %v3849_v3  ;;  %v3875_v36 = vadd.f32 %v3849_v3, %v3747_v48  ;;  %v4665_v22 = vpop.f32.mrf.mxu1 }
 0x40f   :  { %v4014_v25 = vpack.c.bf16 %v4006_v56, %v4006_v56  ;;  %4021 = vst [vmem:[%s5976_s6 + $0x8] sm:$0x3] %v4013_v30  ;;  %v4002_v51 = vadd.f32 %v3993_v62, %v3874_v52  ;;  %v4009_v46 = vpack.c.bf16 %v4001_v33, %v4001_v33  ;;  %v3996_v61 = vcombine.high %v4665_v22, %v4665_v22 }
 0x410   :  { %v3876_v18 = vadd.f32 %v3866_v20, %v3748_v1  ;;  %v4007_v27 = vadd.f32 %v4665_v22, %v3879_v59  ;;  %v3977_v17 = vpop.f32.mrf.mxu1 }
 0x411   :  { %4022 = vst [vmem:[%s5976_s6 + $0xa] sm:$0x3] %v4014_v25  ;;  %v4010_v5 = vpack.c.bf16 %v4002_v51, %v4002_v51  ;;  %4017 = vst [vmem:[%s5976_s6] sm:$0x3] %v4009_v46  ;;  %v4008_v37 = vadd.f32 %v3996_v61, %v3880_v2  ;;  %v3994_v54 = vcombine.high %v3977_v17, %v3977_v17 }
 0x412   :  { %v4003_v40 = vadd.f32 %v3977_v17, %v3875_v36  ;;  %v4015_v16 = vpack.c.bf16 %v4007_v27, %v4007_v27 }
 0x413   :  { %4018 = vst [vmem:[%s5976_s6 + $0x2] sm:$0x3] %v4010_v5  ;;  %v4016_v60 = vpack.c.bf16 %v4008_v37, %v4008_v37  ;;  %v4004_v15 = vadd.f32 %v3994_v54, %v3876_v18 }
 0x414   :  { %v4011_v58 = vpack.c.bf16 %v4003_v40, %v4003_v40  ;;  %4023 = vst [vmem:[%s5976_s6 + $0xc] sm:$0x3] %v4015_v16 }
 0x415   :  { %4024 = vst [vmem:[%s5976_s6 + $0xe] sm:$0x3] %v4016_v60  ;;  %v4012_v9 = vpack.c.bf16 %v4004_v15, %v4004_v15 }
 0x416   :  { %4019 = vst [vmem:[%s5976_s6 + $0x4] sm:$0x3] %v4011_v58 }
 0x417   :  { %4020 = vst [vmem:[%s5976_s6 + $0x6] sm:$0x3] %v4012_v9 }

</bundles_post_ra>
